<compile_context>
chip_gen: v7x
topology: tpu7x:2x2x1
jax: 0.10.0
libtpu: 0.0.40
codegen_flags: <defaults>
</compile_context>

<pallas_src>
import functools

import jax
import jax.numpy as jnp
from jax.experimental import pallas as pl
from jax.experimental.pallas import tpu as pltpu


def _round_up(x, m):
    return (x + m - 1) // m * m


def _default_vmem_limit_bytes():
    # ~3/4 of physical VMEM: ~96 MiB on v5e/v6e (128 MiB), ~48 MiB on v7x (64 MiB).
    try:
        cap = pltpu.get_tpu_info().vmem_capacity_bytes
    except Exception:
        cap = 64 * 1024 * 1024
    return (cap * 3) // 4


def _stage_kernel(x_ref, w_in_ref, b_in_ref, w_blk_ref, b_blk_ref,
                  w_out_ref, b_out_ref, o_ref, *, num_subtiles):
    # x_ref    : [TN, D_in_p]        row tile of the input (x dtype, e.g. f32)
    # w_in_ref : [D_in_p, D_h_p]     in_proj weight (bf16)   b_in_ref : [1, D_h_p]  (f32)
    # w_blk_ref: [M, D_h_p, D_h_p]   stacked block weights   b_blk_ref: [M, D_h_p]
    # w_out_ref: [D_h_p, D_out_p]    out_proj weight         b_out_ref: [1, D_out_p]
    # o_ref    : [TN, D_out_p]       output row tile
    tn = x_ref.shape[0]
    assert tn % num_subtiles == 0
    sub = tn // num_subtiles
    w_dtype = w_in_ref.dtype
    num_blocks = w_blk_ref.shape[0]

    b_in = b_in_ref[...]
    b_out = b_out_ref[...]

    # in_proj: one matmul per (independent) row sub-tile.
    hs = []
    for s in range(num_subtiles):
        x_s = x_ref[s * sub:(s + 1) * sub, :].astype(w_dtype)
        hs.append(jnp.dot(x_s, w_in_ref[...],
                          preferred_element_type=jnp.float32) + b_in)

    # Block chain: blocks OUTER, sub-tiles INNER -> consecutive MXU matmuls are
    # data-independent, hiding the result-drain + bias/cast epilogue latency.
    for i in range(num_blocks):
        w_i = w_blk_ref[i]
        b_i = b_blk_ref[i:i + 1, :]
        hs = [jnp.dot(h.astype(w_dtype), w_i,
                      preferred_element_type=jnp.float32) + b_i
              for h in hs]

    # out_proj + lane-dense store per sub-tile.
    for s in range(num_subtiles):
        out_s = jnp.dot(hs[s].astype(w_dtype), w_out_ref[...],
                        preferred_element_type=jnp.float32) + b_out
        o_ref[s * sub:(s + 1) * sub, :] = out_s.astype(o_ref.dtype)


def prepare_stage_params(w_in, b_in, w_blk, b_blk, w_out, b_out,
                         *, weight_dtype=jnp.bfloat16):
    """Pad feature dims to multiples of 128 and cast weights ONCE (outside the hot path)."""
    d_in, d_h = w_in.shape
    d_out = w_out.shape[1]
    d_in_p = _round_up(d_in, 128)
    d_h_p = _round_up(d_h, 128)
    d_out_p = _round_up(d_out, 128)

    def cast_w(a):
        return a.astype(weight_dtype)

    return dict(
        w_in=cast_w(jnp.pad(w_in, ((0, d_in_p - d_in), (0, d_h_p - d_h)))),
        b_in=jnp.pad(b_in.reshape(1, -1), ((0, 0), (0, d_h_p - d_h))).astype(jnp.float32),
        w_blk=cast_w(jnp.pad(w_blk, ((0, 0), (0, d_h_p - d_h), (0, d_h_p - d_h)))),
        b_blk=jnp.pad(b_blk, ((0, 0), (0, d_h_p - d_h))).astype(jnp.float32),
        w_out=cast_w(jnp.pad(w_out, ((0, d_h_p - d_h), (0, d_out_p - d_out)))),
        b_out=jnp.pad(b_out.reshape(1, -1), ((0, 0), (0, d_out_p - d_out))).astype(jnp.float32),
        d_in=d_in, d_out=d_out,
    )


def stage_forward(x, params, *, tile_n_max=512, num_subtiles=2,
                  vmem_limit_bytes=None, out_dtype=None):
    """x: [N, D_in]; params: output of prepare_stage_params (padded / pre-cast)."""
    n, d_in = x.shape
    assert d_in == params["d_in"], "x feature dim does not match prepared weights"
    w_in, b_in = params["w_in"], params["b_in"]
    w_blk, b_blk = params["w_blk"], params["b_blk"]
    w_out, b_out = params["w_out"], params["b_out"]
    d_in_p, d_h_p = w_in.shape
    d_out_p = w_out.shape[1]
    m = w_blk.shape[0]
    d_out = params["d_out"]
    out_dtype = out_dtype or x.dtype
    if vmem_limit_bytes is None:
        vmem_limit_bytes = _default_vmem_limit_bytes()

    # Row tiling: >= 2 grid steps (both v7x TensorCores busy on the "parallel"
    # axis), even step count when split further, and tn ~= ceil(n/steps)
    # rounded to the sub-tile granularity to minimise padded-row dead work.
    steps = max(2, pl.cdiv(n, tile_n_max))
    if steps > 2 and steps % 2:
        steps += 1
    row_gran = 8 * max(1, num_subtiles)
    tn = _round_up(pl.cdiv(n, steps), row_gran)
    n_p = steps * tn

    x_p = jnp.pad(x, ((0, n_p - n), (0, d_in_p - d_in)))

    # VMEM accounting with the buffering actually requested:
    #   weights single-buffered (Buffered(1)), x/out row tiles double-buffered.
    weight_bytes = sum(a.size * a.dtype.itemsize
                       for a in (w_in, b_in, w_blk, b_blk, w_out, b_out))
    io_bytes = 2 * tn * d_in_p * x_p.dtype.itemsize \
        + 2 * tn * d_out_p * jnp.dtype(out_dtype).itemsize
    assert weight_bytes + io_bytes < 0.9 * vmem_limit_bytes, (
        "weight stack + row tiles exceed the VMEM budget; add a D tiling axis "
        "or shrink tile_n_max")

    kernel = functools.partial(_stage_kernel, num_subtiles=num_subtiles)

    def build(single_buffer_weights):
        def w_spec(shape):
            zero = (0,) * len(shape)
            if single_buffer_weights:
                return pl.BlockSpec(shape, lambda i, _z=zero: _z,
                                    pipeline_mode=pl.Buffered(1))
            return pl.BlockSpec(shape, lambda i, _z=zero: _z)

        in_specs = [
            pl.BlockSpec((tn, d_in_p), lambda i: (i, 0)),   # x: tiled over N
            w_spec((d_in_p, d_h_p)),                        # in_proj W (resident)
            w_spec((1, d_h_p)),                             # in_proj b
            w_spec((m, d_h_p, d_h_p)),                      # block Ws (resident)
            w_spec((m, d_h_p)),                             # block bs
            w_spec((d_h_p, d_out_p)),                       # out_proj W
            w_spec((1, d_out_p)),                           # out_proj b
        ]
        return pl.pallas_call(
            kernel,
            out_shape=jax.ShapeDtypeStruct((n_p, d_out_p), out_dtype),
            grid_spec=pltpu.PrefetchScalarGridSpec(
                num_scalar_prefetch=0,
                grid=(steps,),
                in_specs=in_specs,
                out_specs=pl.BlockSpec((tn, d_out_p), lambda i: (i, 0)),
            ),
            compiler_params=pltpu.CompilerParams(
                dimension_semantics=("parallel",),
                vmem_limit_bytes=vmem_limit_bytes,
            ),
        )

    args = (x_p, w_in, b_in, w_blk, b_blk, w_out, b_out)
    try:
        out = build(True)(*args)
    except Exception:
        # Fallback: default double-buffered weights if this JAX version rejects
        # Buffered(1); correctness is identical, only VMEM footprint differs.
        out = build(False)(*args)

    return out[:n, :d_out]


def _reference(x, w_in, b_in, w_blk, b_blk, w_out, b_out, *, weight_dtype=jnp.float32):
    # Plain-JAX mirror of Stage.forward (in_proj -> blocks -> out_proj) using
    # the same weight dtype / f32-accumulation numerics as the kernel.
    wd = weight_dtype
    h = jnp.dot(x.astype(wd), w_in.astype(wd),
                preferred_element_type=jnp.float32) + b_in
    for i in range(w_blk.shape[0]):
        h = jnp.dot(h.astype(wd), w_blk[i].astype(wd),
                    preferred_element_type=jnp.float32) + b_blk[i]
    return jnp.dot(h.astype(wd), w_out.astype(wd),
                   preferred_element_type=jnp.float32) + b_out


if __name__ == "__main__":
    key = jax.random.PRNGKey(0)
    # num_feats, in/hidden/out feature dims, num_blocks (deliberately not all
    # 128-aligned to exercise the wrapper-side padding + final slicing).
    N, D_IN, D_H, D_OUT, NUM_BLOCKS = 300, 96, 128, 64, 3

    ks = jax.random.split(key, 7)
    x = jax.random.normal(ks[0], (N, D_IN), jnp.float32)
    w_in = jax.random.normal(ks[1], (D_IN, D_H), jnp.float32) * (D_IN ** -0.5)
    b_in = jax.random.normal(ks[2], (D_H,), jnp.float32) * 0.1
    w_blk = jax.random.normal(ks[3], (NUM_BLOCKS, D_H, D_H), jnp.float32) * (D_H ** -0.5)
    b_blk = jax.random.normal(ks[4], (NUM_BLOCKS, D_H), jnp.float32) * 0.1
    w_out = jax.random.normal(ks[5], (D_H, D_OUT), jnp.float32) * (D_H ** -0.5)
    b_out = jax.random.normal(ks[6], (D_OUT,), jnp.float32) * 0.1

    # Pad + cast the weight stack once (outside the hot path), then run.
    params = prepare_stage_params(w_in, b_in, w_blk, b_blk, w_out, b_out,
                                  weight_dtype=jnp.bfloat16)
    out = stage_forward(x, params, tile_n_max=512, num_subtiles=2)
    out = jax.block_until_ready(out)

    ref = _reference(x, w_in, b_in, w_blk, b_blk, w_out, b_out,
                     weight_dtype=jnp.bfloat16)
    assert out.shape == (N, D_OUT)
    assert jnp.allclose(out, ref, atol=1e-2, rtol=1e-2), \
        float(jnp.max(jnp.abs(out - ref)))

    print("KERNEL_OK")
</pallas_src>

<mosaic_0001>
module attributes {stable_mosaic.version = 11 : i64} {
  func.func @_stage_kernel(%arg0: i32, %arg1: memref<160x128xf32, #tpu.memory_space<vmem>>, %arg2: memref<128x128xbf16, #tpu.memory_space<vmem>>, %arg3: memref<1x128xf32, #tpu.memory_space<vmem>>, %arg4: memref<3x128x128xbf16, #tpu.memory_space<vmem>>, %arg5: memref<3x128xf32, #tpu.memory_space<vmem>>, %arg6: memref<128x128xbf16, #tpu.memory_space<vmem>>, %arg7: memref<1x128xf32, #tpu.memory_space<vmem>>, %arg8: memref<160x128xf32, #tpu.memory_space<vmem>>) attributes {dimension_semantics = [#tpu.dimension_semantics<parallel>], iteration_bounds = array<i64: 2>, scalar_prefetch = 0 : i64, scratch_operands = 0 : i64, tpu.core_type = #tpu.core_type<tc>, window_params = [{transform_indices = @transform_0, window_bounds = array<i64: 160, 128>}, {pipeline_mode = #tpu.pipeline_mode<synchronous>, transform_indices = @transform_1, window_bounds = array<i64: 128, 128>}, {pipeline_mode = #tpu.pipeline_mode<synchronous>, transform_indices = @transform_2, window_bounds = array<i64: 1, 128>}, {pipeline_mode = #tpu.pipeline_mode<synchronous>, transform_indices = @transform_3, window_bounds = array<i64: 3, 128, 128>}, {pipeline_mode = #tpu.pipeline_mode<synchronous>, transform_indices = @transform_4, window_bounds = array<i64: 3, 128>}, {pipeline_mode = #tpu.pipeline_mode<synchronous>, transform_indices = @transform_5, window_bounds = array<i64: 128, 128>}, {pipeline_mode = #tpu.pipeline_mode<synchronous>, transform_indices = @transform_6, window_bounds = array<i64: 1, 128>}, {transform_indices = @transform_7, window_bounds = array<i64: 160, 128>}]} {
    %c0 = arith.constant 0 : index
    %c0_0 = arith.constant 0 : index
    %0 = vector.load %arg3[%c0, %c0_0] : memref<1x128xf32, #tpu.memory_space<vmem>>, vector<1x128xf32>
    %c0_1 = arith.constant 0 : index
    %c0_2 = arith.constant 0 : index
    %1 = vector.load %arg7[%c0_1, %c0_2] : memref<1x128xf32, #tpu.memory_space<vmem>>, vector<1x128xf32>
    %c0_3 = arith.constant 0 : index
    %c0_4 = arith.constant 0 : index
    %2 = vector.load %arg1[%c0_3, %c0_4] : memref<160x128xf32, #tpu.memory_space<vmem>>, vector<80x128xf32>
    %3 = arith.truncf %2 : vector<80x128xf32> to vector<80x128xbf16>
    %c0_5 = arith.constant 0 : index
    %c0_6 = arith.constant 0 : index
    %4 = vector.load %arg2[%c0_5, %c0_6] : memref<128x128xbf16, #tpu.memory_space<vmem>>, vector<128x128xbf16>
    %cst = arith.constant dense<0.000000e+00> : vector<80x128xf32>
    %5 = tpu.matmul %3, %4, %cst {dimension_numbers = #tpu.dot_dimension_numbers<[1], [0], [0], [1], [0, 0, 1, 1], [], []>} : vector<80x128xbf16>, vector<128x128xbf16>, vector<80x128xf32> -> vector<80x128xf32>
    %6 = vector.broadcast %0 : vector<1x128xf32> to vector<80x128xf32>
    %7 = arith.addf %5, %6 : vector<80x128xf32>
    %c80 = arith.constant 80 : index
    %c0_7 = arith.constant 0 : index
    %8 = vector.load %arg1[%c80, %c0_7] : memref<160x128xf32, #tpu.memory_space<vmem>>, vector<80x128xf32>
    %9 = arith.truncf %8 : vector<80x128xf32> to vector<80x128xbf16>
    %c0_8 = arith.constant 0 : index
    %c0_9 = arith.constant 0 : index
    %10 = vector.load %arg2[%c0_8, %c0_9] : memref<128x128xbf16, #tpu.memory_space<vmem>>, vector<128x128xbf16>
    %cst_10 = arith.constant dense<0.000000e+00> : vector<80x128xf32>
    %11 = tpu.matmul %9, %10, %cst_10 {dimension_numbers = #tpu.dot_dimension_numbers<[1], [0], [0], [1], [0, 0, 1, 1], [], []>} : vector<80x128xbf16>, vector<128x128xbf16>, vector<80x128xf32> -> vector<80x128xf32>
    %12 = vector.broadcast %0 : vector<1x128xf32> to vector<80x128xf32>
    %13 = arith.addf %11, %12 : vector<80x128xf32>
    %c0_11 = arith.constant 0 : index
    %c0_12 = arith.constant 0 : index
    %c0_13 = arith.constant 0 : index
    %14 = vector.load %arg4[%c0_11, %c0_12, %c0_13] : memref<3x128x128xbf16, #tpu.memory_space<vmem>>, vector<1x128x128xbf16>
    %15 = vector.shape_cast %14 : vector<1x128x128xbf16> to vector<128x128xbf16>
    %c0_14 = arith.constant 0 : index
    %c0_15 = arith.constant 0 : index
    %16 = vector.load %arg5[%c0_14, %c0_15] : memref<3x128xf32, #tpu.memory_space<vmem>>, vector<1x128xf32>
    %17 = arith.truncf %7 : vector<80x128xf32> to vector<80x128xbf16>
    %cst_16 = arith.constant dense<0.000000e+00> : vector<80x128xf32>
    %18 = tpu.matmul %17, %15, %cst_16 {dimension_numbers = #tpu.dot_dimension_numbers<[1], [0], [0], [1], [0, 0, 1, 1], [], []>} : vector<80x128xbf16>, vector<128x128xbf16>, vector<80x128xf32> -> vector<80x128xf32>
    %19 = vector.broadcast %16 : vector<1x128xf32> to vector<80x128xf32>
    %20 = arith.addf %18, %19 : vector<80x128xf32>
    %21 = arith.truncf %13 : vector<80x128xf32> to vector<80x128xbf16>
    %cst_17 = arith.constant dense<0.000000e+00> : vector<80x128xf32>
    %22 = tpu.matmul %21, %15, %cst_17 {dimension_numbers = #tpu.dot_dimension_numbers<[1], [0], [0], [1], [0, 0, 1, 1], [], []>} : vector<80x128xbf16>, vector<128x128xbf16>, vector<80x128xf32> -> vector<80x128xf32>
    %23 = vector.broadcast %16 : vector<1x128xf32> to vector<80x128xf32>
    %24 = arith.addf %22, %23 : vector<80x128xf32>
    %c1 = arith.constant 1 : index
    %c0_18 = arith.constant 0 : index
    %c0_19 = arith.constant 0 : index
    %25 = vector.load %arg4[%c1, %c0_18, %c0_19] : memref<3x128x128xbf16, #tpu.memory_space<vmem>>, vector<1x128x128xbf16>
    %26 = vector.shape_cast %25 : vector<1x128x128xbf16> to vector<128x128xbf16>
    %c1_20 = arith.constant 1 : index
    %c0_21 = arith.constant 0 : index
    %27 = vector.load %arg5[%c1_20, %c0_21] : memref<3x128xf32, #tpu.memory_space<vmem>>, vector<1x128xf32>
    %28 = arith.truncf %20 : vector<80x128xf32> to vector<80x128xbf16>
    %cst_22 = arith.constant dense<0.000000e+00> : vector<80x128xf32>
    %29 = tpu.matmul %28, %26, %cst_22 {dimension_numbers = #tpu.dot_dimension_numbers<[1], [0], [0], [1], [0, 0, 1, 1], [], []>} : vector<80x128xbf16>, vector<128x128xbf16>, vector<80x128xf32> -> vector<80x128xf32>
    %30 = vector.broadcast %27 : vector<1x128xf32> to vector<80x128xf32>
    %31 = arith.addf %29, %30 : vector<80x128xf32>
    %32 = arith.truncf %24 : vector<80x128xf32> to vector<80x128xbf16>
    %cst_23 = arith.constant dense<0.000000e+00> : vector<80x128xf32>
    %33 = tpu.matmul %32, %26, %cst_23 {dimension_numbers = #tpu.dot_dimension_numbers<[1], [0], [0], [1], [0, 0, 1, 1], [], []>} : vector<80x128xbf16>, vector<128x128xbf16>, vector<80x128xf32> -> vector<80x128xf32>
    %34 = vector.broadcast %27 : vector<1x128xf32> to vector<80x128xf32>
    %35 = arith.addf %33, %34 : vector<80x128xf32>
    %c2 = arith.constant 2 : index
    %c0_24 = arith.constant 0 : index
    %c0_25 = arith.constant 0 : index
    %36 = vector.load %arg4[%c2, %c0_24, %c0_25] : memref<3x128x128xbf16, #tpu.memory_space<vmem>>, vector<1x128x128xbf16>
    %37 = vector.shape_cast %36 : vector<1x128x128xbf16> to vector<128x128xbf16>
    %c2_26 = arith.constant 2 : index
    %c0_27 = arith.constant 0 : index
    %38 = vector.load %arg5[%c2_26, %c0_27] : memref<3x128xf32, #tpu.memory_space<vmem>>, vector<1x128xf32>
    %39 = arith.truncf %31 : vector<80x128xf32> to vector<80x128xbf16>
    %cst_28 = arith.constant dense<0.000000e+00> : vector<80x128xf32>
    %40 = tpu.matmul %39, %37, %cst_28 {dimension_numbers = #tpu.dot_dimension_numbers<[1], [0], [0], [1], [0, 0, 1, 1], [], []>} : vector<80x128xbf16>, vector<128x128xbf16>, vector<80x128xf32> -> vector<80x128xf32>
    %41 = vector.broadcast %38 : vector<1x128xf32> to vector<80x128xf32>
    %42 = arith.addf %40, %41 : vector<80x128xf32>
    %43 = arith.truncf %35 : vector<80x128xf32> to vector<80x128xbf16>
    %cst_29 = arith.constant dense<0.000000e+00> : vector<80x128xf32>
    %44 = tpu.matmul %43, %37, %cst_29 {dimension_numbers = #tpu.dot_dimension_numbers<[1], [0], [0], [1], [0, 0, 1, 1], [], []>} : vector<80x128xbf16>, vector<128x128xbf16>, vector<80x128xf32> -> vector<80x128xf32>
    %45 = vector.broadcast %38 : vector<1x128xf32> to vector<80x128xf32>
    %46 = arith.addf %44, %45 : vector<80x128xf32>
    %47 = arith.truncf %42 : vector<80x128xf32> to vector<80x128xbf16>
    %c0_30 = arith.constant 0 : index
    %c0_31 = arith.constant 0 : index
    %48 = vector.load %arg6[%c0_30, %c0_31] : memref<128x128xbf16, #tpu.memory_space<vmem>>, vector<128x128xbf16>
    %cst_32 = arith.constant dense<0.000000e+00> : vector<80x128xf32>
    %49 = tpu.matmul %47, %48, %cst_32 {dimension_numbers = #tpu.dot_dimension_numbers<[1], [0], [0], [1], [0, 0, 1, 1], [], []>} : vector<80x128xbf16>, vector<128x128xbf16>, vector<80x128xf32> -> vector<80x128xf32>
    %50 = vector.broadcast %1 : vector<1x128xf32> to vector<80x128xf32>
    %51 = arith.addf %49, %50 : vector<80x128xf32>
    %c0_33 = arith.constant 0 : index
    %c0_34 = arith.constant 0 : index
    %52 = vector.load %arg8[%c0_33, %c0_34] : memref<160x128xf32, #tpu.memory_space<vmem>>, vector<80x128xf32>
    tpu.vector_store %arg8[%c0_33, %c0_34], %51 {strides = array<i32>} : memref<160x128xf32, #tpu.memory_space<vmem>>, vector<80x128xf32>,
    %53 = arith.truncf %46 : vector<80x128xf32> to vector<80x128xbf16>
    %c0_35 = arith.constant 0 : index
    %c0_36 = arith.constant 0 : index
    %54 = vector.load %arg6[%c0_35, %c0_36] : memref<128x128xbf16, #tpu.memory_space<vmem>>, vector<128x128xbf16>
    %cst_37 = arith.constant dense<0.000000e+00> : vector<80x128xf32>
    %55 = tpu.matmul %53, %54, %cst_37 {dimension_numbers = #tpu.dot_dimension_numbers<[1], [0], [0], [1], [0, 0, 1, 1], [], []>} : vector<80x128xbf16>, vector<128x128xbf16>, vector<80x128xf32> -> vector<80x128xf32>
    %56 = vector.broadcast %1 : vector<1x128xf32> to vector<80x128xf32>
    %57 = arith.addf %55, %56 : vector<80x128xf32>
    %c80_38 = arith.constant 80 : index
    %c0_39 = arith.constant 0 : index
    %58 = vector.load %arg8[%c80_38, %c0_39] : memref<160x128xf32, #tpu.memory_space<vmem>>, vector<80x128xf32>
    tpu.vector_store %arg8[%c80_38, %c0_39], %57 {strides = array<i32>} : memref<160x128xf32, #tpu.memory_space<vmem>>, vector<80x128xf32>,
    return
  }
  func.func @transform_0(%arg0: i32) -> (i32, i32) {
    %c0_i32 = arith.constant 0 : i32
    %c0_i32_0 = arith.constant 0 : i32
    return %arg0, %c0_i32 : i32, i32
  }
  func.func @transform_1(%arg0: i32) -> (i32, i32) {
    %c0_i32 = arith.constant 0 : i32
    %c0_i32_0 = arith.constant 0 : i32
    %c0_i32_1 = arith.constant 0 : i32
    return %c0_i32, %c0_i32_0 : i32, i32
  }
  func.func @transform_2(%arg0: i32) -> (i32, i32) {
    %c0_i32 = arith.constant 0 : i32
    %c0_i32_0 = arith.constant 0 : i32
    %c0_i32_1 = arith.constant 0 : i32
    return %c0_i32, %c0_i32_0 : i32, i32
  }
  func.func @transform_3(%arg0: i32) -> (i32, i32, i32) {
    %c0_i32 = arith.constant 0 : i32
    %c0_i32_0 = arith.constant 0 : i32
    %c0_i32_1 = arith.constant 0 : i32
    %c0_i32_2 = arith.constant 0 : i32
    return %c0_i32, %c0_i32_0, %c0_i32_1 : i32, i32, i32
  }
  func.func @transform_4(%arg0: i32) -> (i32, i32) {
    %c0_i32 = arith.constant 0 : i32
    %c0_i32_0 = arith.constant 0 : i32
    %c0_i32_1 = arith.constant 0 : i32
    return %c0_i32, %c0_i32_0 : i32, i32
  }
  func.func @transform_5(%arg0: i32) -> (i32, i32) {
    %c0_i32 = arith.constant 0 : i32
    %c0_i32_0 = arith.constant 0 : i32
    %c0_i32_1 = arith.constant 0 : i32
    return %c0_i32, %c0_i32_0 : i32, i32
  }
  func.func @transform_6(%arg0: i32) -> (i32, i32) {
    %c0_i32 = arith.constant 0 : i32
    %c0_i32_0 = arith.constant 0 : i32
    %c0_i32_1 = arith.constant 0 : i32
    return %c0_i32, %c0_i32_0 : i32, i32
  }
  func.func @transform_7(%arg0: i32) -> (i32, i32) {
    %c0_i32 = arith.constant 0 : i32
    %c0_i32_0 = arith.constant 0 : i32
    return %arg0, %c0_i32 : i32, i32
  }
}

module attributes {stable_mosaic.version = 11 : i64} {
  func.func @_stage_kernel(%arg0: i32, %arg1: memref<160x128xf32, #tpu.memory_space<vmem>>, %arg2: memref<128x128xbf16, #tpu.memory_space<vmem>>, %arg3: memref<1x128xf32, #tpu.memory_space<vmem>>, %arg4: memref<3x128x128xbf16, #tpu.memory_space<vmem>>, %arg5: memref<3x128xf32, #tpu.memory_space<vmem>>, %arg6: memref<128x128xbf16, #tpu.memory_space<vmem>>, %arg7: memref<1x128xf32, #tpu.memory_space<vmem>>, %arg8: memref<160x128xf32, #tpu.memory_space<vmem>>) attributes {dimension_semantics = [#tpu.dimension_semantics<parallel>], iteration_bounds = array<i64: 2>, scalar_prefetch = 0 : i64, scratch_operands = 0 : i64, tpu.core_type = #tpu.core_type<tc>, window_params = [{transform_indices = @transform_0, window_bounds = array<i64: 160, 128>}, {pipeline_mode = #tpu.pipeline_mode<synchronous>, transform_indices = @transform_1, window_bounds = array<i64: 128, 128>}, {pipeline_mode = #tpu.pipeline_mode<synchronous>, transform_indices = @transform_2, window_bounds = array<i64: 1, 128>}, {pipeline_mode = #tpu.pipeline_mode<synchronous>, transform_indices = @transform_3, window_bounds = array<i64: 3, 128, 128>}, {pipeline_mode = #tpu.pipeline_mode<synchronous>, transform_indices = @transform_4, window_bounds = array<i64: 3, 128>}, {pipeline_mode = #tpu.pipeline_mode<synchronous>, transform_indices = @transform_5, window_bounds = array<i64: 128, 128>}, {pipeline_mode = #tpu.pipeline_mode<synchronous>, transform_indices = @transform_6, window_bounds = array<i64: 1, 128>}, {transform_indices = @transform_7, window_bounds = array<i64: 160, 128>}]} {
    %c0 = arith.constant 0 : index
    %c0_0 = arith.constant 0 : index
    %0 = vector.load %arg3[%c0, %c0_0] : memref<1x128xf32, #tpu.memory_space<vmem>>, vector<1x128xf32>
    %c0_1 = arith.constant 0 : index
    %c0_2 = arith.constant 0 : index
    %1 = vector.load %arg7[%c0_1, %c0_2] : memref<1x128xf32, #tpu.memory_space<vmem>>, vector<1x128xf32>
    %c0_3 = arith.constant 0 : index
    %c0_4 = arith.constant 0 : index
    %2 = vector.load %arg1[%c0_3, %c0_4] : memref<160x128xf32, #tpu.memory_space<vmem>>, vector<80x128xf32>
    %3 = arith.truncf %2 : vector<80x128xf32> to vector<80x128xbf16>
    %c0_5 = arith.constant 0 : index
    %c0_6 = arith.constant 0 : index
    %4 = vector.load %arg2[%c0_5, %c0_6] : memref<128x128xbf16, #tpu.memory_space<vmem>>, vector<128x128xbf16>
    %cst = arith.constant dense<0.000000e+00> : vector<80x128xf32>
    %5 = tpu.matmul %3, %4, %cst {dimension_numbers = #tpu.dot_dimension_numbers<[1], [0], [0], [1], [0, 0, 1, 1], [], []>} : vector<80x128xbf16>, vector<128x128xbf16>, vector<80x128xf32> -> vector<80x128xf32>
    %6 = vector.broadcast %0 : vector<1x128xf32> to vector<80x128xf32>
    %7 = arith.addf %5, %6 : vector<80x128xf32>
    %c80 = arith.constant 80 : index
    %c0_7 = arith.constant 0 : index
    %8 = vector.load %arg1[%c80, %c0_7] : memref<160x128xf32, #tpu.memory_space<vmem>>, vector<80x128xf32>
    %9 = arith.truncf %8 : vector<80x128xf32> to vector<80x128xbf16>
    %c0_8 = arith.constant 0 : index
    %c0_9 = arith.constant 0 : index
    %10 = vector.load %arg2[%c0_8, %c0_9] : memref<128x128xbf16, #tpu.memory_space<vmem>>, vector<128x128xbf16>
    %cst_10 = arith.constant dense<0.000000e+00> : vector<80x128xf32>
    %11 = tpu.matmul %9, %10, %cst_10 {dimension_numbers = #tpu.dot_dimension_numbers<[1], [0], [0], [1], [0, 0, 1, 1], [], []>} : vector<80x128xbf16>, vector<128x128xbf16>, vector<80x128xf32> -> vector<80x128xf32>
    %12 = vector.broadcast %0 : vector<1x128xf32> to vector<80x128xf32>
    %13 = arith.addf %11, %12 : vector<80x128xf32>
    %c0_11 = arith.constant 0 : index
    %c0_12 = arith.constant 0 : index
    %c0_13 = arith.constant 0 : index
    %14 = vector.load %arg4[%c0_11, %c0_12, %c0_13] : memref<3x128x128xbf16, #tpu.memory_space<vmem>>, vector<1x128x128xbf16>
    %15 = vector.shape_cast %14 : vector<1x128x128xbf16> to vector<128x128xbf16>
    %c0_14 = arith.constant 0 : index
    %c0_15 = arith.constant 0 : index
    %16 = vector.load %arg5[%c0_14, %c0_15] : memref<3x128xf32, #tpu.memory_space<vmem>>, vector<1x128xf32>
    %17 = arith.truncf %7 : vector<80x128xf32> to vector<80x128xbf16>
    %cst_16 = arith.constant dense<0.000000e+00> : vector<80x128xf32>
    %18 = tpu.matmul %17, %15, %cst_16 {dimension_numbers = #tpu.dot_dimension_numbers<[1], [0], [0], [1], [0, 0, 1, 1], [], []>} : vector<80x128xbf16>, vector<128x128xbf16>, vector<80x128xf32> -> vector<80x128xf32>
    %19 = vector.broadcast %16 : vector<1x128xf32> to vector<80x128xf32>
    %20 = arith.addf %18, %19 : vector<80x128xf32>
    %21 = arith.truncf %13 : vector<80x128xf32> to vector<80x128xbf16>
    %cst_17 = arith.constant dense<0.000000e+00> : vector<80x128xf32>
    %22 = tpu.matmul %21, %15, %cst_17 {dimension_numbers = #tpu.dot_dimension_numbers<[1], [0], [0], [1], [0, 0, 1, 1], [], []>} : vector<80x128xbf16>, vector<128x128xbf16>, vector<80x128xf32> -> vector<80x128xf32>
    %23 = vector.broadcast %16 : vector<1x128xf32> to vector<80x128xf32>
    %24 = arith.addf %22, %23 : vector<80x128xf32>
    %c1 = arith.constant 1 : index
    %c0_18 = arith.constant 0 : index
    %c0_19 = arith.constant 0 : index
    %25 = vector.load %arg4[%c1, %c0_18, %c0_19] : memref<3x128x128xbf16, #tpu.memory_space<vmem>>, vector<1x128x128xbf16>
    %26 = vector.shape_cast %25 : vector<1x128x128xbf16> to vector<128x128xbf16>
    %c1_20 = arith.constant 1 : index
    %c0_21 = arith.constant 0 : index
    %27 = vector.load %arg5[%c1_20, %c0_21] : memref<3x128xf32, #tpu.memory_space<vmem>>, vector<1x128xf32>
    %28 = arith.truncf %20 : vector<80x128xf32> to vector<80x128xbf16>
    %cst_22 = arith.constant dense<0.000000e+00> : vector<80x128xf32>
    %29 = tpu.matmul %28, %26, %cst_22 {dimension_numbers = #tpu.dot_dimension_numbers<[1], [0], [0], [1], [0, 0, 1, 1], [], []>} : vector<80x128xbf16>, vector<128x128xbf16>, vector<80x128xf32> -> vector<80x128xf32>
    %30 = vector.broadcast %27 : vector<1x128xf32> to vector<80x128xf32>
    %31 = arith.addf %29, %30 : vector<80x128xf32>
    %32 = arith.truncf %24 : vector<80x128xf32> to vector<80x128xbf16>
    %cst_23 = arith.constant dense<0.000000e+00> : vector<80x128xf32>
    %33 = tpu.matmul %32, %26, %cst_23 {dimension_numbers = #tpu.dot_dimension_numbers<[1], [0], [0], [1], [0, 0, 1, 1], [], []>} : vector<80x128xbf16>, vector<128x128xbf16>, vector<80x128xf32> -> vector<80x128xf32>
    %34 = vector.broadcast %27 : vector<1x128xf32> to vector<80x128xf32>
    %35 = arith.addf %33, %34 : vector<80x128xf32>
    %c2 = arith.constant 2 : index
    %c0_24 = arith.constant 0 : index
    %c0_25 = arith.constant 0 : index
    %36 = vector.load %arg4[%c2, %c0_24, %c0_25] : memref<3x128x128xbf16, #tpu.memory_space<vmem>>, vector<1x128x128xbf16>
    %37 = vector.shape_cast %36 : vector<1x128x128xbf16> to vector<128x128xbf16>
    %c2_26 = arith.constant 2 : index
    %c0_27 = arith.constant 0 : index
    %38 = vector.load %arg5[%c2_26, %c0_27] : memref<3x128xf32, #tpu.memory_space<vmem>>, vector<1x128xf32>
    %39 = arith.truncf %31 : vector<80x128xf32> to vector<80x128xbf16>
    %cst_28 = arith.constant dense<0.000000e+00> : vector<80x128xf32>
    %40 = tpu.matmul %39, %37, %cst_28 {dimension_numbers = #tpu.dot_dimension_numbers<[1], [0], [0], [1], [0, 0, 1, 1], [], []>} : vector<80x128xbf16>, vector<128x128xbf16>, vector<80x128xf32> -> vector<80x128xf32>
    %41 = vector.broadcast %38 : vector<1x128xf32> to vector<80x128xf32>
    %42 = arith.addf %40, %41 : vector<80x128xf32>
    %43 = arith.truncf %35 : vector<80x128xf32> to vector<80x128xbf16>
    %cst_29 = arith.constant dense<0.000000e+00> : vector<80x128xf32>
    %44 = tpu.matmul %43, %37, %cst_29 {dimension_numbers = #tpu.dot_dimension_numbers<[1], [0], [0], [1], [0, 0, 1, 1], [], []>} : vector<80x128xbf16>, vector<128x128xbf16>, vector<80x128xf32> -> vector<80x128xf32>
    %45 = vector.broadcast %38 : vector<1x128xf32> to vector<80x128xf32>
    %46 = arith.addf %44, %45 : vector<80x128xf32>
    %47 = arith.truncf %42 : vector<80x128xf32> to vector<80x128xbf16>
    %c0_30 = arith.constant 0 : index
    %c0_31 = arith.constant 0 : index
    %48 = vector.load %arg6[%c0_30, %c0_31] : memref<128x128xbf16, #tpu.memory_space<vmem>>, vector<128x128xbf16>
    %cst_32 = arith.constant dense<0.000000e+00> : vector<80x128xf32>
    %49 = tpu.matmul %47, %48, %cst_32 {dimension_numbers = #tpu.dot_dimension_numbers<[1], [0], [0], [1], [0, 0, 1, 1], [], []>} : vector<80x128xbf16>, vector<128x128xbf16>, vector<80x128xf32> -> vector<80x128xf32>
    %50 = vector.broadcast %1 : vector<1x128xf32> to vector<80x128xf32>
    %51 = arith.addf %49, %50 : vector<80x128xf32>
    %c0_33 = arith.constant 0 : index
    %c0_34 = arith.constant 0 : index
    %52 = vector.load %arg8[%c0_33, %c0_34] : memref<160x128xf32, #tpu.memory_space<vmem>>, vector<80x128xf32>
    tpu.vector_store %arg8[%c0_33, %c0_34], %51 {strides = array<i32>} : memref<160x128xf32, #tpu.memory_space<vmem>>, vector<80x128xf32>,
    %53 = arith.truncf %46 : vector<80x128xf32> to vector<80x128xbf16>
    %c0_35 = arith.constant 0 : index
    %c0_36 = arith.constant 0 : index
    %54 = vector.load %arg6[%c0_35, %c0_36] : memref<128x128xbf16, #tpu.memory_space<vmem>>, vector<128x128xbf16>
    %cst_37 = arith.constant dense<0.000000e+00> : vector<80x128xf32>
    %55 = tpu.matmul %53, %54, %cst_37 {dimension_numbers = #tpu.dot_dimension_numbers<[1], [0], [0], [1], [0, 0, 1, 1], [], []>} : vector<80x128xbf16>, vector<128x128xbf16>, vector<80x128xf32> -> vector<80x128xf32>
    %56 = vector.broadcast %1 : vector<1x128xf32> to vector<80x128xf32>
    %57 = arith.addf %55, %56 : vector<80x128xf32>
    %c80_38 = arith.constant 80 : index
    %c0_39 = arith.constant 0 : index
    %58 = vector.load %arg8[%c80_38, %c0_39] : memref<160x128xf32, #tpu.memory_space<vmem>>, vector<80x128xf32>
    tpu.vector_store %arg8[%c80_38, %c0_39], %57 {strides = array<i32>} : memref<160x128xf32, #tpu.memory_space<vmem>>, vector<80x128xf32>,
    return
  }
  func.func @transform_0(%arg0: i32) -> (i32, i32) {
    %c0_i32 = arith.constant 0 : i32
    %c0_i32_0 = arith.constant 0 : i32
    return %arg0, %c0_i32 : i32, i32
  }
  func.func @transform_1(%arg0: i32) -> (i32, i32) {
    %c0_i32 = arith.constant 0 : i32
    %c0_i32_0 = arith.constant 0 : i32
    %c0_i32_1 = arith.constant 0 : i32
    return %c0_i32, %c0_i32_0 : i32, i32
  }
  func.func @transform_2(%arg0: i32) -> (i32, i32) {
    %c0_i32 = arith.constant 0 : i32
    %c0_i32_0 = arith.constant 0 : i32
    %c0_i32_1 = arith.constant 0 : i32
    return %c0_i32, %c0_i32_0 : i32, i32
  }
  func.func @transform_3(%arg0: i32) -> (i32, i32, i32) {
    %c0_i32 = arith.constant 0 : i32
    %c0_i32_0 = arith.constant 0 : i32
    %c0_i32_1 = arith.constant 0 : i32
    %c0_i32_2 = arith.constant 0 : i32
    return %c0_i32, %c0_i32_0, %c0_i32_1 : i32, i32, i32
  }
  func.func @transform_4(%arg0: i32) -> (i32, i32) {
    %c0_i32 = arith.constant 0 : i32
    %c0_i32_0 = arith.constant 0 : i32
    %c0_i32_1 = arith.constant 0 : i32
    return %c0_i32, %c0_i32_0 : i32, i32
  }
  func.func @transform_5(%arg0: i32) -> (i32, i32) {
    %c0_i32 = arith.constant 0 : i32
    %c0_i32_0 = arith.constant 0 : i32
    %c0_i32_1 = arith.constant 0 : i32
    return %c0_i32, %c0_i32_0 : i32, i32
  }
  func.func @transform_6(%arg0: i32) -> (i32, i32) {
    %c0_i32 = arith.constant 0 : i32
    %c0_i32_0 = arith.constant 0 : i32
    %c0_i32_1 = arith.constant 0 : i32
    return %c0_i32, %c0_i32_0 : i32, i32
  }
  func.func @transform_7(%arg0: i32) -> (i32, i32) {
    %c0_i32 = arith.constant 0 : i32
    %c0_i32_0 = arith.constant 0 : i32
    return %arg0, %c0_i32 : i32, i32
  }
}

</mosaic_0001>

<bundles_post_ra>
// kernel: tpu_custom_call.1
= control target key start
LH: loop header
LB: loop body
LE: loop exit
PB: predicated region body
PF: predicated region fallthrough
CT: control target
= control target key end

     0   :  { %12 = vsyncpa [#allocation3], 0  ;;  %s3254_s0 = inlined_call_operand.hbm [shape: f32[320,128], index: 0, kind: input, shape index: {}]   ;;  %s3255_s1 = inlined_call_operand.hbm [shape: bf16[128,128], index: 1, kind: input, shape index: {}]   ;;  %s3256_s2 = inlined_call_operand.vmem [shape: f32[1,128], index: 2, kind: input, shape index: {}]   ;;  %s3257_s3 = inlined_call_operand.hbm [shape: bf16[3,128,128], index: 3, kind: input, shape index: {}]   ;;  %s3258_s4 = inlined_call_operand.vmem [shape: f32[3,128], index: 4, kind: input, shape index: {}]   ;;  %s3259_s5 = inlined_call_operand.hbm [shape: bf16[128,128], index: 5, kind: input, shape index: {}]   ;;  %s3260_s6 = inlined_call_operand.vmem [shape: f32[1,128], index: 6, kind: input, shape index: {}]   ;;  %s3261_s7 = inlined_call_operand.hbm [shape: f32[320,128], index: 7, kind: output, shape index: {}]  }
   0x1   :  { %14 = vsyncpa [#allocation3 + $0x1], 0 }
   0x2   :  { %15 = vsyncpa [#allocation6], 0 }
   0x3   :  { %16 = vsyncpa [#allocation9], 0 }
   0x4   :  { %17 = vsyncpa [#allocation4], 0 }
   0x5   :  { %19 = vsyncpa [#allocation4 + $0x1], 0  ;;  %s2632_s24 = smov 0   ;;  %s2634_s25 = smov 0  }
   0x6   :  { %s2636_s26 = smov 0   ;;  %s2638_s27 = smov 0  }
   0x7 LB: > { %s2653_s28 = sadd.s32 4294967295, %s2577_s27   ;;  %s1695_s29 = sadd.s32 4294967294, %s2577_s27   ;;  %s2577_s27 = sphi %s2638_s27, %s3287_s27   ;;  %s2573_s26 = sphi %s2636_s26, %s3286_s26   ;;  %s2569_s25 = sphi %s2634_s25, %s3285_s25   ;;  %s2565_s24 = sphi %s2632_s24, %s3284_s24  }
   0x8   : > { %p45_p0 = scmp.ne.s32.totalorder %s2569_s25, %s2565_s24  ;;  %p3262_p1 = scmp.eq.s32.totalorder %s2653_s28, 0 }
   0x9   : > { %p201_p3 = scmp.eq.s32.totalorder %s1695_s29, 1  ;;  %p1696_p5 = scmp.ge.s32.totalorder %s2577_s27, 1 }
   0xa   : > { %p2662_p4 = por %p3262_p1, %p45_p0  ;;  %p208_p7 = scmp.lt.s32.totalorder %s2577_s27, 3 }
   0xb   : > { %p2667_p6 = por %p201_p3, %p45_p0  ;;  %s2579_s10 = smov [#allocation5]  }
   0xc   : > { %s3266_s30 = scalar_select %p2662_p4, 1, 0 }
   0xd   : > { %s3267_s8 = scalar_select %p2667_p6, 1, 0 }
   0xe   : > { %p2672_p8 = pnand %p1696_p5, %p208_p7  ;;  %s220_s11 = sshll.u32 %s2579_s10, 4  ;;  %s2676_s11 = int_to_ptr.vmem [resolvable:$true] %s220_s11 }
   0xf   : > { %3268 = sst [smem:[#allocation15_spill]] %s3267_s8  ;;  %s2580_s13 = smov [#allocation7]  }
  0x10   : > { %s3269_s9 = scalar_select %p2672_p8, 1, 0 }
  0x11   : > { %p2272_p9 = pneg %p2672_p8  ;;  %s236_s14 = sshll.u32 %s2580_s13, 4  ;;  %s2687_s14 = int_to_ptr.vmem [resolvable:$true] %s236_s14 }
  0x12   : > { %s2581_s15 = smov [#allocation8]   ;;  %s2389_s19 = scalar_lea.hbm %s3255_s1, 1024 }
  0x13   : > { %p2683_p11 = pnand %p2272_p9, %p3262_p1  ;;  %s2689_s16 = sshll.u32 %s2581_s15, 4  ;;  %s253_s16 = int_to_ptr.vmem [resolvable:$true] %s2689_s16 }
  0x14   : > { %p2390_p12 = scmp.ne.s32.totalorder %s3255_s1, %s2389_s19  ;;  %p2396_p5 = scmp.lt.u32.totalorder %s2389_s19, %s3255_s1 }
  0x15   : > { %p2699_p13 = pneg %p2683_p11 }
  0x17   : > { %p2392_p0 = pnand %p2699_p13, %p2390_p12 }
  0x19   : > { %p2393_p3 = pneg %p2392_p0 }
  0x1b   : > { %p2398_p7 = pnand %p2396_p5, %p2393_p3 }
  0x1d   : > { %2401 = shalt.err (!%p2398_p7)
}
  0x1e   : > { %s2402_s10 = scalar_lea.vmem %s2676_s11, 1024  ;;  %p2410_p2 = scmp.lt.s32.totalorder %s2676_s11, %s2676_s11 }
  0x1f   : > { %p2403_p9 = scmp.ne.s32.totalorder %s2676_s11, %s2402_s10  ;;  %p2411_p6 = scmp.lt.s32.totalorder %s2402_s10, %s2402_s10 }
  0x21   : > { %p2405_p10 = pnand %p2403_p9, %p2699_p13  ;;  %p2412_p12 = por %p2411_p6, %p2410_p2 }
  0x23   : > { %p2406_p1 = pneg %p2405_p10 }
  0x25   : > { %p2413_p0 = pnand %p2412_p12, %p2406_p1 }
  0x27   : > { %2416 = shalt.err (!%p2413_p0)
}
  0x28   : > { %s2582_s13 = smov 64   ;;  %s2583_s15 = smov 4  }
  0x29   : > { %2275 = dma.hbm_to_vmem [thread:$0]  (!%p2683_p11), %s3255_s1, 1024, %s2676_s11, [#allocation6], %s2582_s13, %s2582_s13, %s2583_s15  }
  0x2a   : > { %s2417_s21 = scalar_lea.hbm %s3257_s3, 3072 }
  0x2b   : > { %p2418_p1 = scmp.ne.s32.totalorder %s3257_s3, %s2417_s21  ;;  %p2424_p10 = scmp.lt.u32.totalorder %s2417_s21, %s3257_s3 }
  0x2d   : > { %p2420_p2 = pnand %p2418_p1, %p2699_p13 }
  0x2f   : > { %p2421_p6 = pneg %p2420_p2 }
  0x31   : > { %p2426_p3 = pnand %p2424_p10, %p2421_p6 }
  0x33   : > { %2429 = shalt.err (!%p2426_p3)
}
  0x34   : > { %s2430_s11 = scalar_lea.vmem %s2687_s14, 3072  ;;  %p2438_p12 = scmp.lt.s32.totalorder %s2687_s14, %s2687_s14 }
  0x35   : > { %p2431_p5 = scmp.ne.s32.totalorder %s2687_s14, %s2430_s11  ;;  %p2439_p0 = scmp.lt.s32.totalorder %s2430_s11, %s2430_s11 }
  0x37   : > { %p2433_p7 = pnand %p2431_p5, %p2699_p13  ;;  %p2440_p1 = por %p2439_p0, %p2438_p12 }
  0x39   : > { %p2434_p9 = pneg %p2433_p7 }
  0x3b   : > { %p2441_p2 = pnand %p2440_p1, %p2434_p9 }
  0x3d   : > { %2444 = shalt.err (!%p2441_p2)
}
  0x3e   : > { %2278 = dma.hbm_to_vmem [thread:$0]  (!%p2683_p11), %s3257_s3, 3072, %s2687_s14, [#allocation6], %s2582_s13, %s2582_s13, %s2583_s15  }
  0x3f   : > { %s2445_s20 = scalar_lea.hbm %s3259_s5, 1024 }
  0x40   : > { %p2446_p6 = scmp.ne.s32.totalorder %s3259_s5, %s2445_s20  ;;  %p2452_p5 = scmp.lt.u32.totalorder %s2445_s20, %s3259_s5 }
  0x42   : > { %p2448_p10 = pnand %p2446_p6, %p2699_p13 }
  0x44   : > { %p2449_p3 = pneg %p2448_p10 }
  0x46   : > { %p2454_p7 = pnand %p2452_p5, %p2449_p3 }
  0x48   : > { %2457 = shalt.err (!%p2454_p7)
}
  0x49   : > { %s2458_s11 = scalar_lea.vmem %s253_s16, 1024  ;;  %p2466_p1 = scmp.lt.s32.totalorder %s253_s16, %s253_s16 }
  0x4a   : > { %p2459_p9 = scmp.ne.s32.totalorder %s253_s16, %s2458_s11  ;;  %p2467_p2 = scmp.lt.s32.totalorder %s2458_s11, %s2458_s11 }
  0x4c   : > { %p2461_p12 = pnand %p2459_p9, %p2699_p13  ;;  %p2468_p4 = por %p2467_p2, %p2466_p1 }
  0x4e   : > { %p2462_p0 = pneg %p2461_p12 }
  0x50   : > { %p2469_p8 = pnand %p2468_p4, %p2462_p0 }
  0x52   : > { %2472 = shalt.err (!%p2469_p8)
}
  0x53   : > { %2281 = dma.hbm_to_vmem [thread:$0]  (!%p2683_p11), %s3259_s5, 1024, %s253_s16, [#allocation9], %s2582_s13, %s2582_s13, %s2583_s15  }
  0x54   : > { %s2772_s22 = sadd.s32 1, %s2577_s27   ;;  %s32_s17 = sadd.s32 1, %s2573_s26 }
  0x55   : > { %s29_s12 = ssub.s32 %s2577_s27, %s2772_s22  ;;  %p39_p8 = scmp.ne.s32.totalorder %s2573_s26, %s2569_s25 }
  0x56   : > { %p30_p4 = scmp.eq.s32.totalorder %s29_s12, 0  ;;  %p40_p13 = scmp.eq.s32.totalorder %s2577_s27, 0 }
  0x57   : > { %p2293_p6 = scmp.lt.s32.totalorder %s2577_s27, 2  ;;  %p3272_p3 = scmp.eq.s32.totalorder %s2653_s28, 1 }
  0x58   : > { %s2782_s18 = scalar_select %p30_p4, %s2573_s26, %s32_s17  }
  0x59   : > { %p41_p10 = por %p40_p13, %p39_p8  ;;  %p2786_p5 = por %p3272_p3, %p39_p8 }
  0x5a   : > { %s269_s20 = sand.u32 1, %s2573_s26   ;;  %s1762_s21 = smul.u32 2560, %s2577_s27 }
  0x5b   : > { %s2254_s16 = smul.u32 160, %s269_s20  ;;  %p2797_p11 = pnand %p2293_p6, %p41_p10 }
  0x5c   : > { %s2795_s23 = scalar_lea.hbm %s3254_s0, %s1762_s21  ;;  %s2803_s14 = scalar_lea.sflag [#allocation3], %s269_s20 }
  0x5d   : > { %s273_s10 = scalar_lea.vmem [#allocation2], %s2254_s16  ;;  %s2473_s8 = scalar_lea.hbm %s2795_s23, 2560 }
  0x5e   : > { %s280_s11 = sshll.u32 %s273_s10, 4  ;;  %p2474_p7 = scmp.ne.s32.totalorder %s2795_s23, %s2473_s8  ;;  %s2801_s11 = int_to_ptr.vmem [resolvable:$true] %s280_s11 }
  0x5f   : > { %p2475_p9 = pneg %p2797_p11  ;;  %s2478_s21 = scalar_lea.hbm %s3254_s0, 5120 }
  0x60   : > { %p2479_p1 = scmp.lt.u32.totalorder %s2795_s23, %s3254_s0  ;;  %p2480_p2 = scmp.lt.u32.totalorder %s2478_s21, %s2473_s8 }
  0x61   : > { %p2476_p12 = pnand %p2475_p9, %p2474_p7  ;;  %p2482_p8 = scmp.lt.u32.totalorder %s2473_s8, %s2795_s23 }
  0x62   : > { %p2481_p4 = por %p2480_p2, %p2479_p1 }
  0x63   : > { %p2477_p0 = pneg %p2476_p12 }
  0x64   : > { %p2483_p13 = por %p2482_p8, %p2481_p4 }
  0x66   : > { %p2484_p6 = pnand %p2483_p13, %p2477_p0 }
  0x68   : > { %2487 = shalt.err (!%p2484_p6)
}
  0x69   : > { %s2488_s20 = scalar_lea.vmem %s2801_s11, 2560  ;;  %s2584_s16 = smov [#allocation2]  }
  0x6a   : > { %p2489_p10 = scmp.ne.s32.totalorder %s2801_s11, %s2488_s20  ;;  %s2493_s10 = sshll.u32 %s2584_s16, 4  ;;  %s2494_s10 = int_to_ptr.vmem [resolvable:$false] %s2493_s10 }
  0x6b   : > { %s2495_s12 = scalar_lea.vmem %s2494_s10, 5120  ;;  %p2496_p12 = scmp.lt.s32.totalorder %s2801_s11, %s2494_s10 }
  0x6c   : > { %p2491_p3 = pnand %p2489_p10, %p2475_p9  ;;  %p2497_p1 = scmp.lt.s32.totalorder %s2495_s12, %s2488_s20 }
  0x6e   : > { %p2492_p7 = pneg %p2491_p3  ;;  %p2498_p2 = por %p2497_p1, %p2496_p12 }
  0x70   : > { %p2499_p4 = pnand %p2498_p2, %p2492_p7 }
  0x72   : > { %2502 = shalt.err (!%p2499_p4)
}
  0x73   : > { %s2585_s8 = smov 128   ;;  %s2586_s17 = smov 8  }
  0x74   : > { %2285 = dma.hbm_to_vmem [thread:$0]  (!%p2797_p11), %s2795_s23, 2560, %s2801_s11, %s2803_s14, %s2585_s8, %s2585_s8, %s2586_s17  }
  0x75   : > { %p3275_p9 = scmp.ne.s32.totalorder %s3269_s9, 0 }
  0x76   : > { %s2834_s21 = sand.u32 (!%p3275_p9), 1, %s2569_s25   ;;  %p3276_p0 = scmp.ne.s32.totalorder (!%p3275_p9), %s3266_s30, 0 }
  0x77   : > { %292 = sbr.rel (%p3275_p9) target bundleno = 1303 (0x517), region = 48  ;;  %s295_s15 = scalar_lea.sflag (!%p3275_p9), [#allocation3], %s2834_s21 }
  0x78   : > { %s2255_s13 = smul.u32 (!%p3275_p9), 160, %s2834_s21 }
  0x7a   : > { %s2840_s20 = scalar_lea.vmem (!%p3275_p9), [#allocation2], %s2255_s13 }
  0x7e   : > { %2548 = dma.done.wait (%p3276_p0), %s295_s15, 2560  }
  0x7f   : > { %2550 = vsyncadd (%p3276_p0), %s295_s15, 4294964736  ;;  %p3277_p11 = scmp.eq.s32.totalorder %s2653_s28, 0 }
  0x81   : > { %2552 = dma.done.wait (%p3277_p11), [#allocation6], 4096   ;;  %p3278_p8 = pmov %p3277_p11 }
  0x83   : > { %2554 = vsyncadd (%p3278_p8), [#allocation6], 4294963200  ;;  %p3279_p13 = pmov %p3278_p8 }
  0x84   : > { %p3280_p6 = pmov %p3278_p8 }
  0x85   : > { %2556 = dma.done.wait (%p3279_p13), [#allocation9], 1024  }
  0x86   : > { %2558 = vsyncadd (%p3280_p6), [#allocation9], 4294966272  ;;  %v2587_v0 = vmov 0.0   ;;  %vm2588_vm0 = vmmov 0   ;;  %v2341_v1 = vld [vmem:[#allocation5] sm:$0xff]   ;;  %v2342_v2 = vld [vmem:[#allocation5 + $0x8] sm:$0xff]  }
  0x87   : > { %1894 = vmatprep.subr.bf16.mxu0 %v2587_v0  ;;  %1930 = vmatprep.subr.bf16.mxu1 %v2587_v0  ;;  %v2343_v3 = vld [vmem:[#allocation5 + $0x10] sm:$0xff]   ;;  %v2344_v4 = vld [vmem:[#allocation5 + $0x18] sm:$0xff]   ;;  %v2345_v5 = vld [vmem:[#allocation5 + $0x20] sm:$0xff]   ;;  %s3163_s17 = scalar_lea.vmem [#allocation10], %s2255_s13  ;;  %s1763_s13 = smul.u32 2560, %s2653_s28 }
  0x88   : > { %1910 = vmatprep.mubr.msk.bf16.mxu0 %vm2588_vm0, %v2587_v0  ;;  %1946 = vmatprep.mubr.msk.bf16.mxu1 %vm2588_vm0, %v2587_v0  ;;  %v2346_v6 = vld [vmem:[#allocation5 + $0x28] sm:$0xff]   ;;  %v2347_v7 = vld [vmem:[#allocation5 + $0x30] sm:$0xff]   ;;  %v2348_v8 = vld [vmem:[#allocation5 + $0x38] sm:$0xff]   ;;  %s1593_s15 = sshll.u32 %s3163_s17, 4  ;;  %s1580_s28 = scalar_lea.sflag [#allocation4], %s2834_s21  ;;  %s3204_s15 = int_to_ptr.vmem [resolvable:$true] %s1593_s15 }
  0x89   : > { %1895 = vmatpush3.bf16.msra.mxu0 %v2341_v1  ;;  %1931 = vmatpush3.bf16.msra.mxu1 %v2341_v1  ;;  %v346_v9 = vld [vmem:[%s2840_s20] sm:$0xff]  ;;  %v347_v10 = vld [vmem:[%s2840_s20 + $0x8] sm:$0xff]  ;;  %v504_v11 = vld [vmem:[%s2840_s20 + $0x50] sm:$0xff]  ;;  %s3202_s9 = scalar_lea.hbm %s3261_s7, %s1763_s13  ;;  %s2503_s23 = scalar_lea.vmem %s3204_s15, 2560 }
  0x8a   : > { %1896 = vmatprep.subr.bf16.mxu0 %v2587_v0  ;;  %1932 = vmatprep.subr.bf16.mxu1 %v2587_v0  ;;  %v505_v12 = vld [vmem:[%s2840_s20 + $0x58] sm:$0xff]  ;;  %v356_v13 = vpack.c.bf16 %v347_v10, %v346_v9  ;;  %v2349_v15 = vld [vmem:[#allocation7] sm:$0xff]   ;;  %v348_v16 = vld [vmem:[%s2840_s20 + $0x10] sm:$0xff]  ;;  %p2504_p10 = scmp.ne.s32.totalorder %s3204_s15, %s2503_s23  ;;  %s2589_s29 = smov [#allocation10]  }
  0x8b   : > { %v514_v14 = vpack.c.bf16 %v505_v12, %v504_v11  ;;  %v349_v17 = vld [vmem:[%s2840_s20 + $0x18] sm:$0xff]  ;;  %v506_v18 = vld [vmem:[%s2840_s20 + $0x60] sm:$0xff]  ;;  %v507_v19 = vld [vmem:[%s2840_s20 + $0x68] sm:$0xff]  ;;  %s2507_s11 = sshll.u32 %s2589_s29, 4  ;;  %s2508_s11 = int_to_ptr.vmem [resolvable:$false] %s2507_s11 }
  0x8c   : > { %v2350_v20 = vld [vmem:[#allocation7 + $0x8] sm:$0xff]   ;;  %v357_v21 = vpack.c.bf16 %v349_v17, %v348_v16  ;;  %v515_v22 = vpack.c.bf16 %v507_v19, %v506_v18  ;;  %v2351_v23 = vld [vmem:[#allocation7 + $0x10] sm:$0xff]   ;;  %v350_v24 = vld [vmem:[%s2840_s20 + $0x20] sm:$0xff]  ;;  %p2505_p3 = pnand %p2504_p10, %p2786_p5  ;;  %s2509_s14 = scalar_lea.vmem %s2508_s11, 5120 }
  0x8d   : > { %1897 = vmatpush3.bf16.msra.mxu0 %v2342_v2  ;;  %1933 = vmatpush3.bf16.msra.mxu1 %v2342_v2  ;;  %v351_v25 = vld [vmem:[%s2840_s20 + $0x28] sm:$0xff]  ;;  %v508_v26 = vld [vmem:[%s2840_s20 + $0x70] sm:$0xff]  ;;  %v509_v27 = vld [vmem:[%s2840_s20 + $0x78] sm:$0xff]  ;;  %p2510_p12 = scmp.lt.s32.totalorder %s3204_s15, %s2508_s11  ;;  %p2511_p1 = scmp.lt.s32.totalorder %s2509_s14, %s2503_s23 }
  0x8e   : > { %1898 = vmatprep.subr.bf16.mxu0 %v2587_v0  ;;  %1934 = vmatprep.subr.bf16.mxu1 %v2587_v0  ;;  %v2352_v28 = vld [vmem:[#allocation7 + $0x18] sm:$0xff]   ;;  %v358_v29 = vpack.c.bf16 %v351_v25, %v350_v24  ;;  %v516_v30 = vpack.c.bf16 %v509_v27, %v508_v26  ;;  %v2353_v31 = vld [vmem:[#allocation7 + $0x20] sm:$0xff]   ;;  %v352_v32 = vld [vmem:[%s2840_s20 + $0x30] sm:$0xff]  ;;  %p2506_p7 = pneg %p2505_p3 }
  0x8f   : > { %v353_v33 = vld [vmem:[%s2840_s20 + $0x38] sm:$0xff]  ;;  %v510_v34 = vld [vmem:[%s2840_s20 + $0x80] sm:$0xff]  ;;  %v511_v35 = vld [vmem:[%s2840_s20 + $0x88] sm:$0xff]  ;;  %p2512_p2 = por %p2511_p1, %p2510_p12 }
  0x90   : > { %v2354_v36 = vld [vmem:[#allocation7 + $0x28] sm:$0xff]   ;;  %v359_v37 = vpack.c.bf16 %v353_v33, %v352_v32  ;;  %v517_v38 = vpack.c.bf16 %v511_v35, %v510_v34  ;;  %v2355_v39 = vld [vmem:[#allocation7 + $0x30] sm:$0xff]   ;;  %v354_v40 = vld [vmem:[%s2840_s20 + $0x40] sm:$0xff] }
  0x91   : > { %1899 = vmatpush3.bf16.msra.mxu0 %v2343_v3  ;;  %1935 = vmatpush3.bf16.msra.mxu1 %v2343_v3  ;;  %v355_v41 = vld [vmem:[%s2840_s20 + $0x48] sm:$0xff]  ;;  %v512_v42 = vld [vmem:[%s2840_s20 + $0x90] sm:$0xff]  ;;  %v513_v43 = vld [vmem:[%s2840_s20 + $0x98] sm:$0xff]  ;;  %p2513_p4 = pnand %p2512_p2, %p2506_p7 }
  0x92   : > { %1900 = vmatprep.subr.bf16.mxu0 %v2587_v0  ;;  %1936 = vmatprep.subr.bf16.mxu1 %v2587_v0  ;;  %v360_v44 = vpack.c.bf16 %v355_v41, %v354_v40  ;;  %v518_v45 = vpack.c.bf16 %v513_v43, %v512_v42  ;;  %v2356_v46 = vld [vmem:[#allocation7 + $0x38] sm:$0xff]   ;;  %v2935_v47 = vld [vmem:[%s3256_s2] ss:$0 sm:$0xff] }
  0x93   : > { %v2357_v62 = vld [vmem:[#allocation7 + $0x40] sm:$0xff]  }
  0x95   : > { %1901 = vmatpush3.bf16.msra.mxu0 %v2344_v4  ;;  %1937 = vmatpush3.bf16.msra.mxu1 %v2344_v4  ;;  %v2358_v4 = vld [vmem:[#allocation7 + $0x48] sm:$0xff]  }
  0x96   : > { %1902 = vmatprep.subr.bf16.mxu0 %v2587_v0  ;;  %1938 = vmatprep.subr.bf16.mxu1 %v2587_v0 }
  0x99   : > { %1903 = vmatpush3.bf16.msra.mxu0 %v2345_v5  ;;  %1939 = vmatpush3.bf16.msra.mxu1 %v2345_v5 }
  0x9a   : > { %1904 = vmatprep.subr.bf16.mxu0 %v2587_v0  ;;  %1940 = vmatprep.subr.bf16.mxu1 %v2587_v0 }
  0x9d   : > { %1905 = vmatpush3.bf16.msra.mxu0 %v2346_v6  ;;  %1941 = vmatpush3.bf16.msra.mxu1 %v2346_v6 }
  0x9e   : > { %1906 = vmatprep.subr.bf16.mxu0 %v2587_v0  ;;  %1942 = vmatprep.subr.bf16.mxu1 %v2587_v0 }
  0xa1   : > { %1907 = vmatpush3.bf16.msra.mxu0 %v2347_v7  ;;  %1943 = vmatpush3.bf16.msra.mxu1 %v2347_v7 }
  0xa2   : > { %1908 = vmatprep.subr.bf16.mxu0 %v2587_v0  ;;  %1944 = vmatprep.subr.bf16.mxu1 %v2587_v0 }
  0xa5   : > { %1909 = vmatpush3.bf16.msra.mxu0 %v2348_v8  ;;  %1945 = vmatpush3.bf16.msra.mxu1 %v2348_v8 }
  0xa6   : > { %1966 = vmatprep.subr.bf16.mxu0 %v2587_v0  ;;  %2002 = vmatprep.subr.bf16.mxu1 %v2587_v0 }
  0xa8   : > { %1911 = vmatmul.mubr.bf16.vlgmr.msra.gmra.mrb[0].mxu0 %v356_v13  ;;  %1947 = vmatmul.mubr.bf16.vlgmr.msra.gmra.mrb[0].mxu1 %v514_v14 }
  0xa9   : > { %1914 = vmatprep.mubr.msk.bf16.mxu0 %vm2588_vm0, %v2587_v0  ;;  %1950 = vmatprep.mubr.msk.bf16.mxu1 %vm2588_vm0, %v2587_v0 }
  0xaa   : > { %1967 = vmatpush3.bf16.msra.mxu0 %v2349_v15  ;;  %2003 = vmatpush3.bf16.msra.mxu1 %v2349_v15  ;;  %v2359_v15 = vld [vmem:[#allocation7 + $0x50] sm:$0xff]  }
  0xab   : > { %1968 = vmatprep.subr.bf16.mxu0 %v2587_v0  ;;  %2004 = vmatprep.subr.bf16.mxu1 %v2587_v0 }
  0xae   : > { %1969 = vmatpush3.bf16.msra.mxu0 %v2350_v20  ;;  %2005 = vmatpush3.bf16.msra.mxu1 %v2350_v20  ;;  %v2360_v20 = vld [vmem:[#allocation7 + $0x58] sm:$0xff]  }
  0xaf   : > { %1970 = vmatprep.subr.bf16.mxu0 %v2587_v0  ;;  %2006 = vmatprep.subr.bf16.mxu1 %v2587_v0 }
  0xb0   : > { %1915 = vmatmul.mubr.bf16.gmra.mrb[4].mxu0 %v357_v21  ;;  %1951 = vmatmul.mubr.bf16.gmra.mrb[4].mxu1 %v515_v22 }
  0xb1   : > { %1918 = vmatprep.mubr.msk.bf16.mxu0 %vm2588_vm0, %v2587_v0  ;;  %1954 = vmatprep.mubr.msk.bf16.mxu1 %vm2588_vm0, %v2587_v0 }
  0xb2   : > { %1971 = vmatpush3.bf16.msra.mxu0 %v2351_v23  ;;  %2007 = vmatpush3.bf16.msra.mxu1 %v2351_v23 }
  0xb3   : > { %1972 = vmatprep.subr.bf16.mxu0 %v2587_v0  ;;  %2008 = vmatprep.subr.bf16.mxu1 %v2587_v0 }
  0xb6   : > { %1973 = vmatpush3.bf16.msra.mxu0 %v2352_v28  ;;  %2009 = vmatpush3.bf16.msra.mxu1 %v2352_v28 }
  0xb7   : > { %1974 = vmatprep.subr.bf16.mxu0 %v2587_v0  ;;  %2010 = vmatprep.subr.bf16.mxu1 %v2587_v0 }
  0xb8   : > { %1919 = vmatmul.mubr.bf16.gmra.mrb[8].mxu0 %v358_v29  ;;  %1955 = vmatmul.mubr.bf16.gmra.mrb[8].mxu1 %v516_v30 }
  0xb9   : > { %1922 = vmatprep.mubr.msk.bf16.mxu0 %vm2588_vm0, %v2587_v0  ;;  %1958 = vmatprep.mubr.msk.bf16.mxu1 %vm2588_vm0, %v2587_v0 }
  0xba   : > { %1975 = vmatpush3.bf16.msra.mxu0 %v2353_v31  ;;  %2011 = vmatpush3.bf16.msra.mxu1 %v2353_v31  ;;  %v2361_v31 = vld [vmem:[#allocation7 + $0x60] sm:$0xff]  }
  0xbb   : > { %1976 = vmatprep.subr.bf16.mxu0 %v2587_v0  ;;  %2012 = vmatprep.subr.bf16.mxu1 %v2587_v0 }
  0xbe   : > { %1977 = vmatpush3.bf16.msra.mxu0 %v2354_v36  ;;  %2013 = vmatpush3.bf16.msra.mxu1 %v2354_v36  ;;  %v2362_v36 = vld [vmem:[#allocation7 + $0x68] sm:$0xff]  }
  0xbf   : > { %1978 = vmatprep.subr.bf16.mxu0 %v2587_v0  ;;  %2014 = vmatprep.subr.bf16.mxu1 %v2587_v0 }
  0xc0   : > { %1923 = vmatmul.mubr.bf16.gmra.mrb[12].mxu0 %v359_v37  ;;  %1959 = vmatmul.mubr.bf16.gmra.mrb[12].mxu1 %v517_v38 }
  0xc1   : > { %1926 = vmatprep.mubr.msk.bf16.mxu0 %vm2588_vm0, %v2587_v0  ;;  %1962 = vmatprep.mubr.msk.bf16.mxu1 %vm2588_vm0, %v2587_v0 }
  0xc2   : > { %1979 = vmatpush3.bf16.msra.mxu0 %v2355_v39  ;;  %2015 = vmatpush3.bf16.msra.mxu1 %v2355_v39 }
  0xc3   : > { %1980 = vmatprep.subr.bf16.mxu0 %v2587_v0  ;;  %2016 = vmatprep.subr.bf16.mxu1 %v2587_v0 }
  0xc6   : > { %1981 = vmatpush3.bf16.msra.mxu0 %v2356_v46  ;;  %2017 = vmatpush3.bf16.msra.mxu1 %v2356_v46 }
  0xc7   : > { %2038 = vmatprep.subr.bf16.mxu0 %v2587_v0  ;;  %2074 = vmatprep.subr.bf16.mxu1 %v2587_v0 }
  0xc8   : > { %1927 = vmatmul.mubr.bf16.gmra.mrb[16].mxu0 %v360_v44  ;;  %1963 = vmatmul.mubr.bf16.gmra.mrb[16].mxu1 %v518_v45 }
  0xc9   : > { %1982 = vmatprep.mubr.msk.bf16.mxu0 %vm2588_vm0, %v2587_v0  ;;  %2018 = vmatprep.mubr.msk.bf16.mxu1 %vm2588_vm0, %v2587_v0 }
 0x17b   : > { %v465_v48 = vpop.f32.mrb[0].mxu0  ;;  %v553_v49 = vpop.f32.mrb[0].mxu1 }
 0x17c   : > { %v1912_v50 = vpop.f32.mrb[1].mxu0  ;;  %v1948_v51 = vpop.f32.mrb[1].mxu1  ;;  %v466_v54 = vadd.f32 %v2935_v47, %v465_v48  ;;  %v554_v55 = vadd.f32 %v2935_v47, %v553_v49  ;;  %v2363_v48 = vld [vmem:[#allocation7 + $0x70] sm:$0xff]  }
 0x17d   : > { %v468_v52 = vpop.f32.mrb[2].mxu0  ;;  %v556_v53 = vpop.f32.mrb[2].mxu1 }
 0x17e   : > { %v469_v56 = vadd.f32 %v2935_v47, %v468_v52  ;;  %v557_v57 = vadd.f32 %v2935_v47, %v556_v53  ;;  %v1913_v58 = vpop.f32.mrb[3].mxu0  ;;  %v1949_v59 = vpop.f32.mrb[3].mxu1 }
 0x180   : > { %v609_v60 = vpack.c.bf16 %v469_v56, %v466_v54  ;;  %v739_v61 = vpack.c.bf16 %v557_v57, %v554_v55 }
 0x182   : > { %1983 = vmatmul.mubr.bf16.vlgmr.msra.gmra.mrb[20].mxu0 %v609_v60  ;;  %2019 = vmatmul.mubr.bf16.vlgmr.msra.gmra.mrb[20].mxu1 %v739_v61 }
 0x183   : > { %v473_v63 = vpop.f32.mrb[4].mxu0  ;;  %v561_v1 = vpop.f32.mrb[4].mxu1  ;;  %1986 = vmatprep.mubr.msk.bf16.mxu0 %vm2588_vm0, %v2587_v0  ;;  %2022 = vmatprep.mubr.msk.bf16.mxu1 %vm2588_vm0, %v2587_v0 }
 0x184   : > { %v1916_v2 = vpop.f32.mrb[5].mxu0  ;;  %v1952_v3 = vpop.f32.mrb[5].mxu1  ;;  %2039 = vmatpush3.bf16.msra.mxu0 %v2357_v62  ;;  %2075 = vmatpush3.bf16.msra.mxu1 %v2357_v62  ;;  %v474_v7 = vadd.f32 %v2935_v47, %v473_v63  ;;  %v562_v8 = vadd.f32 %v2935_v47, %v561_v1  ;;  %v2364_v63 = vld [vmem:[#allocation7 + $0x78] sm:$0xff]  }
 0x185   : > { %v476_v5 = vpop.f32.mrb[6].mxu0  ;;  %v564_v6 = vpop.f32.mrb[6].mxu1  ;;  %2040 = vmatprep.subr.bf16.mxu0 %v2587_v0  ;;  %2076 = vmatprep.subr.bf16.mxu1 %v2587_v0 }
 0x186   : > { %v477_v9 = vadd.f32 %v2935_v47, %v476_v5  ;;  %v565_v10 = vadd.f32 %v2935_v47, %v564_v6  ;;  %v1917_v11 = vpop.f32.mrb[7].mxu0  ;;  %v1953_v12 = vpop.f32.mrb[7].mxu1 }
 0x188   : > { %v610_v13 = vpack.c.bf16 %v477_v9, %v474_v7  ;;  %v740_v14 = vpack.c.bf16 %v565_v10, %v562_v8  ;;  %2041 = vmatpush3.bf16.msra.mxu0 %v2358_v4  ;;  %2077 = vmatpush3.bf16.msra.mxu1 %v2358_v4 }
 0x189   : > { %2042 = vmatprep.subr.bf16.mxu0 %v2587_v0  ;;  %2078 = vmatprep.subr.bf16.mxu1 %v2587_v0 }
 0x18a   : > { %1987 = vmatmul.mubr.bf16.gmra.mrb[24].mxu0 %v610_v13  ;;  %2023 = vmatmul.mubr.bf16.gmra.mrb[24].mxu1 %v740_v14 }
 0x18b   : > { %v481_v16 = vpop.f32.mrb[8].mxu0  ;;  %v569_v17 = vpop.f32.mrb[8].mxu1  ;;  %1990 = vmatprep.mubr.msk.bf16.mxu0 %vm2588_vm0, %v2587_v0  ;;  %2026 = vmatprep.mubr.msk.bf16.mxu1 %vm2588_vm0, %v2587_v0 }
 0x18c   : > { %v1920_v18 = vpop.f32.mrb[9].mxu0  ;;  %v1956_v19 = vpop.f32.mrb[9].mxu1  ;;  %2043 = vmatpush3.bf16.msra.mxu0 %v2359_v15  ;;  %2079 = vmatpush3.bf16.msra.mxu1 %v2359_v15  ;;  %v482_v23 = vadd.f32 %v2935_v47, %v481_v16  ;;  %v570_v24 = vadd.f32 %v2935_v47, %v569_v17  ;;  %v2365_v15 = vld [vmem:[#allocation7 + $0x80] sm:$0xff]  }
 0x18d   : > { %v484_v21 = vpop.f32.mrb[10].mxu0  ;;  %v572_v22 = vpop.f32.mrb[10].mxu1  ;;  %2044 = vmatprep.subr.bf16.mxu0 %v2587_v0  ;;  %2080 = vmatprep.subr.bf16.mxu1 %v2587_v0 }
 0x18e   : > { %v485_v25 = vadd.f32 %v2935_v47, %v484_v21  ;;  %v573_v26 = vadd.f32 %v2935_v47, %v572_v22  ;;  %v1921_v27 = vpop.f32.mrb[11].mxu0  ;;  %v1957_v28 = vpop.f32.mrb[11].mxu1 }
 0x190   : > { %v611_v29 = vpack.c.bf16 %v485_v25, %v482_v23  ;;  %v741_v30 = vpack.c.bf16 %v573_v26, %v570_v24  ;;  %2045 = vmatpush3.bf16.msra.mxu0 %v2360_v20  ;;  %2081 = vmatpush3.bf16.msra.mxu1 %v2360_v20  ;;  %v2366_v20 = vld [vmem:[#allocation7 + $0x88] sm:$0xff]  }
 0x191   : > { %2046 = vmatprep.subr.bf16.mxu0 %v2587_v0  ;;  %2082 = vmatprep.subr.bf16.mxu1 %v2587_v0 }
 0x192   : > { %1991 = vmatmul.mubr.bf16.gmra.mrb[28].mxu0 %v611_v29  ;;  %2027 = vmatmul.mubr.bf16.gmra.mrb[28].mxu1 %v741_v30 }
 0x193   : > { %v489_v32 = vpop.f32.mrb[12].mxu0  ;;  %v577_v33 = vpop.f32.mrb[12].mxu1  ;;  %1994 = vmatprep.mubr.msk.bf16.mxu0 %vm2588_vm0, %v2587_v0  ;;  %2030 = vmatprep.mubr.msk.bf16.mxu1 %vm2588_vm0, %v2587_v0 }
 0x194   : > { %v1924_v34 = vpop.f32.mrb[13].mxu0  ;;  %v1960_v35 = vpop.f32.mrb[13].mxu1  ;;  %2047 = vmatpush3.bf16.msra.mxu0 %v2361_v31  ;;  %2083 = vmatpush3.bf16.msra.mxu1 %v2361_v31  ;;  %v490_v39 = vadd.f32 %v2935_v47, %v489_v32  ;;  %v578_v40 = vadd.f32 %v2935_v47, %v577_v33  ;;  %v2367_v31 = vld [vmem:[#allocation7 + $0x90] sm:$0xff]  }
 0x195   : > { %v492_v37 = vpop.f32.mrb[14].mxu0  ;;  %v580_v38 = vpop.f32.mrb[14].mxu1  ;;  %2048 = vmatprep.subr.bf16.mxu0 %v2587_v0  ;;  %2084 = vmatprep.subr.bf16.mxu1 %v2587_v0 }
 0x196   : > { %v493_v41 = vadd.f32 %v2935_v47, %v492_v37  ;;  %v581_v42 = vadd.f32 %v2935_v47, %v580_v38  ;;  %v1925_v43 = vpop.f32.mrb[15].mxu0  ;;  %v1961_v44 = vpop.f32.mrb[15].mxu1 }
 0x198   : > { %v612_v45 = vpack.c.bf16 %v493_v41, %v490_v39  ;;  %v742_v46 = vpack.c.bf16 %v581_v42, %v578_v40  ;;  %2049 = vmatpush3.bf16.msra.mxu0 %v2362_v36  ;;  %2085 = vmatpush3.bf16.msra.mxu1 %v2362_v36  ;;  %v2368_v36 = vld [vmem:[#allocation7 + $0x98] sm:$0xff]  }
 0x199   : > { %2050 = vmatprep.subr.bf16.mxu0 %v2587_v0  ;;  %2086 = vmatprep.subr.bf16.mxu1 %v2587_v0 }
 0x19a   : > { %1995 = vmatmul.mubr.bf16.gmra.mrb[32].mxu0 %v612_v45  ;;  %2031 = vmatmul.mubr.bf16.gmra.mrb[32].mxu1 %v742_v46 }
 0x19b   : > { %v497_v49 = vpop.f32.mrb[16].mxu0  ;;  %v585_v50 = vpop.f32.mrb[16].mxu1  ;;  %1998 = vmatprep.mubr.msk.bf16.mxu0 %vm2588_vm0, %v2587_v0  ;;  %2034 = vmatprep.mubr.msk.bf16.mxu1 %vm2588_vm0, %v2587_v0 }
 0x19c   : > { %v1928_v51 = vpop.f32.mrb[17].mxu0  ;;  %v1964_v52 = vpop.f32.mrb[17].mxu1  ;;  %2051 = vmatpush3.bf16.msra.mxu0 %v2363_v48  ;;  %2087 = vmatpush3.bf16.msra.mxu1 %v2363_v48  ;;  %v498_v55 = vadd.f32 %v2935_v47, %v497_v49  ;;  %v586_v56 = vadd.f32 %v2935_v47, %v585_v50  ;;  %v2369_v48 = vld [vmem:[#allocation7 + $0xa0] sm:$0xff]  }
 0x19d   : > { %v500_v53 = vpop.f32.mrb[18].mxu0  ;;  %v588_v54 = vpop.f32.mrb[18].mxu1  ;;  %2052 = vmatprep.subr.bf16.mxu0 %v2587_v0  ;;  %2088 = vmatprep.subr.bf16.mxu1 %v2587_v0 }
 0x19e   : > { %v501_v57 = vadd.f32 %v2935_v47, %v500_v53  ;;  %v589_v58 = vadd.f32 %v2935_v47, %v588_v54  ;;  %v1929_v59 = vpop.f32.mrb[19].mxu0  ;;  %v1965_v60 = vpop.f32.mrb[19].mxu1  ;;  %v2996_v47 = vld [vmem:[%s3258_s4] ss:$0 sm:$0xff]  ;;  %v2370_v53 = vld [vmem:[#allocation7 + $0xa8] sm:$0xff]  }
 0x1a0   : > { %v613_v61 = vpack.c.bf16 %v501_v57, %v498_v55  ;;  %v743_v62 = vpack.c.bf16 %v589_v58, %v586_v56  ;;  %2053 = vmatpush3.bf16.msra.mxu0 %v2364_v63  ;;  %2089 = vmatpush3.bf16.msra.mxu1 %v2364_v63 }
 0x1a1   : > { %2110 = vmatprep.subr.bf16.mxu0 %v2587_v0  ;;  %2146 = vmatprep.subr.bf16.mxu1 %v2587_v0 }
 0x1a2   : > { %1999 = vmatmul.mubr.bf16.gmra.mrb[36].mxu0 %v613_v61  ;;  %2035 = vmatmul.mubr.bf16.gmra.mrb[36].mxu1 %v743_v62 }
 0x1a3   : > { %2054 = vmatprep.mubr.msk.bf16.mxu0 %vm2588_vm0, %v2587_v0  ;;  %2090 = vmatprep.mubr.msk.bf16.mxu1 %vm2588_vm0, %v2587_v0 }
 0x255   : > { %v700_v1 = vpop.f32.mrb[20].mxu0  ;;  %v778_v2 = vpop.f32.mrb[20].mxu1 }
 0x256   : > { %v1984_v3 = vpop.f32.mrb[21].mxu0  ;;  %v2020_v4 = vpop.f32.mrb[21].mxu1  ;;  %v701_v7 = vadd.f32 %v2996_v47, %v700_v1  ;;  %v779_v8 = vadd.f32 %v2996_v47, %v778_v2  ;;  %v2371_v1 = vld [vmem:[#allocation7 + $0xb0] sm:$0xff]  }
 0x257   : > { %v703_v5 = vpop.f32.mrb[22].mxu0  ;;  %v781_v6 = vpop.f32.mrb[22].mxu1 }
 0x258   : > { %v704_v9 = vadd.f32 %v2996_v47, %v703_v5  ;;  %v782_v10 = vadd.f32 %v2996_v47, %v781_v6  ;;  %v1985_v11 = vpop.f32.mrb[23].mxu0  ;;  %v2021_v12 = vpop.f32.mrb[23].mxu1 }
 0x25a   : > { %v835_v13 = vpack.c.bf16 %v704_v9, %v701_v7  ;;  %v965_v14 = vpack.c.bf16 %v782_v10, %v779_v8 }
 0x25c   : > { %2055 = vmatmul.mubr.bf16.vlgmr.msra.gmra.mrb[40].mxu0 %v835_v13  ;;  %2091 = vmatmul.mubr.bf16.vlgmr.msra.gmra.mrb[40].mxu1 %v965_v14 }
 0x25d   : > { %v708_v16 = vpop.f32.mrb[24].mxu0  ;;  %v786_v17 = vpop.f32.mrb[24].mxu1  ;;  %2058 = vmatprep.mubr.msk.bf16.mxu0 %vm2588_vm0, %v2587_v0  ;;  %2094 = vmatprep.mubr.msk.bf16.mxu1 %vm2588_vm0, %v2587_v0 }
 0x25e   : > { %v1988_v18 = vpop.f32.mrb[25].mxu0  ;;  %v2024_v19 = vpop.f32.mrb[25].mxu1  ;;  %2111 = vmatpush3.bf16.msra.mxu0 %v2365_v15  ;;  %2147 = vmatpush3.bf16.msra.mxu1 %v2365_v15  ;;  %v709_v23 = vadd.f32 %v2996_v47, %v708_v16  ;;  %v787_v24 = vadd.f32 %v2996_v47, %v786_v17  ;;  %v2372_v16 = vld [vmem:[#allocation7 + $0xb8] sm:$0xff]  }
 0x25f   : > { %v711_v21 = vpop.f32.mrb[26].mxu0  ;;  %v789_v22 = vpop.f32.mrb[26].mxu1  ;;  %2112 = vmatprep.subr.bf16.mxu0 %v2587_v0  ;;  %2148 = vmatprep.subr.bf16.mxu1 %v2587_v0 }
 0x260   : > { %v712_v25 = vadd.f32 %v2996_v47, %v711_v21  ;;  %v790_v26 = vadd.f32 %v2996_v47, %v789_v22  ;;  %v1989_v27 = vpop.f32.mrb[27].mxu0  ;;  %v2025_v28 = vpop.f32.mrb[27].mxu1 }
 0x262   : > { %v836_v29 = vpack.c.bf16 %v712_v25, %v709_v23  ;;  %v966_v30 = vpack.c.bf16 %v790_v26, %v787_v24  ;;  %2113 = vmatpush3.bf16.msra.mxu0 %v2366_v20  ;;  %2149 = vmatpush3.bf16.msra.mxu1 %v2366_v20 }
 0x263   : > { %2114 = vmatprep.subr.bf16.mxu0 %v2587_v0  ;;  %2150 = vmatprep.subr.bf16.mxu1 %v2587_v0 }
 0x264   : > { %2059 = vmatmul.mubr.bf16.gmra.mrb[44].mxu0 %v836_v29  ;;  %2095 = vmatmul.mubr.bf16.gmra.mrb[44].mxu1 %v966_v30 }
 0x265   : > { %v716_v32 = vpop.f32.mrb[28].mxu0  ;;  %v794_v33 = vpop.f32.mrb[28].mxu1  ;;  %2062 = vmatprep.mubr.msk.bf16.mxu0 %vm2588_vm0, %v2587_v0  ;;  %2098 = vmatprep.mubr.msk.bf16.mxu1 %vm2588_vm0, %v2587_v0 }
 0x266   : > { %v1992_v34 = vpop.f32.mrb[29].mxu0  ;;  %v2028_v35 = vpop.f32.mrb[29].mxu1  ;;  %2115 = vmatpush3.bf16.msra.mxu0 %v2367_v31  ;;  %2151 = vmatpush3.bf16.msra.mxu1 %v2367_v31  ;;  %v717_v39 = vadd.f32 %v2996_v47, %v716_v32  ;;  %v795_v40 = vadd.f32 %v2996_v47, %v794_v33  ;;  %v2373_v31 = vld [vmem:[#allocation8] sm:$0xff]  }
 0x267   : > { %v719_v37 = vpop.f32.mrb[30].mxu0  ;;  %v797_v38 = vpop.f32.mrb[30].mxu1  ;;  %2116 = vmatprep.subr.bf16.mxu0 %v2587_v0  ;;  %2152 = vmatprep.subr.bf16.mxu1 %v2587_v0  ;;  %v2374_v32 = vld [vmem:[#allocation8] sm:$0xff]  }
 0x268   : > { %v720_v41 = vadd.f32 %v2996_v47, %v719_v37  ;;  %v798_v42 = vadd.f32 %v2996_v47, %v797_v38  ;;  %v1993_v43 = vpop.f32.mrb[31].mxu0  ;;  %v2029_v44 = vpop.f32.mrb[31].mxu1  ;;  %v2375_v37 = vld [vmem:[#allocation8 + $0x8] sm:$0xff]  }
 0x269   : > { %v2376_v38 = vld [vmem:[#allocation8 + $0x8] sm:$0xff]  }
 0x26a   : > { %v837_v45 = vpack.c.bf16 %v720_v41, %v717_v39  ;;  %v967_v46 = vpack.c.bf16 %v798_v42, %v795_v40  ;;  %2117 = vmatpush3.bf16.msra.mxu0 %v2368_v36  ;;  %2153 = vmatpush3.bf16.msra.mxu1 %v2368_v36 }
 0x26b   : > { %2118 = vmatprep.subr.bf16.mxu0 %v2587_v0  ;;  %2154 = vmatprep.subr.bf16.mxu1 %v2587_v0 }
 0x26c   : > { %2063 = vmatmul.mubr.bf16.gmra.mrb[48].mxu0 %v837_v45  ;;  %2099 = vmatmul.mubr.bf16.gmra.mrb[48].mxu1 %v967_v46 }
 0x26d   : > { %v724_v49 = vpop.f32.mrb[32].mxu0  ;;  %v802_v50 = vpop.f32.mrb[32].mxu1  ;;  %2066 = vmatprep.mubr.msk.bf16.mxu0 %vm2588_vm0, %v2587_v0  ;;  %2102 = vmatprep.mubr.msk.bf16.mxu1 %vm2588_vm0, %v2587_v0 }
 0x26e   : > { %v1996_v51 = vpop.f32.mrb[33].mxu0  ;;  %v2032_v52 = vpop.f32.mrb[33].mxu1  ;;  %2119 = vmatpush3.bf16.msra.mxu0 %v2369_v48  ;;  %2155 = vmatpush3.bf16.msra.mxu1 %v2369_v48  ;;  %v725_v56 = vadd.f32 %v2996_v47, %v724_v49  ;;  %v803_v57 = vadd.f32 %v2996_v47, %v802_v50  ;;  %v2377_v50 = vld [vmem:[#allocation8 + $0x10] sm:$0xff]  }
 0x26f   : > { %v727_v54 = vpop.f32.mrb[34].mxu0  ;;  %v805_v55 = vpop.f32.mrb[34].mxu1  ;;  %2120 = vmatprep.subr.bf16.mxu0 %v2587_v0  ;;  %2156 = vmatprep.subr.bf16.mxu1 %v2587_v0  ;;  %v2378_v51 = vld [vmem:[#allocation8 + $0x10] sm:$0xff]  }
 0x270   : > { %v728_v58 = vadd.f32 %v2996_v47, %v727_v54  ;;  %v806_v59 = vadd.f32 %v2996_v47, %v805_v55  ;;  %v1997_v60 = vpop.f32.mrb[35].mxu0  ;;  %v2033_v61 = vpop.f32.mrb[35].mxu1 }
 0x272   : > { %v838_v62 = vpack.c.bf16 %v728_v58, %v725_v56  ;;  %v968_v63 = vpack.c.bf16 %v806_v59, %v803_v57  ;;  %2121 = vmatpush3.bf16.msra.mxu0 %v2370_v53  ;;  %2157 = vmatpush3.bf16.msra.mxu1 %v2370_v53  ;;  %v2379_v56 = vld [vmem:[#allocation8 + $0x18] sm:$0xff]  }
 0x273   : > { %2122 = vmatprep.subr.bf16.mxu0 %v2587_v0  ;;  %2158 = vmatprep.subr.bf16.mxu1 %v2587_v0  ;;  %v2380_v57 = vld [vmem:[#allocation8 + $0x18] sm:$0xff]  }
 0x274   : > { %2067 = vmatmul.mubr.bf16.gmra.mrb[52].mxu0 %v838_v62  ;;  %2103 = vmatmul.mubr.bf16.gmra.mrb[52].mxu1 %v968_v63 }
 0x275   : > { %v732_v2 = vpop.f32.mrb[36].mxu0  ;;  %v810_v3 = vpop.f32.mrb[36].mxu1  ;;  %2070 = vmatprep.mubr.msk.bf16.mxu0 %vm2588_vm0, %v2587_v0  ;;  %2106 = vmatprep.mubr.msk.bf16.mxu1 %vm2588_vm0, %v2587_v0 }
 0x276   : > { %v2000_v4 = vpop.f32.mrb[37].mxu0  ;;  %v2036_v5 = vpop.f32.mrb[37].mxu1  ;;  %2123 = vmatpush3.bf16.msra.mxu0 %v2371_v1  ;;  %2159 = vmatpush3.bf16.msra.mxu1 %v2371_v1  ;;  %v733_v8 = vadd.f32 %v2996_v47, %v732_v2  ;;  %v811_v9 = vadd.f32 %v2996_v47, %v810_v3 }
 0x277   : > { %v735_v6 = vpop.f32.mrb[38].mxu0  ;;  %v813_v7 = vpop.f32.mrb[38].mxu1  ;;  %2124 = vmatprep.subr.bf16.mxu0 %v2587_v0  ;;  %2160 = vmatprep.subr.bf16.mxu1 %v2587_v0  ;;  %v2381_v5 = vld [vmem:[#allocation8 + $0x20] sm:$0xff]  }
 0x278   : > { %v736_v10 = vadd.f32 %v2996_v47, %v735_v6  ;;  %v814_v11 = vadd.f32 %v2996_v47, %v813_v7  ;;  %v2001_v12 = vpop.f32.mrb[39].mxu0  ;;  %v2037_v13 = vpop.f32.mrb[39].mxu1  ;;  %v3057_v47 = vld [vmem:[%s3258_s4 + $0x1] ss:$0 sm:$0xff] }
 0x279   : > { %v2382_v6 = vld [vmem:[#allocation8 + $0x20] sm:$0xff]   ;;  %v2384_v12 = vld [vmem:[#allocation8 + $0x28] sm:$0xff]  }
 0x27a   : > { %v839_v14 = vpack.c.bf16 %v736_v10, %v733_v8  ;;  %v969_v15 = vpack.c.bf16 %v814_v11, %v811_v9  ;;  %2125 = vmatpush3.bf16.msra.mxu0 %v2372_v16  ;;  %2161 = vmatpush3.bf16.msra.mxu1 %v2372_v16  ;;  %v2383_v11 = vld [vmem:[#allocation8 + $0x28] sm:$0xff]  }
 0x27b   : > { %2182 = vmatprep.subr.bf16.mxu0 %v2587_v0  ;;  %2218 = vmatprep.subr.bf16.mxu1 %v2587_v0 }
 0x27c   : > { %2071 = vmatmul.mubr.bf16.gmra.mrb[56].mxu0 %v839_v14  ;;  %2107 = vmatmul.mubr.bf16.gmra.mrb[56].mxu1 %v969_v15 }
 0x27d   : > { %2126 = vmatprep.mubr.msk.bf16.mxu0 %vm2588_vm0, %v2587_v0  ;;  %2162 = vmatprep.mubr.msk.bf16.mxu1 %vm2588_vm0, %v2587_v0 }
 0x32f   : > { %v926_v17 = vpop.f32.mrb[40].mxu0  ;;  %v1004_v18 = vpop.f32.mrb[40].mxu1 }
 0x330   : > { %v2056_v19 = vpop.f32.mrb[41].mxu0  ;;  %v2092_v20 = vpop.f32.mrb[41].mxu1  ;;  %v927_v23 = vadd.f32 %v3057_v47, %v926_v17  ;;  %v1005_v24 = vadd.f32 %v3057_v47, %v1004_v18 }
 0x331   : > { %v929_v21 = vpop.f32.mrb[42].mxu0  ;;  %v1007_v22 = vpop.f32.mrb[42].mxu1 }
 0x332   : > { %v930_v25 = vadd.f32 %v3057_v47, %v929_v21  ;;  %v1008_v26 = vadd.f32 %v3057_v47, %v1007_v22  ;;  %v2057_v27 = vpop.f32.mrb[43].mxu0  ;;  %v2093_v28 = vpop.f32.mrb[43].mxu1 }
 0x334   : > { %v1061_v29 = vpack.c.bf16 %v930_v25, %v927_v23  ;;  %v1191_v30 = vpack.c.bf16 %v1008_v26, %v1005_v24  ;;  %v2385_v23 = vld [vmem:[#allocation8 + $0x30] sm:$0xff]  }
 0x335   : > { %v2386_v24 = vld [vmem:[#allocation8 + $0x30] sm:$0xff]  }
 0x336   : > { %2127 = vmatmul.mubr.bf16.vlgmr.msra.gmra.mrb[60].mxu0 %v1061_v29  ;;  %2163 = vmatmul.mubr.bf16.vlgmr.msra.gmra.mrb[60].mxu1 %v1191_v30 }
 0x337   : > { %v934_v33 = vpop.f32.mrb[44].mxu0  ;;  %v1012_v34 = vpop.f32.mrb[44].mxu1  ;;  %2130 = vmatprep.mubr.msk.bf16.mxu0 %vm2588_vm0, %v2587_v0  ;;  %2166 = vmatprep.mubr.msk.bf16.mxu1 %vm2588_vm0, %v2587_v0 }
 0x338   : > { %v2060_v35 = vpop.f32.mrb[45].mxu0  ;;  %v2096_v36 = vpop.f32.mrb[45].mxu1  ;;  %2183 = vmatpush3.bf16.msra.mxu0 %v2373_v31  ;;  %2219 = vmatpush3.bf16.msra.mxu1 %v2374_v32  ;;  %v935_v41 = vadd.f32 %v3057_v47, %v934_v33  ;;  %v1013_v42 = vadd.f32 %v3057_v47, %v1012_v34 }
 0x339   : > { %v937_v39 = vpop.f32.mrb[46].mxu0  ;;  %v1015_v40 = vpop.f32.mrb[46].mxu1  ;;  %2184 = vmatprep.subr.bf16.mxu0 %v2587_v0  ;;  %2220 = vmatprep.subr.bf16.mxu1 %v2587_v0 }
 0x33a   : > { %v938_v43 = vadd.f32 %v3057_v47, %v937_v39  ;;  %v1016_v44 = vadd.f32 %v3057_v47, %v1015_v40  ;;  %v2061_v45 = vpop.f32.mrb[47].mxu0  ;;  %v2097_v46 = vpop.f32.mrb[47].mxu1  ;;  %v2387_v39 = vld [vmem:[#allocation8 + $0x38] sm:$0xff]  }
 0x33b   : > { %v2388_v40 = vld [vmem:[#allocation8 + $0x38] sm:$0xff]  }
 0x33c   : > { %v1062_v48 = vpack.c.bf16 %v938_v43, %v935_v41  ;;  %v1192_v49 = vpack.c.bf16 %v1016_v44, %v1013_v42  ;;  %2185 = vmatpush3.bf16.msra.mxu0 %v2375_v37  ;;  %2221 = vmatpush3.bf16.msra.mxu1 %v2376_v38 }
 0x33d   : > { %2186 = vmatprep.subr.bf16.mxu0 %v2587_v0  ;;  %2222 = vmatprep.subr.bf16.mxu1 %v2587_v0 }
 0x33e   : > { %2131 = vmatmul.mubr.bf16.gmra.mrb[64].mxu0 %v1062_v48  ;;  %2167 = vmatmul.mubr.bf16.gmra.mrb[64].mxu1 %v1192_v49 }
 0x33f   : > { %v942_v52 = vpop.f32.mrb[48].mxu0  ;;  %v1020_v53 = vpop.f32.mrb[48].mxu1  ;;  %2134 = vmatprep.mubr.msk.bf16.mxu0 %vm2588_vm0, %v2587_v0  ;;  %2170 = vmatprep.mubr.msk.bf16.mxu1 %vm2588_vm0, %v2587_v0 }
 0x340   : > { %v2064_v54 = vpop.f32.mrb[49].mxu0  ;;  %v2100_v55 = vpop.f32.mrb[49].mxu1  ;;  %2187 = vmatpush3.bf16.msra.mxu0 %v2377_v50  ;;  %2223 = vmatpush3.bf16.msra.mxu1 %v2378_v51  ;;  %v943_v60 = vadd.f32 %v3057_v47, %v942_v52  ;;  %v1021_v61 = vadd.f32 %v3057_v47, %v1020_v53 }
 0x341   : > { %v945_v58 = vpop.f32.mrb[50].mxu0  ;;  %v1023_v59 = vpop.f32.mrb[50].mxu1  ;;  %2188 = vmatprep.subr.bf16.mxu0 %v2587_v0  ;;  %2224 = vmatprep.subr.bf16.mxu1 %v2587_v0 }
 0x342   : > { %v946_v62 = vadd.f32 %v3057_v47, %v945_v58  ;;  %v1024_v63 = vadd.f32 %v3057_v47, %v1023_v59  ;;  %v2065_v1 = vpop.f32.mrb[51].mxu0  ;;  %v2101_v2 = vpop.f32.mrb[51].mxu1 }
 0x344   : > { %v1063_v3 = vpack.c.bf16 %v946_v62, %v943_v60  ;;  %v1193_v4 = vpack.c.bf16 %v1024_v63, %v1021_v61  ;;  %2189 = vmatpush3.bf16.msra.mxu0 %v2379_v56  ;;  %2225 = vmatpush3.bf16.msra.mxu1 %v2380_v57 }
 0x345   : > { %2190 = vmatprep.subr.bf16.mxu0 %v2587_v0  ;;  %2226 = vmatprep.subr.bf16.mxu1 %v2587_v0 }
 0x346   : > { %2135 = vmatmul.mubr.bf16.gmra.mrb[68].mxu0 %v1063_v3  ;;  %2171 = vmatmul.mubr.bf16.gmra.mrb[68].mxu1 %v1193_v4 }
 0x347   : > { %v950_v7 = vpop.f32.mrb[52].mxu0  ;;  %v1028_v8 = vpop.f32.mrb[52].mxu1  ;;  %2138 = vmatprep.mubr.msk.bf16.mxu0 %vm2588_vm0, %v2587_v0  ;;  %2174 = vmatprep.mubr.msk.bf16.mxu1 %vm2588_vm0, %v2587_v0 }
 0x348   : > { %v2068_v9 = vpop.f32.mrb[53].mxu0  ;;  %v2104_v10 = vpop.f32.mrb[53].mxu1  ;;  %2191 = vmatpush3.bf16.msra.mxu0 %v2381_v5  ;;  %2227 = vmatpush3.bf16.msra.mxu1 %v2382_v6  ;;  %v951_v15 = vadd.f32 %v3057_v47, %v950_v7  ;;  %v1029_v16 = vadd.f32 %v3057_v47, %v1028_v8 }
 0x349   : > { %v953_v13 = vpop.f32.mrb[54].mxu0  ;;  %v1031_v14 = vpop.f32.mrb[54].mxu1  ;;  %2192 = vmatprep.subr.bf16.mxu0 %v2587_v0  ;;  %2228 = vmatprep.subr.bf16.mxu1 %v2587_v0 }
 0x34a   : > { %v954_v17 = vadd.f32 %v3057_v47, %v953_v13  ;;  %v1032_v18 = vadd.f32 %v3057_v47, %v1031_v14  ;;  %v2069_v19 = vpop.f32.mrb[55].mxu0  ;;  %v2105_v20 = vpop.f32.mrb[55].mxu1 }
 0x34c   : > { %v1064_v21 = vpack.c.bf16 %v954_v17, %v951_v15  ;;  %v1194_v22 = vpack.c.bf16 %v1032_v18, %v1029_v16  ;;  %2193 = vmatpush3.bf16.msra.mxu0 %v2383_v11  ;;  %2229 = vmatpush3.bf16.msra.mxu1 %v2384_v12 }
 0x34d   : > { %2194 = vmatprep.subr.bf16.mxu0 %v2587_v0  ;;  %2230 = vmatprep.subr.bf16.mxu1 %v2587_v0 }
 0x34e   : > { %2139 = vmatmul.mubr.bf16.gmra.mrb[72].mxu0 %v1064_v21  ;;  %2175 = vmatmul.mubr.bf16.gmra.mrb[72].mxu1 %v1194_v22 }
 0x34f   : > { %v958_v25 = vpop.f32.mrb[56].mxu0  ;;  %v1036_v26 = vpop.f32.mrb[56].mxu1  ;;  %2142 = vmatprep.mubr.msk.bf16.mxu0 %vm2588_vm0, %v2587_v0  ;;  %2178 = vmatprep.mubr.msk.bf16.mxu1 %vm2588_vm0, %v2587_v0 }
 0x350   : > { %v2072_v27 = vpop.f32.mrb[57].mxu0  ;;  %v2108_v28 = vpop.f32.mrb[57].mxu1  ;;  %2195 = vmatpush3.bf16.msra.mxu0 %v2385_v23  ;;  %2231 = vmatpush3.bf16.msra.mxu1 %v2386_v24  ;;  %v959_v31 = vadd.f32 %v3057_v47, %v958_v25  ;;  %v1037_v32 = vadd.f32 %v3057_v47, %v1036_v26 }
 0x351   : > { %v961_v29 = vpop.f32.mrb[58].mxu0  ;;  %v1039_v30 = vpop.f32.mrb[58].mxu1  ;;  %2196 = vmatprep.subr.bf16.mxu0 %v2587_v0  ;;  %2232 = vmatprep.subr.bf16.mxu1 %v2587_v0 }
 0x352   : > { %v962_v33 = vadd.f32 %v3057_v47, %v961_v29  ;;  %v1040_v34 = vadd.f32 %v3057_v47, %v1039_v30  ;;  %v2073_v35 = vpop.f32.mrb[59].mxu0  ;;  %v2109_v36 = vpop.f32.mrb[59].mxu1  ;;  %v3116_v47 = vld [vmem:[%s3258_s4 + $0x2] ss:$0 sm:$0xff] }
 0x354   : > { %v1065_v37 = vpack.c.bf16 %v962_v33, %v959_v31  ;;  %v1195_v38 = vpack.c.bf16 %v1040_v34, %v1037_v32  ;;  %2197 = vmatpush3.bf16.msra.mxu0 %v2387_v39  ;;  %2233 = vmatpush3.bf16.msra.mxu1 %v2388_v40 }
 0x356   : > { %2143 = vmatmul.mubr.bf16.gmra.mrb[76].mxu0 %v1065_v37  ;;  %2179 = vmatmul.mubr.bf16.gmra.mrb[76].mxu1 %v1195_v38 }
 0x357   : > { %2198 = vmatprep.mubr.msk.bf16.mxu0 %vm2588_vm0, %v2587_v0  ;;  %2234 = vmatprep.mubr.msk.bf16.mxu1 %vm2588_vm0, %v2587_v0 }
 0x409   : > { %v1152_v41 = vpop.f32.mrb[60].mxu0  ;;  %v1230_v42 = vpop.f32.mrb[60].mxu1 }
 0x40a   : > { %v2128_v43 = vpop.f32.mrb[61].mxu0  ;;  %v2164_v44 = vpop.f32.mrb[61].mxu1  ;;  %v1153_v48 = vadd.f32 %v3116_v47, %v1152_v41  ;;  %v1231_v49 = vadd.f32 %v3116_v47, %v1230_v42 }
 0x40b   : > { %v1155_v45 = vpop.f32.mrb[62].mxu0  ;;  %v1233_v46 = vpop.f32.mrb[62].mxu1 }
 0x40c   : > { %v1156_v50 = vadd.f32 %v3116_v47, %v1155_v45  ;;  %v1234_v51 = vadd.f32 %v3116_v47, %v1233_v46  ;;  %v2129_v52 = vpop.f32.mrb[63].mxu0  ;;  %v2165_v53 = vpop.f32.mrb[63].mxu1 }
 0x40e   : > { %v1269_v54 = vpack.c.bf16 %v1156_v50, %v1153_v48  ;;  %v1427_v55 = vpack.c.bf16 %v1234_v51, %v1231_v49 }
 0x410   : > { %2199 = vmatmul.mubr.bf16.vlgmr.msra.gmra.mrb[80].mxu0 %v1269_v54  ;;  %2235 = vmatmul.mubr.bf16.vlgmr.msra.gmra.mrb[80].mxu1 %v1427_v55 }
 0x411   : > { %v1160_v56 = vpop.f32.mrb[64].mxu0  ;;  %v1238_v57 = vpop.f32.mrb[64].mxu1  ;;  %2202 = vmatprep.mubr.msk.bf16.mxu0 %vm2588_vm0, %v2587_v0  ;;  %2238 = vmatprep.mubr.msk.bf16.mxu1 %vm2588_vm0, %v2587_v0 }
 0x412   : > { %v2132_v58 = vpop.f32.mrb[65].mxu0  ;;  %v2168_v59 = vpop.f32.mrb[65].mxu1  ;;  %v1161_v62 = vadd.f32 %v3116_v47, %v1160_v56  ;;  %v1239_v63 = vadd.f32 %v3116_v47, %v1238_v57 }
 0x413   : > { %v1163_v60 = vpop.f32.mrb[66].mxu0  ;;  %v1241_v61 = vpop.f32.mrb[66].mxu1 }
 0x414   : > { %v1164_v1 = vadd.f32 %v3116_v47, %v1163_v60  ;;  %v1242_v2 = vadd.f32 %v3116_v47, %v1241_v61  ;;  %v2133_v3 = vpop.f32.mrb[67].mxu0  ;;  %v2169_v4 = vpop.f32.mrb[67].mxu1 }
 0x416   : > { %v1270_v5 = vpack.c.bf16 %v1164_v1, %v1161_v62  ;;  %v1428_v6 = vpack.c.bf16 %v1242_v2, %v1239_v63 }
 0x418   : > { %2203 = vmatmul.mubr.bf16.gmra.mrb[84].mxu0 %v1270_v5  ;;  %2239 = vmatmul.mubr.bf16.gmra.mrb[84].mxu1 %v1428_v6 }
 0x419   : > { %v1168_v7 = vpop.f32.mrb[68].mxu0  ;;  %v1246_v8 = vpop.f32.mrb[68].mxu1  ;;  %2206 = vmatprep.mubr.msk.bf16.mxu0 %vm2588_vm0, %v2587_v0  ;;  %2242 = vmatprep.mubr.msk.bf16.mxu1 %vm2588_vm0, %v2587_v0 }
 0x41a   : > { %v2136_v9 = vpop.f32.mrb[69].mxu0  ;;  %v2172_v10 = vpop.f32.mrb[69].mxu1  ;;  %v1169_v13 = vadd.f32 %v3116_v47, %v1168_v7  ;;  %v1247_v14 = vadd.f32 %v3116_v47, %v1246_v8 }
 0x41b   : > { %v1171_v11 = vpop.f32.mrb[70].mxu0  ;;  %v1249_v12 = vpop.f32.mrb[70].mxu1 }
 0x41c   : > { %v1172_v15 = vadd.f32 %v3116_v47, %v1171_v11  ;;  %v1250_v16 = vadd.f32 %v3116_v47, %v1249_v12  ;;  %v2137_v17 = vpop.f32.mrb[71].mxu0  ;;  %v2173_v18 = vpop.f32.mrb[71].mxu1 }
 0x41e   : > { %v1271_v19 = vpack.c.bf16 %v1172_v15, %v1169_v13  ;;  %v1429_v20 = vpack.c.bf16 %v1250_v16, %v1247_v14 }
 0x420   : > { %2207 = vmatmul.mubr.bf16.gmra.mrb[88].mxu0 %v1271_v19  ;;  %2243 = vmatmul.mubr.bf16.gmra.mrb[88].mxu1 %v1429_v20 }
 0x421   : > { %v1176_v21 = vpop.f32.mrb[72].mxu0  ;;  %v1254_v22 = vpop.f32.mrb[72].mxu1  ;;  %2210 = vmatprep.mubr.msk.bf16.mxu0 %vm2588_vm0, %v2587_v0  ;;  %2246 = vmatprep.mubr.msk.bf16.mxu1 %vm2588_vm0, %v2587_v0 }
 0x422   : > { %v2140_v23 = vpop.f32.mrb[73].mxu0  ;;  %v2176_v24 = vpop.f32.mrb[73].mxu1  ;;  %v1177_v27 = vadd.f32 %v3116_v47, %v1176_v21  ;;  %v1255_v28 = vadd.f32 %v3116_v47, %v1254_v22 }
 0x423   : > { %v1179_v25 = vpop.f32.mrb[74].mxu0  ;;  %v1257_v26 = vpop.f32.mrb[74].mxu1 }
 0x424   : > { %v1180_v29 = vadd.f32 %v3116_v47, %v1179_v25  ;;  %v1258_v30 = vadd.f32 %v3116_v47, %v1257_v26  ;;  %v2141_v31 = vpop.f32.mrb[75].mxu0  ;;  %v2177_v32 = vpop.f32.mrb[75].mxu1 }
 0x426   : > { %v1272_v33 = vpack.c.bf16 %v1180_v29, %v1177_v27  ;;  %v1430_v34 = vpack.c.bf16 %v1258_v30, %v1255_v28 }
 0x428   : > { %2211 = vmatmul.mubr.bf16.gmra.mrb[92].mxu0 %v1272_v33  ;;  %2247 = vmatmul.mubr.bf16.gmra.mrb[92].mxu1 %v1430_v34 }
 0x429   : > { %v1184_v35 = vpop.f32.mrb[76].mxu0  ;;  %v1262_v36 = vpop.f32.mrb[76].mxu1  ;;  %2214 = vmatprep.mubr.msk.bf16.mxu0 %vm2588_vm0, %v2587_v0  ;;  %2250 = vmatprep.mubr.msk.bf16.mxu1 %vm2588_vm0, %v2587_v0  ;;  %v3157_v0 = vld [vmem:[%s3260_s6] ss:$0 sm:$0xff] }
 0x42a   : > { %v2144_v37 = vpop.f32.mrb[77].mxu0  ;;  %v2180_v38 = vpop.f32.mrb[77].mxu1  ;;  %v1185_v41 = vadd.f32 %v3116_v47, %v1184_v35  ;;  %v1263_v42 = vadd.f32 %v3116_v47, %v1262_v36 }
 0x42b   : > { %v1187_v39 = vpop.f32.mrb[78].mxu0  ;;  %v1265_v40 = vpop.f32.mrb[78].mxu1 }
 0x42c   : > { %v1188_v43 = vadd.f32 %v3116_v47, %v1187_v39  ;;  %v1266_v44 = vadd.f32 %v3116_v47, %v1265_v40  ;;  %v2145_v45 = vpop.f32.mrb[79].mxu0  ;;  %v2181_v46 = vpop.f32.mrb[79].mxu1 }
 0x42e   : > { %v1273_v48 = vpack.c.bf16 %v1188_v43, %v1185_v41  ;;  %v1431_v49 = vpack.c.bf16 %v1266_v44, %v1263_v42 }
 0x430   : > { %2215 = vmatmul.mubr.bf16.gmra.mrb[96].mxu0 %v1273_v48  ;;  %2251 = vmatmul.mubr.bf16.gmra.mrb[96].mxu1 %v1431_v49 }
 0x4e3   : > { %v1378_v50 = vpop.f32.mrb[80].mxu0  ;;  %v1530_v51 = vpop.f32.mrb[80].mxu1 }
 0x4e4   : > { %v1379_v52 = vadd.f32 %v3157_v0, %v1378_v50  ;;  %v1531_v53 = vadd.f32 %v3157_v0, %v1530_v51  ;;  %v2200_v54 = vpop.f32.mrb[81].mxu0  ;;  %v2236_v47 = vpop.f32.mrb[81].mxu1 }
 0x4e5   : > { %v1381_v55 = vpop.f32.mrb[82].mxu0  ;;  %v1533_v56 = vpop.f32.mrb[82].mxu1 }
 0x4e6   : > { %1417 = vst [vmem:[%s3163_s17] sm:$0xff] %v1379_v52  ;;  %1569 = vst [vmem:[%s3163_s17 + $0x50] sm:$0xff] %v1531_v53  ;;  %v1382_v57 = vadd.f32 %v3157_v0, %v1381_v55  ;;  %v1534_v58 = vadd.f32 %v3157_v0, %v1533_v56  ;;  %v2201_v59 = vpop.f32.mrb[83].mxu0  ;;  %v2237_v60 = vpop.f32.mrb[83].mxu1 }
 0x4e8   : > { %1418 = vst [vmem:[%s3163_s17 + $0x8] sm:$0xff] %v1382_v57  ;;  %1570 = vst [vmem:[%s3163_s17 + $0x58] sm:$0xff] %v1534_v58 }
 0x4eb   : > { %v1386_v61 = vpop.f32.mrb[84].mxu0  ;;  %v1538_v62 = vpop.f32.mrb[84].mxu1 }
 0x4ec   : > { %v1387_v63 = vadd.f32 %v3157_v0, %v1386_v61  ;;  %v1539_v1 = vadd.f32 %v3157_v0, %v1538_v62  ;;  %v2204_v2 = vpop.f32.mrb[85].mxu0  ;;  %v2240_v3 = vpop.f32.mrb[85].mxu1 }
 0x4ed   : > { %v1389_v4 = vpop.f32.mrb[86].mxu0  ;;  %v1541_v5 = vpop.f32.mrb[86].mxu1 }
 0x4ee   : > { %1419 = vst [vmem:[%s3163_s17 + $0x10] sm:$0xff] %v1387_v63  ;;  %1571 = vst [vmem:[%s3163_s17 + $0x60] sm:$0xff] %v1539_v1  ;;  %v1390_v6 = vadd.f32 %v3157_v0, %v1389_v4  ;;  %v1542_v7 = vadd.f32 %v3157_v0, %v1541_v5  ;;  %v2205_v8 = vpop.f32.mrb[87].mxu0  ;;  %v2241_v9 = vpop.f32.mrb[87].mxu1 }
 0x4f0   : > { %1420 = vst [vmem:[%s3163_s17 + $0x18] sm:$0xff] %v1390_v6  ;;  %1572 = vst [vmem:[%s3163_s17 + $0x68] sm:$0xff] %v1542_v7 }
 0x4f3   : > { %v1394_v10 = vpop.f32.mrb[88].mxu0  ;;  %v1546_v11 = vpop.f32.mrb[88].mxu1 }
 0x4f4   : > { %v1395_v12 = vadd.f32 %v3157_v0, %v1394_v10  ;;  %v1547_v13 = vadd.f32 %v3157_v0, %v1546_v11  ;;  %v2208_v14 = vpop.f32.mrb[89].mxu0  ;;  %v2244_v15 = vpop.f32.mrb[89].mxu1 }
 0x4f5   : > { %v1397_v16 = vpop.f32.mrb[90].mxu0  ;;  %v1549_v17 = vpop.f32.mrb[90].mxu1 }
 0x4f6   : > { %1421 = vst [vmem:[%s3163_s17 + $0x20] sm:$0xff] %v1395_v12  ;;  %1573 = vst [vmem:[%s3163_s17 + $0x70] sm:$0xff] %v1547_v13  ;;  %v1398_v18 = vadd.f32 %v3157_v0, %v1397_v16  ;;  %v1550_v19 = vadd.f32 %v3157_v0, %v1549_v17  ;;  %v2209_v20 = vpop.f32.mrb[91].mxu0  ;;  %v2245_v21 = vpop.f32.mrb[91].mxu1 }
 0x4f8   : > { %1422 = vst [vmem:[%s3163_s17 + $0x28] sm:$0xff] %v1398_v18  ;;  %1574 = vst [vmem:[%s3163_s17 + $0x78] sm:$0xff] %v1550_v19 }
 0x4fb   : > { %v1402_v22 = vpop.f32.mrb[92].mxu0  ;;  %v1554_v23 = vpop.f32.mrb[92].mxu1 }
 0x4fc   : > { %v1403_v24 = vadd.f32 %v3157_v0, %v1402_v22  ;;  %v1555_v25 = vadd.f32 %v3157_v0, %v1554_v23  ;;  %v2212_v26 = vpop.f32.mrb[93].mxu0  ;;  %v2248_v27 = vpop.f32.mrb[93].mxu1 }
 0x4fd   : > { %v1405_v28 = vpop.f32.mrb[94].mxu0  ;;  %v1557_v29 = vpop.f32.mrb[94].mxu1 }
 0x4fe   : > { %1423 = vst [vmem:[%s3163_s17 + $0x30] sm:$0xff] %v1403_v24  ;;  %1575 = vst [vmem:[%s3163_s17 + $0x80] sm:$0xff] %v1555_v25  ;;  %v1406_v30 = vadd.f32 %v3157_v0, %v1405_v28  ;;  %v1558_v31 = vadd.f32 %v3157_v0, %v1557_v29  ;;  %v2213_v32 = vpop.f32.mrb[95].mxu0  ;;  %v2249_v33 = vpop.f32.mrb[95].mxu1 }
 0x500   : > { %1424 = vst [vmem:[%s3163_s17 + $0x38] sm:$0xff] %v1406_v30  ;;  %1576 = vst [vmem:[%s3163_s17 + $0x88] sm:$0xff] %v1558_v31 }
 0x503   : > { %v1410_v34 = vpop.f32.mrb[96].mxu0  ;;  %v1562_v35 = vpop.f32.mrb[96].mxu1 }
 0x504   : > { %v1411_v36 = vadd.f32 %v3157_v0, %v1410_v34  ;;  %v1563_v37 = vadd.f32 %v3157_v0, %v1562_v35  ;;  %v2216_v38 = vpop.f32.mrb[97].mxu0  ;;  %v2252_v39 = vpop.f32.mrb[97].mxu1 }
 0x505   : > { %v1413_v40 = vpop.f32.mrb[98].mxu0  ;;  %v1565_v41 = vpop.f32.mrb[98].mxu1 }
 0x506   : > { %1425 = vst [vmem:[%s3163_s17 + $0x40] sm:$0xff] %v1411_v36  ;;  %1577 = vst [vmem:[%s3163_s17 + $0x90] sm:$0xff] %v1563_v37  ;;  %v1414_v42 = vadd.f32 %v3157_v0, %v1413_v40  ;;  %v1566_v43 = vadd.f32 %v3157_v0, %v1565_v41  ;;  %v2217_v44 = vpop.f32.mrb[99].mxu0  ;;  %v2253_v45 = vpop.f32.mrb[99].mxu1 }
 0x508   : > { %1426 = vst [vmem:[%s3163_s17 + $0x48] sm:$0xff] %v1414_v42  ;;  %1578 = vst [vmem:[%s3163_s17 + $0x98] sm:$0xff] %v1566_v43 }
 0x509   : > { %2516 = shalt.err (!%p2513_p4)
}
 0x50a   : > { %s2517_s16 = scalar_lea.hbm %s3202_s9, 2560  ;;  %s2521_s8 = scalar_lea.hbm %s3261_s7, 5120 }
 0x50b   : > { %p2518_p9 = scmp.ne.s32.totalorder %s3202_s9, %s2517_s16  ;;  %p2522_p8 = scmp.lt.u32.totalorder %s3202_s9, %s3261_s7 }
 0x50c   : > { %p2523_p13 = scmp.lt.u32.totalorder %s2521_s8, %s2517_s16  ;;  %p2525_p10 = scmp.lt.u32.totalorder %s2517_s16, %s3202_s9 }
 0x50d   : > { %p2519_p0 = pnand %p2518_p9, %p2786_p5 }
 0x50e   : > { %p2524_p6 = por %p2523_p13, %p2522_p8 }
 0x50f   : > { %p2520_p11 = pneg %p2519_p0 }
 0x510   : > { %p2526_p3 = por %p2525_p10, %p2524_p6 }
 0x512   : > { %p2527_p7 = pnand %p2526_p3, %p2520_p11 }
 0x514   : > { %2530 = shalt.err (!%p2527_p7)
}
 0x515   : > { %s2590_s20 = smov 128   ;;  %s2591_s30 = smov 8  }
 0x516   : > { %2270 = dma.vmem_to_hbm [thread:$0]  (%p2786_p5), %s3204_s15, 2560, %s3202_s9, %s1580_s28, %s2590_s20, %s2590_s20, %s2591_s30  }
 0x517 PF: > { %s3281_s23 = sld [smem:[#allocation15_spill]]  ;;  %s1608_s29 = sand.u32 1, %s2565_s24  }
 0x518   : > { %p3283_p1 = scmp.ge.s32.totalorder %s2577_s27, 2  ;;  %s1609_s11 = scalar_lea.sflag [#allocation4], %s1608_s29 }
 0x51d   : > { %p3282_p12 = scmp.ne.s32.totalorder %s3281_s23, 0 }
 0x51f   : > { %p2287_p2 = pnand %p3283_p1, %p3282_p12 }
 0x521   : > { %2560 = dma.done.wait (!%p2287_p2), %s1609_s11, 2560  }
 0x522   : > { %2562 = vsyncadd (!%p2287_p2), %s1609_s11, 4294964736  ;;  %p22_p4 = scmp.ge.s32.totalorder %s2772_s22, 4   ;;  %s3284_s24 = smov %s2569_s25 }
 0x523   : > { %s3285_s25 = smov %s2573_s26  ;;  %s3286_s26 = smov %s2782_s18 }
 0x524   : > { %s3287_s27 = smov %s2772_s22  ;;  %24 = sbr.rel (!%p22_p4) target bundleno = 7 (0x7), region = 107 }
 0x52b   :  { %1614 = vsyncpa [#allocation3], 1 }
 0x52c   :  { %1616 = vsyncpa [#allocation3 + $0x1], 1 }
 0x52d   :  { %1617 = vsyncpa [#allocation6], 1 }
 0x52e   :  { %1618 = vsyncpa [#allocation9], 1 }
 0x52f   :  { %1619 = vsyncpa [#allocation4], 1 }
 0x530   :  { %1621 = vsyncpa [#allocation4 + $0x1], 1 }

// kernel: tpu_custom_call.1
= control target key start
LH: loop header
LB: loop body
LE: loop exit
PB: predicated region body
PF: predicated region fallthrough
CT: control target
= control target key end

     0   :  { %12 = vsyncpa [#allocation3], 0  ;;  %s3254_s0 = inlined_call_operand.hbm [shape: f32[320,128], index: 0, kind: input, shape index: {}]   ;;  %s3255_s1 = inlined_call_operand.hbm [shape: bf16[128,128], index: 1, kind: input, shape index: {}]   ;;  %s3256_s2 = inlined_call_operand.vmem [shape: f32[1,128], index: 2, kind: input, shape index: {}]   ;;  %s3257_s3 = inlined_call_operand.hbm [shape: bf16[3,128,128], index: 3, kind: input, shape index: {}]   ;;  %s3258_s4 = inlined_call_operand.vmem [shape: f32[3,128], index: 4, kind: input, shape index: {}]   ;;  %s3259_s5 = inlined_call_operand.hbm [shape: bf16[128,128], index: 5, kind: input, shape index: {}]   ;;  %s3260_s6 = inlined_call_operand.vmem [shape: f32[1,128], index: 6, kind: input, shape index: {}]   ;;  %s3261_s7 = inlined_call_operand.hbm [shape: f32[320,128], index: 7, kind: output, shape index: {}]  }
   0x1   :  { %14 = vsyncpa [#allocation3 + $0x1], 0 }
   0x2   :  { %15 = vsyncpa [#allocation6], 0 }
   0x3   :  { %16 = vsyncpa [#allocation9], 0 }
   0x4   :  { %17 = vsyncpa [#allocation4], 0 }
   0x5   :  { %19 = vsyncpa [#allocation4 + $0x1], 0  ;;  %s2632_s24 = smov 0   ;;  %s2634_s25 = smov 0  }
   0x6   :  { %s2636_s26 = smov 0   ;;  %s2638_s27 = smov 0  }
   0x7 LB: > { %s2653_s28 = sadd.s32 4294967295, %s2577_s27   ;;  %s1695_s29 = sadd.s32 4294967294, %s2577_s27   ;;  %s2577_s27 = sphi %s2638_s27, %s3287_s27   ;;  %s2573_s26 = sphi %s2636_s26, %s3286_s26   ;;  %s2569_s25 = sphi %s2634_s25, %s3285_s25   ;;  %s2565_s24 = sphi %s2632_s24, %s3284_s24  }
   0x8   : > { %p45_p0 = scmp.ne.s32.totalorder %s2569_s25, %s2565_s24  ;;  %p3262_p1 = scmp.eq.s32.totalorder %s2653_s28, 0 }
   0x9   : > { %p201_p3 = scmp.eq.s32.totalorder %s1695_s29, 1  ;;  %p1696_p5 = scmp.ge.s32.totalorder %s2577_s27, 1 }
   0xa   : > { %p2662_p4 = por %p3262_p1, %p45_p0  ;;  %p208_p7 = scmp.lt.s32.totalorder %s2577_s27, 3 }
   0xb   : > { %p2667_p6 = por %p201_p3, %p45_p0  ;;  %s2579_s10 = smov [#allocation5]  }
   0xc   : > { %s3266_s30 = scalar_select %p2662_p4, 1, 0 }
   0xd   : > { %s3267_s8 = scalar_select %p2667_p6, 1, 0 }
   0xe   : > { %p2672_p8 = pnand %p1696_p5, %p208_p7  ;;  %s220_s11 = sshll.u32 %s2579_s10, 4  ;;  %s2676_s11 = int_to_ptr.vmem [resolvable:$true] %s220_s11 }
   0xf   : > { %3268 = sst [smem:[#allocation15_spill]] %s3267_s8  ;;  %s2580_s13 = smov [#allocation7]  }
  0x10   : > { %s3269_s9 = scalar_select %p2672_p8, 1, 0 }
  0x11   : > { %p2272_p9 = pneg %p2672_p8  ;;  %s236_s14 = sshll.u32 %s2580_s13, 4  ;;  %s2687_s14 = int_to_ptr.vmem [resolvable:$true] %s236_s14 }
  0x12   : > { %s2581_s15 = smov [#allocation8]   ;;  %s2389_s19 = scalar_lea.hbm %s3255_s1, 1024 }
  0x13   : > { %p2683_p11 = pnand %p2272_p9, %p3262_p1  ;;  %s2689_s16 = sshll.u32 %s2581_s15, 4  ;;  %s253_s16 = int_to_ptr.vmem [resolvable:$true] %s2689_s16 }
  0x14   : > { %p2390_p12 = scmp.ne.s32.totalorder %s3255_s1, %s2389_s19  ;;  %p2396_p5 = scmp.lt.u32.totalorder %s2389_s19, %s3255_s1 }
  0x15   : > { %p2699_p13 = pneg %p2683_p11 }
  0x17   : > { %p2392_p0 = pnand %p2699_p13, %p2390_p12 }
  0x19   : > { %p2393_p3 = pneg %p2392_p0 }
  0x1b   : > { %p2398_p7 = pnand %p2396_p5, %p2393_p3 }
  0x1d   : > { %2401 = shalt.err (!%p2398_p7)
}
  0x1e   : > { %s2402_s10 = scalar_lea.vmem %s2676_s11, 1024  ;;  %p2410_p2 = scmp.lt.s32.totalorder %s2676_s11, %s2676_s11 }
  0x1f   : > { %p2403_p9 = scmp.ne.s32.totalorder %s2676_s11, %s2402_s10  ;;  %p2411_p6 = scmp.lt.s32.totalorder %s2402_s10, %s2402_s10 }
  0x21   : > { %p2405_p10 = pnand %p2403_p9, %p2699_p13  ;;  %p2412_p12 = por %p2411_p6, %p2410_p2 }
  0x23   : > { %p2406_p1 = pneg %p2405_p10 }
  0x25   : > { %p2413_p0 = pnand %p2412_p12, %p2406_p1 }
  0x27   : > { %2416 = shalt.err (!%p2413_p0)
}
  0x28   : > { %s2582_s13 = smov 64   ;;  %s2583_s15 = smov 4  }
  0x29   : > { %2275 = dma.hbm_to_vmem [thread:$0]  (!%p2683_p11), %s3255_s1, 1024, %s2676_s11, [#allocation6], %s2582_s13, %s2582_s13, %s2583_s15  }
  0x2a   : > { %s2417_s21 = scalar_lea.hbm %s3257_s3, 3072 }
  0x2b   : > { %p2418_p1 = scmp.ne.s32.totalorder %s3257_s3, %s2417_s21  ;;  %p2424_p10 = scmp.lt.u32.totalorder %s2417_s21, %s3257_s3 }
  0x2d   : > { %p2420_p2 = pnand %p2418_p1, %p2699_p13 }
  0x2f   : > { %p2421_p6 = pneg %p2420_p2 }
  0x31   : > { %p2426_p3 = pnand %p2424_p10, %p2421_p6 }
  0x33   : > { %2429 = shalt.err (!%p2426_p3)
}
  0x34   : > { %s2430_s11 = scalar_lea.vmem %s2687_s14, 3072  ;;  %p2438_p12 = scmp.lt.s32.totalorder %s2687_s14, %s2687_s14 }
  0x35   : > { %p2431_p5 = scmp.ne.s32.totalorder %s2687_s14, %s2430_s11  ;;  %p2439_p0 = scmp.lt.s32.totalorder %s2430_s11, %s2430_s11 }
  0x37   : > { %p2433_p7 = pnand %p2431_p5, %p2699_p13  ;;  %p2440_p1 = por %p2439_p0, %p2438_p12 }
  0x39   : > { %p2434_p9 = pneg %p2433_p7 }
  0x3b   : > { %p2441_p2 = pnand %p2440_p1, %p2434_p9 }
  0x3d   : > { %2444 = shalt.err (!%p2441_p2)
}
  0x3e   : > { %2278 = dma.hbm_to_vmem [thread:$0]  (!%p2683_p11), %s3257_s3, 3072, %s2687_s14, [#allocation6], %s2582_s13, %s2582_s13, %s2583_s15  }
  0x3f   : > { %s2445_s20 = scalar_lea.hbm %s3259_s5, 1024 }
  0x40   : > { %p2446_p6 = scmp.ne.s32.totalorder %s3259_s5, %s2445_s20  ;;  %p2452_p5 = scmp.lt.u32.totalorder %s2445_s20, %s3259_s5 }
  0x42   : > { %p2448_p10 = pnand %p2446_p6, %p2699_p13 }
  0x44   : > { %p2449_p3 = pneg %p2448_p10 }
  0x46   : > { %p2454_p7 = pnand %p2452_p5, %p2449_p3 }
  0x48   : > { %2457 = shalt.err (!%p2454_p7)
}
  0x49   : > { %s2458_s11 = scalar_lea.vmem %s253_s16, 1024  ;;  %p2466_p1 = scmp.lt.s32.totalorder %s253_s16, %s253_s16 }
  0x4a   : > { %p2459_p9 = scmp.ne.s32.totalorder %s253_s16, %s2458_s11  ;;  %p2467_p2 = scmp.lt.s32.totalorder %s2458_s11, %s2458_s11 }
  0x4c   : > { %p2461_p12 = pnand %p2459_p9, %p2699_p13  ;;  %p2468_p4 = por %p2467_p2, %p2466_p1 }
  0x4e   : > { %p2462_p0 = pneg %p2461_p12 }
  0x50   : > { %p2469_p8 = pnand %p2468_p4, %p2462_p0 }
  0x52   : > { %2472 = shalt.err (!%p2469_p8)
}
  0x53   : > { %2281 = dma.hbm_to_vmem [thread:$0]  (!%p2683_p11), %s3259_s5, 1024, %s253_s16, [#allocation9], %s2582_s13, %s2582_s13, %s2583_s15  }
  0x54   : > { %s2772_s22 = sadd.s32 1, %s2577_s27   ;;  %s32_s17 = sadd.s32 1, %s2573_s26 }
  0x55   : > { %s29_s12 = ssub.s32 %s2577_s27, %s2772_s22  ;;  %p39_p8 = scmp.ne.s32.totalorder %s2573_s26, %s2569_s25 }
  0x56   : > { %p30_p4 = scmp.eq.s32.totalorder %s29_s12, 0  ;;  %p40_p13 = scmp.eq.s32.totalorder %s2577_s27, 0 }
  0x57   : > { %p2293_p6 = scmp.lt.s32.totalorder %s2577_s27, 2  ;;  %p3272_p3 = scmp.eq.s32.totalorder %s2653_s28, 1 }
  0x58   : > { %s2782_s18 = scalar_select %p30_p4, %s2573_s26, %s32_s17  }
  0x59   : > { %p41_p10 = por %p40_p13, %p39_p8  ;;  %p2786_p5 = por %p3272_p3, %p39_p8 }
  0x5a   : > { %s269_s20 = sand.u32 1, %s2573_s26   ;;  %s1762_s21 = smul.u32 2560, %s2577_s27 }
  0x5b   : > { %s2254_s16 = smul.u32 160, %s269_s20  ;;  %p2797_p11 = pnand %p2293_p6, %p41_p10 }
  0x5c   : > { %s2795_s23 = scalar_lea.hbm %s3254_s0, %s1762_s21  ;;  %s2803_s14 = scalar_lea.sflag [#allocation3], %s269_s20 }
  0x5d   : > { %s273_s10 = scalar_lea.vmem [#allocation2], %s2254_s16  ;;  %s2473_s8 = scalar_lea.hbm %s2795_s23, 2560 }
  0x5e   : > { %s280_s11 = sshll.u32 %s273_s10, 4  ;;  %p2474_p7 = scmp.ne.s32.totalorder %s2795_s23, %s2473_s8  ;;  %s2801_s11 = int_to_ptr.vmem [resolvable:$true] %s280_s11 }
  0x5f   : > { %p2475_p9 = pneg %p2797_p11  ;;  %s2478_s21 = scalar_lea.hbm %s3254_s0, 5120 }
  0x60   : > { %p2479_p1 = scmp.lt.u32.totalorder %s2795_s23, %s3254_s0  ;;  %p2480_p2 = scmp.lt.u32.totalorder %s2478_s21, %s2473_s8 }
  0x61   : > { %p2476_p12 = pnand %p2475_p9, %p2474_p7  ;;  %p2482_p8 = scmp.lt.u32.totalorder %s2473_s8, %s2795_s23 }
  0x62   : > { %p2481_p4 = por %p2480_p2, %p2479_p1 }
  0x63   : > { %p2477_p0 = pneg %p2476_p12 }
  0x64   : > { %p2483_p13 = por %p2482_p8, %p2481_p4 }
  0x66   : > { %p2484_p6 = pnand %p2483_p13, %p2477_p0 }
  0x68   : > { %2487 = shalt.err (!%p2484_p6)
}
  0x69   : > { %s2488_s20 = scalar_lea.vmem %s2801_s11, 2560  ;;  %s2584_s16 = smov [#allocation2]  }
  0x6a   : > { %p2489_p10 = scmp.ne.s32.totalorder %s2801_s11, %s2488_s20  ;;  %s2493_s10 = sshll.u32 %s2584_s16, 4  ;;  %s2494_s10 = int_to_ptr.vmem [resolvable:$false] %s2493_s10 }
  0x6b   : > { %s2495_s12 = scalar_lea.vmem %s2494_s10, 5120  ;;  %p2496_p12 = scmp.lt.s32.totalorder %s2801_s11, %s2494_s10 }
  0x6c   : > { %p2491_p3 = pnand %p2489_p10, %p2475_p9  ;;  %p2497_p1 = scmp.lt.s32.totalorder %s2495_s12, %s2488_s20 }
  0x6e   : > { %p2492_p7 = pneg %p2491_p3  ;;  %p2498_p2 = por %p2497_p1, %p2496_p12 }
  0x70   : > { %p2499_p4 = pnand %p2498_p2, %p2492_p7 }
  0x72   : > { %2502 = shalt.err (!%p2499_p4)
}
  0x73   : > { %s2585_s8 = smov 128   ;;  %s2586_s17 = smov 8  }
  0x74   : > { %2285 = dma.hbm_to_vmem [thread:$0]  (!%p2797_p11), %s2795_s23, 2560, %s2801_s11, %s2803_s14, %s2585_s8, %s2585_s8, %s2586_s17  }
  0x75   : > { %p3275_p9 = scmp.ne.s32.totalorder %s3269_s9, 0 }
  0x76   : > { %s2834_s21 = sand.u32 (!%p3275_p9), 1, %s2569_s25   ;;  %p3276_p0 = scmp.ne.s32.totalorder (!%p3275_p9), %s3266_s30, 0 }
  0x77   : > { %292 = sbr.rel (%p3275_p9) target bundleno = 1303 (0x517), region = 48  ;;  %s295_s15 = scalar_lea.sflag (!%p3275_p9), [#allocation3], %s2834_s21 }
  0x78   : > { %s2255_s13 = smul.u32 (!%p3275_p9), 160, %s2834_s21 }
  0x7a   : > { %s2840_s20 = scalar_lea.vmem (!%p3275_p9), [#allocation2], %s2255_s13 }
  0x7e   : > { %2548 = dma.done.wait (%p3276_p0), %s295_s15, 2560  }
  0x7f   : > { %2550 = vsyncadd (%p3276_p0), %s295_s15, 4294964736  ;;  %p3277_p11 = scmp.eq.s32.totalorder %s2653_s28, 0 }
  0x81   : > { %2552 = dma.done.wait (%p3277_p11), [#allocation6], 4096   ;;  %p3278_p8 = pmov %p3277_p11 }
  0x83   : > { %2554 = vsyncadd (%p3278_p8), [#allocation6], 4294963200  ;;  %p3279_p13 = pmov %p3278_p8 }
  0x84   : > { %p3280_p6 = pmov %p3278_p8 }
  0x85   : > { %2556 = dma.done.wait (%p3279_p13), [#allocation9], 1024  }
  0x86   : > { %2558 = vsyncadd (%p3280_p6), [#allocation9], 4294966272  ;;  %v2587_v0 = vmov 0.0   ;;  %vm2588_vm0 = vmmov 0   ;;  %v2341_v1 = vld [vmem:[#allocation5] sm:$0xff]   ;;  %v2342_v2 = vld [vmem:[#allocation5 + $0x8] sm:$0xff]  }
  0x87   : > { %1894 = vmatprep.subr.bf16.mxu0 %v2587_v0  ;;  %1930 = vmatprep.subr.bf16.mxu1 %v2587_v0  ;;  %v2343_v3 = vld [vmem:[#allocation5 + $0x10] sm:$0xff]   ;;  %v2344_v4 = vld [vmem:[#allocation5 + $0x18] sm:$0xff]   ;;  %v2345_v5 = vld [vmem:[#allocation5 + $0x20] sm:$0xff]   ;;  %s3163_s17 = scalar_lea.vmem [#allocation10], %s2255_s13  ;;  %s1763_s13 = smul.u32 2560, %s2653_s28 }
  0x88   : > { %1910 = vmatprep.mubr.msk.bf16.mxu0 %vm2588_vm0, %v2587_v0  ;;  %1946 = vmatprep.mubr.msk.bf16.mxu1 %vm2588_vm0, %v2587_v0  ;;  %v2346_v6 = vld [vmem:[#allocation5 + $0x28] sm:$0xff]   ;;  %v2347_v7 = vld [vmem:[#allocation5 + $0x30] sm:$0xff]   ;;  %v2348_v8 = vld [vmem:[#allocation5 + $0x38] sm:$0xff]   ;;  %s1593_s15 = sshll.u32 %s3163_s17, 4  ;;  %s1580_s28 = scalar_lea.sflag [#allocation4], %s2834_s21  ;;  %s3204_s15 = int_to_ptr.vmem [resolvable:$true] %s1593_s15 }
  0x89   : > { %1895 = vmatpush3.bf16.msra.mxu0 %v2341_v1  ;;  %1931 = vmatpush3.bf16.msra.mxu1 %v2341_v1  ;;  %v346_v9 = vld [vmem:[%s2840_s20] sm:$0xff]  ;;  %v347_v10 = vld [vmem:[%s2840_s20 + $0x8] sm:$0xff]  ;;  %v504_v11 = vld [vmem:[%s2840_s20 + $0x50] sm:$0xff]  ;;  %s3202_s9 = scalar_lea.hbm %s3261_s7, %s1763_s13  ;;  %s2503_s23 = scalar_lea.vmem %s3204_s15, 2560 }
  0x8a   : > { %1896 = vmatprep.subr.bf16.mxu0 %v2587_v0  ;;  %1932 = vmatprep.subr.bf16.mxu1 %v2587_v0  ;;  %v505_v12 = vld [vmem:[%s2840_s20 + $0x58] sm:$0xff]  ;;  %v356_v13 = vpack.c.bf16 %v347_v10, %v346_v9  ;;  %v2349_v15 = vld [vmem:[#allocation7] sm:$0xff]   ;;  %v348_v16 = vld [vmem:[%s2840_s20 + $0x10] sm:$0xff]  ;;  %p2504_p10 = scmp.ne.s32.totalorder %s3204_s15, %s2503_s23  ;;  %s2589_s29 = smov [#allocation10]  }
  0x8b   : > { %v514_v14 = vpack.c.bf16 %v505_v12, %v504_v11  ;;  %v349_v17 = vld [vmem:[%s2840_s20 + $0x18] sm:$0xff]  ;;  %v506_v18 = vld [vmem:[%s2840_s20 + $0x60] sm:$0xff]  ;;  %v507_v19 = vld [vmem:[%s2840_s20 + $0x68] sm:$0xff]  ;;  %s2507_s11 = sshll.u32 %s2589_s29, 4  ;;  %s2508_s11 = int_to_ptr.vmem [resolvable:$false] %s2507_s11 }
  0x8c   : > { %v2350_v20 = vld [vmem:[#allocation7 + $0x8] sm:$0xff]   ;;  %v357_v21 = vpack.c.bf16 %v349_v17, %v348_v16  ;;  %v515_v22 = vpack.c.bf16 %v507_v19, %v506_v18  ;;  %v2351_v23 = vld [vmem:[#allocation7 + $0x10] sm:$0xff]   ;;  %v350_v24 = vld [vmem:[%s2840_s20 + $0x20] sm:$0xff]  ;;  %p2505_p3 = pnand %p2504_p10, %p2786_p5  ;;  %s2509_s14 = scalar_lea.vmem %s2508_s11, 5120 }
  0x8d   : > { %1897 = vmatpush3.bf16.msra.mxu0 %v2342_v2  ;;  %1933 = vmatpush3.bf16.msra.mxu1 %v2342_v2  ;;  %v351_v25 = vld [vmem:[%s2840_s20 + $0x28] sm:$0xff]  ;;  %v508_v26 = vld [vmem:[%s2840_s20 + $0x70] sm:$0xff]  ;;  %v509_v27 = vld [vmem:[%s2840_s20 + $0x78] sm:$0xff]  ;;  %p2510_p12 = scmp.lt.s32.totalorder %s3204_s15, %s2508_s11  ;;  %p2511_p1 = scmp.lt.s32.totalorder %s2509_s14, %s2503_s23 }
  0x8e   : > { %1898 = vmatprep.subr.bf16.mxu0 %v2587_v0  ;;  %1934 = vmatprep.subr.bf16.mxu1 %v2587_v0  ;;  %v2352_v28 = vld [vmem:[#allocation7 + $0x18] sm:$0xff]   ;;  %v358_v29 = vpack.c.bf16 %v351_v25, %v350_v24  ;;  %v516_v30 = vpack.c.bf16 %v509_v27, %v508_v26  ;;  %v2353_v31 = vld [vmem:[#allocation7 + $0x20] sm:$0xff]   ;;  %v352_v32 = vld [vmem:[%s2840_s20 + $0x30] sm:$0xff]  ;;  %p2506_p7 = pneg %p2505_p3 }
  0x8f   : > { %v353_v33 = vld [vmem:[%s2840_s20 + $0x38] sm:$0xff]  ;;  %v510_v34 = vld [vmem:[%s2840_s20 + $0x80] sm:$0xff]  ;;  %v511_v35 = vld [vmem:[%s2840_s20 + $0x88] sm:$0xff]  ;;  %p2512_p2 = por %p2511_p1, %p2510_p12 }
  0x90   : > { %v2354_v36 = vld [vmem:[#allocation7 + $0x28] sm:$0xff]   ;;  %v359_v37 = vpack.c.bf16 %v353_v33, %v352_v32  ;;  %v517_v38 = vpack.c.bf16 %v511_v35, %v510_v34  ;;  %v2355_v39 = vld [vmem:[#allocation7 + $0x30] sm:$0xff]   ;;  %v354_v40 = vld [vmem:[%s2840_s20 + $0x40] sm:$0xff] }
  0x91   : > { %1899 = vmatpush3.bf16.msra.mxu0 %v2343_v3  ;;  %1935 = vmatpush3.bf16.msra.mxu1 %v2343_v3  ;;  %v355_v41 = vld [vmem:[%s2840_s20 + $0x48] sm:$0xff]  ;;  %v512_v42 = vld [vmem:[%s2840_s20 + $0x90] sm:$0xff]  ;;  %v513_v43 = vld [vmem:[%s2840_s20 + $0x98] sm:$0xff]  ;;  %p2513_p4 = pnand %p2512_p2, %p2506_p7 }
  0x92   : > { %1900 = vmatprep.subr.bf16.mxu0 %v2587_v0  ;;  %1936 = vmatprep.subr.bf16.mxu1 %v2587_v0  ;;  %v360_v44 = vpack.c.bf16 %v355_v41, %v354_v40  ;;  %v518_v45 = vpack.c.bf16 %v513_v43, %v512_v42  ;;  %v2356_v46 = vld [vmem:[#allocation7 + $0x38] sm:$0xff]   ;;  %v2935_v47 = vld [vmem:[%s3256_s2] ss:$0 sm:$0xff] }
  0x93   : > { %v2357_v62 = vld [vmem:[#allocation7 + $0x40] sm:$0xff]  }
  0x95   : > { %1901 = vmatpush3.bf16.msra.mxu0 %v2344_v4  ;;  %1937 = vmatpush3.bf16.msra.mxu1 %v2344_v4  ;;  %v2358_v4 = vld [vmem:[#allocation7 + $0x48] sm:$0xff]  }
  0x96   : > { %1902 = vmatprep.subr.bf16.mxu0 %v2587_v0  ;;  %1938 = vmatprep.subr.bf16.mxu1 %v2587_v0 }
  0x99   : > { %1903 = vmatpush3.bf16.msra.mxu0 %v2345_v5  ;;  %1939 = vmatpush3.bf16.msra.mxu1 %v2345_v5 }
  0x9a   : > { %1904 = vmatprep.subr.bf16.mxu0 %v2587_v0  ;;  %1940 = vmatprep.subr.bf16.mxu1 %v2587_v0 }
  0x9d   : > { %1905 = vmatpush3.bf16.msra.mxu0 %v2346_v6  ;;  %1941 = vmatpush3.bf16.msra.mxu1 %v2346_v6 }
  0x9e   : > { %1906 = vmatprep.subr.bf16.mxu0 %v2587_v0  ;;  %1942 = vmatprep.subr.bf16.mxu1 %v2587_v0 }
  0xa1   : > { %1907 = vmatpush3.bf16.msra.mxu0 %v2347_v7  ;;  %1943 = vmatpush3.bf16.msra.mxu1 %v2347_v7 }
  0xa2   : > { %1908 = vmatprep.subr.bf16.mxu0 %v2587_v0  ;;  %1944 = vmatprep.subr.bf16.mxu1 %v2587_v0 }
  0xa5   : > { %1909 = vmatpush3.bf16.msra.mxu0 %v2348_v8  ;;  %1945 = vmatpush3.bf16.msra.mxu1 %v2348_v8 }
  0xa6   : > { %1966 = vmatprep.subr.bf16.mxu0 %v2587_v0  ;;  %2002 = vmatprep.subr.bf16.mxu1 %v2587_v0 }
  0xa8   : > { %1911 = vmatmul.mubr.bf16.vlgmr.msra.gmra.mrb[0].mxu0 %v356_v13  ;;  %1947 = vmatmul.mubr.bf16.vlgmr.msra.gmra.mrb[0].mxu1 %v514_v14 }
  0xa9   : > { %1914 = vmatprep.mubr.msk.bf16.mxu0 %vm2588_vm0, %v2587_v0  ;;  %1950 = vmatprep.mubr.msk.bf16.mxu1 %vm2588_vm0, %v2587_v0 }
  0xaa   : > { %1967 = vmatpush3.bf16.msra.mxu0 %v2349_v15  ;;  %2003 = vmatpush3.bf16.msra.mxu1 %v2349_v15  ;;  %v2359_v15 = vld [vmem:[#allocation7 + $0x50] sm:$0xff]  }
  0xab   : > { %1968 = vmatprep.subr.bf16.mxu0 %v2587_v0  ;;  %2004 = vmatprep.subr.bf16.mxu1 %v2587_v0 }
  0xae   : > { %1969 = vmatpush3.bf16.msra.mxu0 %v2350_v20  ;;  %2005 = vmatpush3.bf16.msra.mxu1 %v2350_v20  ;;  %v2360_v20 = vld [vmem:[#allocation7 + $0x58] sm:$0xff]  }
  0xaf   : > { %1970 = vmatprep.subr.bf16.mxu0 %v2587_v0  ;;  %2006 = vmatprep.subr.bf16.mxu1 %v2587_v0 }
  0xb0   : > { %1915 = vmatmul.mubr.bf16.gmra.mrb[4].mxu0 %v357_v21  ;;  %1951 = vmatmul.mubr.bf16.gmra.mrb[4].mxu1 %v515_v22 }
  0xb1   : > { %1918 = vmatprep.mubr.msk.bf16.mxu0 %vm2588_vm0, %v2587_v0  ;;  %1954 = vmatprep.mubr.msk.bf16.mxu1 %vm2588_vm0, %v2587_v0 }
  0xb2   : > { %1971 = vmatpush3.bf16.msra.mxu0 %v2351_v23  ;;  %2007 = vmatpush3.bf16.msra.mxu1 %v2351_v23 }
  0xb3   : > { %1972 = vmatprep.subr.bf16.mxu0 %v2587_v0  ;;  %2008 = vmatprep.subr.bf16.mxu1 %v2587_v0 }
  0xb6   : > { %1973 = vmatpush3.bf16.msra.mxu0 %v2352_v28  ;;  %2009 = vmatpush3.bf16.msra.mxu1 %v2352_v28 }
  0xb7   : > { %1974 = vmatprep.subr.bf16.mxu0 %v2587_v0  ;;  %2010 = vmatprep.subr.bf16.mxu1 %v2587_v0 }
  0xb8   : > { %1919 = vmatmul.mubr.bf16.gmra.mrb[8].mxu0 %v358_v29  ;;  %1955 = vmatmul.mubr.bf16.gmra.mrb[8].mxu1 %v516_v30 }
  0xb9   : > { %1922 = vmatprep.mubr.msk.bf16.mxu0 %vm2588_vm0, %v2587_v0  ;;  %1958 = vmatprep.mubr.msk.bf16.mxu1 %vm2588_vm0, %v2587_v0 }
  0xba   : > { %1975 = vmatpush3.bf16.msra.mxu0 %v2353_v31  ;;  %2011 = vmatpush3.bf16.msra.mxu1 %v2353_v31  ;;  %v2361_v31 = vld [vmem:[#allocation7 + $0x60] sm:$0xff]  }
  0xbb   : > { %1976 = vmatprep.subr.bf16.mxu0 %v2587_v0  ;;  %2012 = vmatprep.subr.bf16.mxu1 %v2587_v0 }
  0xbe   : > { %1977 = vmatpush3.bf16.msra.mxu0 %v2354_v36  ;;  %2013 = vmatpush3.bf16.msra.mxu1 %v2354_v36  ;;  %v2362_v36 = vld [vmem:[#allocation7 + $0x68] sm:$0xff]  }
  0xbf   : > { %1978 = vmatprep.subr.bf16.mxu0 %v2587_v0  ;;  %2014 = vmatprep.subr.bf16.mxu1 %v2587_v0 }
  0xc0   : > { %1923 = vmatmul.mubr.bf16.gmra.mrb[12].mxu0 %v359_v37  ;;  %1959 = vmatmul.mubr.bf16.gmra.mrb[12].mxu1 %v517_v38 }
  0xc1   : > { %1926 = vmatprep.mubr.msk.bf16.mxu0 %vm2588_vm0, %v2587_v0  ;;  %1962 = vmatprep.mubr.msk.bf16.mxu1 %vm2588_vm0, %v2587_v0 }
  0xc2   : > { %1979 = vmatpush3.bf16.msra.mxu0 %v2355_v39  ;;  %2015 = vmatpush3.bf16.msra.mxu1 %v2355_v39 }
  0xc3   : > { %1980 = vmatprep.subr.bf16.mxu0 %v2587_v0  ;;  %2016 = vmatprep.subr.bf16.mxu1 %v2587_v0 }
  0xc6   : > { %1981 = vmatpush3.bf16.msra.mxu0 %v2356_v46  ;;  %2017 = vmatpush3.bf16.msra.mxu1 %v2356_v46 }
  0xc7   : > { %2038 = vmatprep.subr.bf16.mxu0 %v2587_v0  ;;  %2074 = vmatprep.subr.bf16.mxu1 %v2587_v0 }
  0xc8   : > { %1927 = vmatmul.mubr.bf16.gmra.mrb[16].mxu0 %v360_v44  ;;  %1963 = vmatmul.mubr.bf16.gmra.mrb[16].mxu1 %v518_v45 }
  0xc9   : > { %1982 = vmatprep.mubr.msk.bf16.mxu0 %vm2588_vm0, %v2587_v0  ;;  %2018 = vmatprep.mubr.msk.bf16.mxu1 %vm2588_vm0, %v2587_v0 }
 0x17b   : > { %v465_v48 = vpop.f32.mrb[0].mxu0  ;;  %v553_v49 = vpop.f32.mrb[0].mxu1 }
 0x17c   : > { %v1912_v50 = vpop.f32.mrb[1].mxu0  ;;  %v1948_v51 = vpop.f32.mrb[1].mxu1  ;;  %v466_v54 = vadd.f32 %v2935_v47, %v465_v48  ;;  %v554_v55 = vadd.f32 %v2935_v47, %v553_v49  ;;  %v2363_v48 = vld [vmem:[#allocation7 + $0x70] sm:$0xff]  }
 0x17d   : > { %v468_v52 = vpop.f32.mrb[2].mxu0  ;;  %v556_v53 = vpop.f32.mrb[2].mxu1 }
 0x17e   : > { %v469_v56 = vadd.f32 %v2935_v47, %v468_v52  ;;  %v557_v57 = vadd.f32 %v2935_v47, %v556_v53  ;;  %v1913_v58 = vpop.f32.mrb[3].mxu0  ;;  %v1949_v59 = vpop.f32.mrb[3].mxu1 }
 0x180   : > { %v609_v60 = vpack.c.bf16 %v469_v56, %v466_v54  ;;  %v739_v61 = vpack.c.bf16 %v557_v57, %v554_v55 }
 0x182   : > { %1983 = vmatmul.mubr.bf16.vlgmr.msra.gmra.mrb[20].mxu0 %v609_v60  ;;  %2019 = vmatmul.mubr.bf16.vlgmr.msra.gmra.mrb[20].mxu1 %v739_v61 }
 0x183   : > { %v473_v63 = vpop.f32.mrb[4].mxu0  ;;  %v561_v1 = vpop.f32.mrb[4].mxu1  ;;  %1986 = vmatprep.mubr.msk.bf16.mxu0 %vm2588_vm0, %v2587_v0  ;;  %2022 = vmatprep.mubr.msk.bf16.mxu1 %vm2588_vm0, %v2587_v0 }
 0x184   : > { %v1916_v2 = vpop.f32.mrb[5].mxu0  ;;  %v1952_v3 = vpop.f32.mrb[5].mxu1  ;;  %2039 = vmatpush3.bf16.msra.mxu0 %v2357_v62  ;;  %2075 = vmatpush3.bf16.msra.mxu1 %v2357_v62  ;;  %v474_v7 = vadd.f32 %v2935_v47, %v473_v63  ;;  %v562_v8 = vadd.f32 %v2935_v47, %v561_v1  ;;  %v2364_v63 = vld [vmem:[#allocation7 + $0x78] sm:$0xff]  }
 0x185   : > { %v476_v5 = vpop.f32.mrb[6].mxu0  ;;  %v564_v6 = vpop.f32.mrb[6].mxu1  ;;  %2040 = vmatprep.subr.bf16.mxu0 %v2587_v0  ;;  %2076 = vmatprep.subr.bf16.mxu1 %v2587_v0 }
 0x186   : > { %v477_v9 = vadd.f32 %v2935_v47, %v476_v5  ;;  %v565_v10 = vadd.f32 %v2935_v47, %v564_v6  ;;  %v1917_v11 = vpop.f32.mrb[7].mxu0  ;;  %v1953_v12 = vpop.f32.mrb[7].mxu1 }
 0x188   : > { %v610_v13 = vpack.c.bf16 %v477_v9, %v474_v7  ;;  %v740_v14 = vpack.c.bf16 %v565_v10, %v562_v8  ;;  %2041 = vmatpush3.bf16.msra.mxu0 %v2358_v4  ;;  %2077 = vmatpush3.bf16.msra.mxu1 %v2358_v4 }
 0x189   : > { %2042 = vmatprep.subr.bf16.mxu0 %v2587_v0  ;;  %2078 = vmatprep.subr.bf16.mxu1 %v2587_v0 }
 0x18a   : > { %1987 = vmatmul.mubr.bf16.gmra.mrb[24].mxu0 %v610_v13  ;;  %2023 = vmatmul.mubr.bf16.gmra.mrb[24].mxu1 %v740_v14 }
 0x18b   : > { %v481_v16 = vpop.f32.mrb[8].mxu0  ;;  %v569_v17 = vpop.f32.mrb[8].mxu1  ;;  %1990 = vmatprep.mubr.msk.bf16.mxu0 %vm2588_vm0, %v2587_v0  ;;  %2026 = vmatprep.mubr.msk.bf16.mxu1 %vm2588_vm0, %v2587_v0 }
 0x18c   : > { %v1920_v18 = vpop.f32.mrb[9].mxu0  ;;  %v1956_v19 = vpop.f32.mrb[9].mxu1  ;;  %2043 = vmatpush3.bf16.msra.mxu0 %v2359_v15  ;;  %2079 = vmatpush3.bf16.msra.mxu1 %v2359_v15  ;;  %v482_v23 = vadd.f32 %v2935_v47, %v481_v16  ;;  %v570_v24 = vadd.f32 %v2935_v47, %v569_v17  ;;  %v2365_v15 = vld [vmem:[#allocation7 + $0x80] sm:$0xff]  }
 0x18d   : > { %v484_v21 = vpop.f32.mrb[10].mxu0  ;;  %v572_v22 = vpop.f32.mrb[10].mxu1  ;;  %2044 = vmatprep.subr.bf16.mxu0 %v2587_v0  ;;  %2080 = vmatprep.subr.bf16.mxu1 %v2587_v0 }
 0x18e   : > { %v485_v25 = vadd.f32 %v2935_v47, %v484_v21  ;;  %v573_v26 = vadd.f32 %v2935_v47, %v572_v22  ;;  %v1921_v27 = vpop.f32.mrb[11].mxu0  ;;  %v1957_v28 = vpop.f32.mrb[11].mxu1 }
 0x190   : > { %v611_v29 = vpack.c.bf16 %v485_v25, %v482_v23  ;;  %v741_v30 = vpack.c.bf16 %v573_v26, %v570_v24  ;;  %2045 = vmatpush3.bf16.msra.mxu0 %v2360_v20  ;;  %2081 = vmatpush3.bf16.msra.mxu1 %v2360_v20  ;;  %v2366_v20 = vld [vmem:[#allocation7 + $0x88] sm:$0xff]  }
 0x191   : > { %2046 = vmatprep.subr.bf16.mxu0 %v2587_v0  ;;  %2082 = vmatprep.subr.bf16.mxu1 %v2587_v0 }
 0x192   : > { %1991 = vmatmul.mubr.bf16.gmra.mrb[28].mxu0 %v611_v29  ;;  %2027 = vmatmul.mubr.bf16.gmra.mrb[28].mxu1 %v741_v30 }
 0x193   : > { %v489_v32 = vpop.f32.mrb[12].mxu0  ;;  %v577_v33 = vpop.f32.mrb[12].mxu1  ;;  %1994 = vmatprep.mubr.msk.bf16.mxu0 %vm2588_vm0, %v2587_v0  ;;  %2030 = vmatprep.mubr.msk.bf16.mxu1 %vm2588_vm0, %v2587_v0 }
 0x194   : > { %v1924_v34 = vpop.f32.mrb[13].mxu0  ;;  %v1960_v35 = vpop.f32.mrb[13].mxu1  ;;  %2047 = vmatpush3.bf16.msra.mxu0 %v2361_v31  ;;  %2083 = vmatpush3.bf16.msra.mxu1 %v2361_v31  ;;  %v490_v39 = vadd.f32 %v2935_v47, %v489_v32  ;;  %v578_v40 = vadd.f32 %v2935_v47, %v577_v33  ;;  %v2367_v31 = vld [vmem:[#allocation7 + $0x90] sm:$0xff]  }
 0x195   : > { %v492_v37 = vpop.f32.mrb[14].mxu0  ;;  %v580_v38 = vpop.f32.mrb[14].mxu1  ;;  %2048 = vmatprep.subr.bf16.mxu0 %v2587_v0  ;;  %2084 = vmatprep.subr.bf16.mxu1 %v2587_v0 }
 0x196   : > { %v493_v41 = vadd.f32 %v2935_v47, %v492_v37  ;;  %v581_v42 = vadd.f32 %v2935_v47, %v580_v38  ;;  %v1925_v43 = vpop.f32.mrb[15].mxu0  ;;  %v1961_v44 = vpop.f32.mrb[15].mxu1 }
 0x198   : > { %v612_v45 = vpack.c.bf16 %v493_v41, %v490_v39  ;;  %v742_v46 = vpack.c.bf16 %v581_v42, %v578_v40  ;;  %2049 = vmatpush3.bf16.msra.mxu0 %v2362_v36  ;;  %2085 = vmatpush3.bf16.msra.mxu1 %v2362_v36  ;;  %v2368_v36 = vld [vmem:[#allocation7 + $0x98] sm:$0xff]  }
 0x199   : > { %2050 = vmatprep.subr.bf16.mxu0 %v2587_v0  ;;  %2086 = vmatprep.subr.bf16.mxu1 %v2587_v0 }
 0x19a   : > { %1995 = vmatmul.mubr.bf16.gmra.mrb[32].mxu0 %v612_v45  ;;  %2031 = vmatmul.mubr.bf16.gmra.mrb[32].mxu1 %v742_v46 }
 0x19b   : > { %v497_v49 = vpop.f32.mrb[16].mxu0  ;;  %v585_v50 = vpop.f32.mrb[16].mxu1  ;;  %1998 = vmatprep.mubr.msk.bf16.mxu0 %vm2588_vm0, %v2587_v0  ;;  %2034 = vmatprep.mubr.msk.bf16.mxu1 %vm2588_vm0, %v2587_v0 }
 0x19c   : > { %v1928_v51 = vpop.f32.mrb[17].mxu0  ;;  %v1964_v52 = vpop.f32.mrb[17].mxu1  ;;  %2051 = vmatpush3.bf16.msra.mxu0 %v2363_v48  ;;  %2087 = vmatpush3.bf16.msra.mxu1 %v2363_v48  ;;  %v498_v55 = vadd.f32 %v2935_v47, %v497_v49  ;;  %v586_v56 = vadd.f32 %v2935_v47, %v585_v50  ;;  %v2369_v48 = vld [vmem:[#allocation7 + $0xa0] sm:$0xff]  }
 0x19d   : > { %v500_v53 = vpop.f32.mrb[18].mxu0  ;;  %v588_v54 = vpop.f32.mrb[18].mxu1  ;;  %2052 = vmatprep.subr.bf16.mxu0 %v2587_v0  ;;  %2088 = vmatprep.subr.bf16.mxu1 %v2587_v0 }
 0x19e   : > { %v501_v57 = vadd.f32 %v2935_v47, %v500_v53  ;;  %v589_v58 = vadd.f32 %v2935_v47, %v588_v54  ;;  %v1929_v59 = vpop.f32.mrb[19].mxu0  ;;  %v1965_v60 = vpop.f32.mrb[19].mxu1  ;;  %v2996_v47 = vld [vmem:[%s3258_s4] ss:$0 sm:$0xff]  ;;  %v2370_v53 = vld [vmem:[#allocation7 + $0xa8] sm:$0xff]  }
 0x1a0   : > { %v613_v61 = vpack.c.bf16 %v501_v57, %v498_v55  ;;  %v743_v62 = vpack.c.bf16 %v589_v58, %v586_v56  ;;  %2053 = vmatpush3.bf16.msra.mxu0 %v2364_v63  ;;  %2089 = vmatpush3.bf16.msra.mxu1 %v2364_v63 }
 0x1a1   : > { %2110 = vmatprep.subr.bf16.mxu0 %v2587_v0  ;;  %2146 = vmatprep.subr.bf16.mxu1 %v2587_v0 }
 0x1a2   : > { %1999 = vmatmul.mubr.bf16.gmra.mrb[36].mxu0 %v613_v61  ;;  %2035 = vmatmul.mubr.bf16.gmra.mrb[36].mxu1 %v743_v62 }
 0x1a3   : > { %2054 = vmatprep.mubr.msk.bf16.mxu0 %vm2588_vm0, %v2587_v0  ;;  %2090 = vmatprep.mubr.msk.bf16.mxu1 %vm2588_vm0, %v2587_v0 }
 0x255   : > { %v700_v1 = vpop.f32.mrb[20].mxu0  ;;  %v778_v2 = vpop.f32.mrb[20].mxu1 }
 0x256   : > { %v1984_v3 = vpop.f32.mrb[21].mxu0  ;;  %v2020_v4 = vpop.f32.mrb[21].mxu1  ;;  %v701_v7 = vadd.f32 %v2996_v47, %v700_v1  ;;  %v779_v8 = vadd.f32 %v2996_v47, %v778_v2  ;;  %v2371_v1 = vld [vmem:[#allocation7 + $0xb0] sm:$0xff]  }
 0x257   : > { %v703_v5 = vpop.f32.mrb[22].mxu0  ;;  %v781_v6 = vpop.f32.mrb[22].mxu1 }
 0x258   : > { %v704_v9 = vadd.f32 %v2996_v47, %v703_v5  ;;  %v782_v10 = vadd.f32 %v2996_v47, %v781_v6  ;;  %v1985_v11 = vpop.f32.mrb[23].mxu0  ;;  %v2021_v12 = vpop.f32.mrb[23].mxu1 }
 0x25a   : > { %v835_v13 = vpack.c.bf16 %v704_v9, %v701_v7  ;;  %v965_v14 = vpack.c.bf16 %v782_v10, %v779_v8 }
 0x25c   : > { %2055 = vmatmul.mubr.bf16.vlgmr.msra.gmra.mrb[40].mxu0 %v835_v13  ;;  %2091 = vmatmul.mubr.bf16.vlgmr.msra.gmra.mrb[40].mxu1 %v965_v14 }
 0x25d   : > { %v708_v16 = vpop.f32.mrb[24].mxu0  ;;  %v786_v17 = vpop.f32.mrb[24].mxu1  ;;  %2058 = vmatprep.mubr.msk.bf16.mxu0 %vm2588_vm0, %v2587_v0  ;;  %2094 = vmatprep.mubr.msk.bf16.mxu1 %vm2588_vm0, %v2587_v0 }
 0x25e   : > { %v1988_v18 = vpop.f32.mrb[25].mxu0  ;;  %v2024_v19 = vpop.f32.mrb[25].mxu1  ;;  %2111 = vmatpush3.bf16.msra.mxu0 %v2365_v15  ;;  %2147 = vmatpush3.bf16.msra.mxu1 %v2365_v15  ;;  %v709_v23 = vadd.f32 %v2996_v47, %v708_v16  ;;  %v787_v24 = vadd.f32 %v2996_v47, %v786_v17  ;;  %v2372_v16 = vld [vmem:[#allocation7 + $0xb8] sm:$0xff]  }
 0x25f   : > { %v711_v21 = vpop.f32.mrb[26].mxu0  ;;  %v789_v22 = vpop.f32.mrb[26].mxu1  ;;  %2112 = vmatprep.subr.bf16.mxu0 %v2587_v0  ;;  %2148 = vmatprep.subr.bf16.mxu1 %v2587_v0 }
 0x260   : > { %v712_v25 = vadd.f32 %v2996_v47, %v711_v21  ;;  %v790_v26 = vadd.f32 %v2996_v47, %v789_v22  ;;  %v1989_v27 = vpop.f32.mrb[27].mxu0  ;;  %v2025_v28 = vpop.f32.mrb[27].mxu1 }
 0x262   : > { %v836_v29 = vpack.c.bf16 %v712_v25, %v709_v23  ;;  %v966_v30 = vpack.c.bf16 %v790_v26, %v787_v24  ;;  %2113 = vmatpush3.bf16.msra.mxu0 %v2366_v20  ;;  %2149 = vmatpush3.bf16.msra.mxu1 %v2366_v20 }
 0x263   : > { %2114 = vmatprep.subr.bf16.mxu0 %v2587_v0  ;;  %2150 = vmatprep.subr.bf16.mxu1 %v2587_v0 }
 0x264   : > { %2059 = vmatmul.mubr.bf16.gmra.mrb[44].mxu0 %v836_v29  ;;  %2095 = vmatmul.mubr.bf16.gmra.mrb[44].mxu1 %v966_v30 }
 0x265   : > { %v716_v32 = vpop.f32.mrb[28].mxu0  ;;  %v794_v33 = vpop.f32.mrb[28].mxu1  ;;  %2062 = vmatprep.mubr.msk.bf16.mxu0 %vm2588_vm0, %v2587_v0  ;;  %2098 = vmatprep.mubr.msk.bf16.mxu1 %vm2588_vm0, %v2587_v0 }
 0x266   : > { %v1992_v34 = vpop.f32.mrb[29].mxu0  ;;  %v2028_v35 = vpop.f32.mrb[29].mxu1  ;;  %2115 = vmatpush3.bf16.msra.mxu0 %v2367_v31  ;;  %2151 = vmatpush3.bf16.msra.mxu1 %v2367_v31  ;;  %v717_v39 = vadd.f32 %v2996_v47, %v716_v32  ;;  %v795_v40 = vadd.f32 %v2996_v47, %v794_v33  ;;  %v2373_v31 = vld [vmem:[#allocation8] sm:$0xff]  }
 0x267   : > { %v719_v37 = vpop.f32.mrb[30].mxu0  ;;  %v797_v38 = vpop.f32.mrb[30].mxu1  ;;  %2116 = vmatprep.subr.bf16.mxu0 %v2587_v0  ;;  %2152 = vmatprep.subr.bf16.mxu1 %v2587_v0  ;;  %v2374_v32 = vld [vmem:[#allocation8] sm:$0xff]  }
 0x268   : > { %v720_v41 = vadd.f32 %v2996_v47, %v719_v37  ;;  %v798_v42 = vadd.f32 %v2996_v47, %v797_v38  ;;  %v1993_v43 = vpop.f32.mrb[31].mxu0  ;;  %v2029_v44 = vpop.f32.mrb[31].mxu1  ;;  %v2375_v37 = vld [vmem:[#allocation8 + $0x8] sm:$0xff]  }
 0x269   : > { %v2376_v38 = vld [vmem:[#allocation8 + $0x8] sm:$0xff]  }
 0x26a   : > { %v837_v45 = vpack.c.bf16 %v720_v41, %v717_v39  ;;  %v967_v46 = vpack.c.bf16 %v798_v42, %v795_v40  ;;  %2117 = vmatpush3.bf16.msra.mxu0 %v2368_v36  ;;  %2153 = vmatpush3.bf16.msra.mxu1 %v2368_v36 }
 0x26b   : > { %2118 = vmatprep.subr.bf16.mxu0 %v2587_v0  ;;  %2154 = vmatprep.subr.bf16.mxu1 %v2587_v0 }
 0x26c   : > { %2063 = vmatmul.mubr.bf16.gmra.mrb[48].mxu0 %v837_v45  ;;  %2099 = vmatmul.mubr.bf16.gmra.mrb[48].mxu1 %v967_v46 }
 0x26d   : > { %v724_v49 = vpop.f32.mrb[32].mxu0  ;;  %v802_v50 = vpop.f32.mrb[32].mxu1  ;;  %2066 = vmatprep.mubr.msk.bf16.mxu0 %vm2588_vm0, %v2587_v0  ;;  %2102 = vmatprep.mubr.msk.bf16.mxu1 %vm2588_vm0, %v2587_v0 }
 0x26e   : > { %v1996_v51 = vpop.f32.mrb[33].mxu0  ;;  %v2032_v52 = vpop.f32.mrb[33].mxu1  ;;  %2119 = vmatpush3.bf16.msra.mxu0 %v2369_v48  ;;  %2155 = vmatpush3.bf16.msra.mxu1 %v2369_v48  ;;  %v725_v56 = vadd.f32 %v2996_v47, %v724_v49  ;;  %v803_v57 = vadd.f32 %v2996_v47, %v802_v50  ;;  %v2377_v50 = vld [vmem:[#allocation8 + $0x10] sm:$0xff]  }
 0x26f   : > { %v727_v54 = vpop.f32.mrb[34].mxu0  ;;  %v805_v55 = vpop.f32.mrb[34].mxu1  ;;  %2120 = vmatprep.subr.bf16.mxu0 %v2587_v0  ;;  %2156 = vmatprep.subr.bf16.mxu1 %v2587_v0  ;;  %v2378_v51 = vld [vmem:[#allocation8 + $0x10] sm:$0xff]  }
 0x270   : > { %v728_v58 = vadd.f32 %v2996_v47, %v727_v54  ;;  %v806_v59 = vadd.f32 %v2996_v47, %v805_v55  ;;  %v1997_v60 = vpop.f32.mrb[35].mxu0  ;;  %v2033_v61 = vpop.f32.mrb[35].mxu1 }
 0x272   : > { %v838_v62 = vpack.c.bf16 %v728_v58, %v725_v56  ;;  %v968_v63 = vpack.c.bf16 %v806_v59, %v803_v57  ;;  %2121 = vmatpush3.bf16.msra.mxu0 %v2370_v53  ;;  %2157 = vmatpush3.bf16.msra.mxu1 %v2370_v53  ;;  %v2379_v56 = vld [vmem:[#allocation8 + $0x18] sm:$0xff]  }
 0x273   : > { %2122 = vmatprep.subr.bf16.mxu0 %v2587_v0  ;;  %2158 = vmatprep.subr.bf16.mxu1 %v2587_v0  ;;  %v2380_v57 = vld [vmem:[#allocation8 + $0x18] sm:$0xff]  }
 0x274   : > { %2067 = vmatmul.mubr.bf16.gmra.mrb[52].mxu0 %v838_v62  ;;  %2103 = vmatmul.mubr.bf16.gmra.mrb[52].mxu1 %v968_v63 }
 0x275   : > { %v732_v2 = vpop.f32.mrb[36].mxu0  ;;  %v810_v3 = vpop.f32.mrb[36].mxu1  ;;  %2070 = vmatprep.mubr.msk.bf16.mxu0 %vm2588_vm0, %v2587_v0  ;;  %2106 = vmatprep.mubr.msk.bf16.mxu1 %vm2588_vm0, %v2587_v0 }
 0x276   : > { %v2000_v4 = vpop.f32.mrb[37].mxu0  ;;  %v2036_v5 = vpop.f32.mrb[37].mxu1  ;;  %2123 = vmatpush3.bf16.msra.mxu0 %v2371_v1  ;;  %2159 = vmatpush3.bf16.msra.mxu1 %v2371_v1  ;;  %v733_v8 = vadd.f32 %v2996_v47, %v732_v2  ;;  %v811_v9 = vadd.f32 %v2996_v47, %v810_v3 }
 0x277   : > { %v735_v6 = vpop.f32.mrb[38].mxu0  ;;  %v813_v7 = vpop.f32.mrb[38].mxu1  ;;  %2124 = vmatprep.subr.bf16.mxu0 %v2587_v0  ;;  %2160 = vmatprep.subr.bf16.mxu1 %v2587_v0  ;;  %v2381_v5 = vld [vmem:[#allocation8 + $0x20] sm:$0xff]  }
 0x278   : > { %v736_v10 = vadd.f32 %v2996_v47, %v735_v6  ;;  %v814_v11 = vadd.f32 %v2996_v47, %v813_v7  ;;  %v2001_v12 = vpop.f32.mrb[39].mxu0  ;;  %v2037_v13 = vpop.f32.mrb[39].mxu1  ;;  %v3057_v47 = vld [vmem:[%s3258_s4 + $0x1] ss:$0 sm:$0xff] }
 0x279   : > { %v2382_v6 = vld [vmem:[#allocation8 + $0x20] sm:$0xff]   ;;  %v2384_v12 = vld [vmem:[#allocation8 + $0x28] sm:$0xff]  }
 0x27a   : > { %v839_v14 = vpack.c.bf16 %v736_v10, %v733_v8  ;;  %v969_v15 = vpack.c.bf16 %v814_v11, %v811_v9  ;;  %2125 = vmatpush3.bf16.msra.mxu0 %v2372_v16  ;;  %2161 = vmatpush3.bf16.msra.mxu1 %v2372_v16  ;;  %v2383_v11 = vld [vmem:[#allocation8 + $0x28] sm:$0xff]  }
 0x27b   : > { %2182 = vmatprep.subr.bf16.mxu0 %v2587_v0  ;;  %2218 = vmatprep.subr.bf16.mxu1 %v2587_v0 }
 0x27c   : > { %2071 = vmatmul.mubr.bf16.gmra.mrb[56].mxu0 %v839_v14  ;;  %2107 = vmatmul.mubr.bf16.gmra.mrb[56].mxu1 %v969_v15 }
 0x27d   : > { %2126 = vmatprep.mubr.msk.bf16.mxu0 %vm2588_vm0, %v2587_v0  ;;  %2162 = vmatprep.mubr.msk.bf16.mxu1 %vm2588_vm0, %v2587_v0 }
 0x32f   : > { %v926_v17 = vpop.f32.mrb[40].mxu0  ;;  %v1004_v18 = vpop.f32.mrb[40].mxu1 }
 0x330   : > { %v2056_v19 = vpop.f32.mrb[41].mxu0  ;;  %v2092_v20 = vpop.f32.mrb[41].mxu1  ;;  %v927_v23 = vadd.f32 %v3057_v47, %v926_v17  ;;  %v1005_v24 = vadd.f32 %v3057_v47, %v1004_v18 }
 0x331   : > { %v929_v21 = vpop.f32.mrb[42].mxu0  ;;  %v1007_v22 = vpop.f32.mrb[42].mxu1 }
 0x332   : > { %v930_v25 = vadd.f32 %v3057_v47, %v929_v21  ;;  %v1008_v26 = vadd.f32 %v3057_v47, %v1007_v22  ;;  %v2057_v27 = vpop.f32.mrb[43].mxu0  ;;  %v2093_v28 = vpop.f32.mrb[43].mxu1 }
 0x334   : > { %v1061_v29 = vpack.c.bf16 %v930_v25, %v927_v23  ;;  %v1191_v30 = vpack.c.bf16 %v1008_v26, %v1005_v24  ;;  %v2385_v23 = vld [vmem:[#allocation8 + $0x30] sm:$0xff]  }
 0x335   : > { %v2386_v24 = vld [vmem:[#allocation8 + $0x30] sm:$0xff]  }
 0x336   : > { %2127 = vmatmul.mubr.bf16.vlgmr.msra.gmra.mrb[60].mxu0 %v1061_v29  ;;  %2163 = vmatmul.mubr.bf16.vlgmr.msra.gmra.mrb[60].mxu1 %v1191_v30 }
 0x337   : > { %v934_v33 = vpop.f32.mrb[44].mxu0  ;;  %v1012_v34 = vpop.f32.mrb[44].mxu1  ;;  %2130 = vmatprep.mubr.msk.bf16.mxu0 %vm2588_vm0, %v2587_v0  ;;  %2166 = vmatprep.mubr.msk.bf16.mxu1 %vm2588_vm0, %v2587_v0 }
 0x338   : > { %v2060_v35 = vpop.f32.mrb[45].mxu0  ;;  %v2096_v36 = vpop.f32.mrb[45].mxu1  ;;  %2183 = vmatpush3.bf16.msra.mxu0 %v2373_v31  ;;  %2219 = vmatpush3.bf16.msra.mxu1 %v2374_v32  ;;  %v935_v41 = vadd.f32 %v3057_v47, %v934_v33  ;;  %v1013_v42 = vadd.f32 %v3057_v47, %v1012_v34 }
 0x339   : > { %v937_v39 = vpop.f32.mrb[46].mxu0  ;;  %v1015_v40 = vpop.f32.mrb[46].mxu1  ;;  %2184 = vmatprep.subr.bf16.mxu0 %v2587_v0  ;;  %2220 = vmatprep.subr.bf16.mxu1 %v2587_v0 }
 0x33a   : > { %v938_v43 = vadd.f32 %v3057_v47, %v937_v39  ;;  %v1016_v44 = vadd.f32 %v3057_v47, %v1015_v40  ;;  %v2061_v45 = vpop.f32.mrb[47].mxu0  ;;  %v2097_v46 = vpop.f32.mrb[47].mxu1  ;;  %v2387_v39 = vld [vmem:[#allocation8 + $0x38] sm:$0xff]  }
 0x33b   : > { %v2388_v40 = vld [vmem:[#allocation8 + $0x38] sm:$0xff]  }
 0x33c   : > { %v1062_v48 = vpack.c.bf16 %v938_v43, %v935_v41  ;;  %v1192_v49 = vpack.c.bf16 %v1016_v44, %v1013_v42  ;;  %2185 = vmatpush3.bf16.msra.mxu0 %v2375_v37  ;;  %2221 = vmatpush3.bf16.msra.mxu1 %v2376_v38 }
 0x33d   : > { %2186 = vmatprep.subr.bf16.mxu0 %v2587_v0  ;;  %2222 = vmatprep.subr.bf16.mxu1 %v2587_v0 }
 0x33e   : > { %2131 = vmatmul.mubr.bf16.gmra.mrb[64].mxu0 %v1062_v48  ;;  %2167 = vmatmul.mubr.bf16.gmra.mrb[64].mxu1 %v1192_v49 }
 0x33f   : > { %v942_v52 = vpop.f32.mrb[48].mxu0  ;;  %v1020_v53 = vpop.f32.mrb[48].mxu1  ;;  %2134 = vmatprep.mubr.msk.bf16.mxu0 %vm2588_vm0, %v2587_v0  ;;  %2170 = vmatprep.mubr.msk.bf16.mxu1 %vm2588_vm0, %v2587_v0 }
 0x340   : > { %v2064_v54 = vpop.f32.mrb[49].mxu0  ;;  %v2100_v55 = vpop.f32.mrb[49].mxu1  ;;  %2187 = vmatpush3.bf16.msra.mxu0 %v2377_v50  ;;  %2223 = vmatpush3.bf16.msra.mxu1 %v2378_v51  ;;  %v943_v60 = vadd.f32 %v3057_v47, %v942_v52  ;;  %v1021_v61 = vadd.f32 %v3057_v47, %v1020_v53 }
 0x341   : > { %v945_v58 = vpop.f32.mrb[50].mxu0  ;;  %v1023_v59 = vpop.f32.mrb[50].mxu1  ;;  %2188 = vmatprep.subr.bf16.mxu0 %v2587_v0  ;;  %2224 = vmatprep.subr.bf16.mxu1 %v2587_v0 }
 0x342   : > { %v946_v62 = vadd.f32 %v3057_v47, %v945_v58  ;;  %v1024_v63 = vadd.f32 %v3057_v47, %v1023_v59  ;;  %v2065_v1 = vpop.f32.mrb[51].mxu0  ;;  %v2101_v2 = vpop.f32.mrb[51].mxu1 }
 0x344   : > { %v1063_v3 = vpack.c.bf16 %v946_v62, %v943_v60  ;;  %v1193_v4 = vpack.c.bf16 %v1024_v63, %v1021_v61  ;;  %2189 = vmatpush3.bf16.msra.mxu0 %v2379_v56  ;;  %2225 = vmatpush3.bf16.msra.mxu1 %v2380_v57 }
 0x345   : > { %2190 = vmatprep.subr.bf16.mxu0 %v2587_v0  ;;  %2226 = vmatprep.subr.bf16.mxu1 %v2587_v0 }
 0x346   : > { %2135 = vmatmul.mubr.bf16.gmra.mrb[68].mxu0 %v1063_v3  ;;  %2171 = vmatmul.mubr.bf16.gmra.mrb[68].mxu1 %v1193_v4 }
 0x347   : > { %v950_v7 = vpop.f32.mrb[52].mxu0  ;;  %v1028_v8 = vpop.f32.mrb[52].mxu1  ;;  %2138 = vmatprep.mubr.msk.bf16.mxu0 %vm2588_vm0, %v2587_v0  ;;  %2174 = vmatprep.mubr.msk.bf16.mxu1 %vm2588_vm0, %v2587_v0 }
 0x348   : > { %v2068_v9 = vpop.f32.mrb[53].mxu0  ;;  %v2104_v10 = vpop.f32.mrb[53].mxu1  ;;  %2191 = vmatpush3.bf16.msra.mxu0 %v2381_v5  ;;  %2227 = vmatpush3.bf16.msra.mxu1 %v2382_v6  ;;  %v951_v15 = vadd.f32 %v3057_v47, %v950_v7  ;;  %v1029_v16 = vadd.f32 %v3057_v47, %v1028_v8 }
 0x349   : > { %v953_v13 = vpop.f32.mrb[54].mxu0  ;;  %v1031_v14 = vpop.f32.mrb[54].mxu1  ;;  %2192 = vmatprep.subr.bf16.mxu0 %v2587_v0  ;;  %2228 = vmatprep.subr.bf16.mxu1 %v2587_v0 }
 0x34a   : > { %v954_v17 = vadd.f32 %v3057_v47, %v953_v13  ;;  %v1032_v18 = vadd.f32 %v3057_v47, %v1031_v14  ;;  %v2069_v19 = vpop.f32.mrb[55].mxu0  ;;  %v2105_v20 = vpop.f32.mrb[55].mxu1 }
 0x34c   : > { %v1064_v21 = vpack.c.bf16 %v954_v17, %v951_v15  ;;  %v1194_v22 = vpack.c.bf16 %v1032_v18, %v1029_v16  ;;  %2193 = vmatpush3.bf16.msra.mxu0 %v2383_v11  ;;  %2229 = vmatpush3.bf16.msra.mxu1 %v2384_v12 }
 0x34d   : > { %2194 = vmatprep.subr.bf16.mxu0 %v2587_v0  ;;  %2230 = vmatprep.subr.bf16.mxu1 %v2587_v0 }
 0x34e   : > { %2139 = vmatmul.mubr.bf16.gmra.mrb[72].mxu0 %v1064_v21  ;;  %2175 = vmatmul.mubr.bf16.gmra.mrb[72].mxu1 %v1194_v22 }
 0x34f   : > { %v958_v25 = vpop.f32.mrb[56].mxu0  ;;  %v1036_v26 = vpop.f32.mrb[56].mxu1  ;;  %2142 = vmatprep.mubr.msk.bf16.mxu0 %vm2588_vm0, %v2587_v0  ;;  %2178 = vmatprep.mubr.msk.bf16.mxu1 %vm2588_vm0, %v2587_v0 }
 0x350   : > { %v2072_v27 = vpop.f32.mrb[57].mxu0  ;;  %v2108_v28 = vpop.f32.mrb[57].mxu1  ;;  %2195 = vmatpush3.bf16.msra.mxu0 %v2385_v23  ;;  %2231 = vmatpush3.bf16.msra.mxu1 %v2386_v24  ;;  %v959_v31 = vadd.f32 %v3057_v47, %v958_v25  ;;  %v1037_v32 = vadd.f32 %v3057_v47, %v1036_v26 }
 0x351   : > { %v961_v29 = vpop.f32.mrb[58].mxu0  ;;  %v1039_v30 = vpop.f32.mrb[58].mxu1  ;;  %2196 = vmatprep.subr.bf16.mxu0 %v2587_v0  ;;  %2232 = vmatprep.subr.bf16.mxu1 %v2587_v0 }
 0x352   : > { %v962_v33 = vadd.f32 %v3057_v47, %v961_v29  ;;  %v1040_v34 = vadd.f32 %v3057_v47, %v1039_v30  ;;  %v2073_v35 = vpop.f32.mrb[59].mxu0  ;;  %v2109_v36 = vpop.f32.mrb[59].mxu1  ;;  %v3116_v47 = vld [vmem:[%s3258_s4 + $0x2] ss:$0 sm:$0xff] }
 0x354   : > { %v1065_v37 = vpack.c.bf16 %v962_v33, %v959_v31  ;;  %v1195_v38 = vpack.c.bf16 %v1040_v34, %v1037_v32  ;;  %2197 = vmatpush3.bf16.msra.mxu0 %v2387_v39  ;;  %2233 = vmatpush3.bf16.msra.mxu1 %v2388_v40 }
 0x356   : > { %2143 = vmatmul.mubr.bf16.gmra.mrb[76].mxu0 %v1065_v37  ;;  %2179 = vmatmul.mubr.bf16.gmra.mrb[76].mxu1 %v1195_v38 }
 0x357   : > { %2198 = vmatprep.mubr.msk.bf16.mxu0 %vm2588_vm0, %v2587_v0  ;;  %2234 = vmatprep.mubr.msk.bf16.mxu1 %vm2588_vm0, %v2587_v0 }
 0x409   : > { %v1152_v41 = vpop.f32.mrb[60].mxu0  ;;  %v1230_v42 = vpop.f32.mrb[60].mxu1 }
 0x40a   : > { %v2128_v43 = vpop.f32.mrb[61].mxu0  ;;  %v2164_v44 = vpop.f32.mrb[61].mxu1  ;;  %v1153_v48 = vadd.f32 %v3116_v47, %v1152_v41  ;;  %v1231_v49 = vadd.f32 %v3116_v47, %v1230_v42 }
 0x40b   : > { %v1155_v45 = vpop.f32.mrb[62].mxu0  ;;  %v1233_v46 = vpop.f32.mrb[62].mxu1 }
 0x40c   : > { %v1156_v50 = vadd.f32 %v3116_v47, %v1155_v45  ;;  %v1234_v51 = vadd.f32 %v3116_v47, %v1233_v46  ;;  %v2129_v52 = vpop.f32.mrb[63].mxu0  ;;  %v2165_v53 = vpop.f32.mrb[63].mxu1 }
 0x40e   : > { %v1269_v54 = vpack.c.bf16 %v1156_v50, %v1153_v48  ;;  %v1427_v55 = vpack.c.bf16 %v1234_v51, %v1231_v49 }
 0x410   : > { %2199 = vmatmul.mubr.bf16.vlgmr.msra.gmra.mrb[80].mxu0 %v1269_v54  ;;  %2235 = vmatmul.mubr.bf16.vlgmr.msra.gmra.mrb[80].mxu1 %v1427_v55 }
 0x411   : > { %v1160_v56 = vpop.f32.mrb[64].mxu0  ;;  %v1238_v57 = vpop.f32.mrb[64].mxu1  ;;  %2202 = vmatprep.mubr.msk.bf16.mxu0 %vm2588_vm0, %v2587_v0  ;;  %2238 = vmatprep.mubr.msk.bf16.mxu1 %vm2588_vm0, %v2587_v0 }
 0x412   : > { %v2132_v58 = vpop.f32.mrb[65].mxu0  ;;  %v2168_v59 = vpop.f32.mrb[65].mxu1  ;;  %v1161_v62 = vadd.f32 %v3116_v47, %v1160_v56  ;;  %v1239_v63 = vadd.f32 %v3116_v47, %v1238_v57 }
 0x413   : > { %v1163_v60 = vpop.f32.mrb[66].mxu0  ;;  %v1241_v61 = vpop.f32.mrb[66].mxu1 }
 0x414   : > { %v1164_v1 = vadd.f32 %v3116_v47, %v1163_v60  ;;  %v1242_v2 = vadd.f32 %v3116_v47, %v1241_v61  ;;  %v2133_v3 = vpop.f32.mrb[67].mxu0  ;;  %v2169_v4 = vpop.f32.mrb[67].mxu1 }
 0x416   : > { %v1270_v5 = vpack.c.bf16 %v1164_v1, %v1161_v62  ;;  %v1428_v6 = vpack.c.bf16 %v1242_v2, %v1239_v63 }
 0x418   : > { %2203 = vmatmul.mubr.bf16.gmra.mrb[84].mxu0 %v1270_v5  ;;  %2239 = vmatmul.mubr.bf16.gmra.mrb[84].mxu1 %v1428_v6 }
 0x419   : > { %v1168_v7 = vpop.f32.mrb[68].mxu0  ;;  %v1246_v8 = vpop.f32.mrb[68].mxu1  ;;  %2206 = vmatprep.mubr.msk.bf16.mxu0 %vm2588_vm0, %v2587_v0  ;;  %2242 = vmatprep.mubr.msk.bf16.mxu1 %vm2588_vm0, %v2587_v0 }
 0x41a   : > { %v2136_v9 = vpop.f32.mrb[69].mxu0  ;;  %v2172_v10 = vpop.f32.mrb[69].mxu1  ;;  %v1169_v13 = vadd.f32 %v3116_v47, %v1168_v7  ;;  %v1247_v14 = vadd.f32 %v3116_v47, %v1246_v8 }
 0x41b   : > { %v1171_v11 = vpop.f32.mrb[70].mxu0  ;;  %v1249_v12 = vpop.f32.mrb[70].mxu1 }
 0x41c   : > { %v1172_v15 = vadd.f32 %v3116_v47, %v1171_v11  ;;  %v1250_v16 = vadd.f32 %v3116_v47, %v1249_v12  ;;  %v2137_v17 = vpop.f32.mrb[71].mxu0  ;;  %v2173_v18 = vpop.f32.mrb[71].mxu1 }
 0x41e   : > { %v1271_v19 = vpack.c.bf16 %v1172_v15, %v1169_v13  ;;  %v1429_v20 = vpack.c.bf16 %v1250_v16, %v1247_v14 }
 0x420   : > { %2207 = vmatmul.mubr.bf16.gmra.mrb[88].mxu0 %v1271_v19  ;;  %2243 = vmatmul.mubr.bf16.gmra.mrb[88].mxu1 %v1429_v20 }
 0x421   : > { %v1176_v21 = vpop.f32.mrb[72].mxu0  ;;  %v1254_v22 = vpop.f32.mrb[72].mxu1  ;;  %2210 = vmatprep.mubr.msk.bf16.mxu0 %vm2588_vm0, %v2587_v0  ;;  %2246 = vmatprep.mubr.msk.bf16.mxu1 %vm2588_vm0, %v2587_v0 }
 0x422   : > { %v2140_v23 = vpop.f32.mrb[73].mxu0  ;;  %v2176_v24 = vpop.f32.mrb[73].mxu1  ;;  %v1177_v27 = vadd.f32 %v3116_v47, %v1176_v21  ;;  %v1255_v28 = vadd.f32 %v3116_v47, %v1254_v22 }
 0x423   : > { %v1179_v25 = vpop.f32.mrb[74].mxu0  ;;  %v1257_v26 = vpop.f32.mrb[74].mxu1 }
 0x424   : > { %v1180_v29 = vadd.f32 %v3116_v47, %v1179_v25  ;;  %v1258_v30 = vadd.f32 %v3116_v47, %v1257_v26  ;;  %v2141_v31 = vpop.f32.mrb[75].mxu0  ;;  %v2177_v32 = vpop.f32.mrb[75].mxu1 }
 0x426   : > { %v1272_v33 = vpack.c.bf16 %v1180_v29, %v1177_v27  ;;  %v1430_v34 = vpack.c.bf16 %v1258_v30, %v1255_v28 }
 0x428   : > { %2211 = vmatmul.mubr.bf16.gmra.mrb[92].mxu0 %v1272_v33  ;;  %2247 = vmatmul.mubr.bf16.gmra.mrb[92].mxu1 %v1430_v34 }
 0x429   : > { %v1184_v35 = vpop.f32.mrb[76].mxu0  ;;  %v1262_v36 = vpop.f32.mrb[76].mxu1  ;;  %2214 = vmatprep.mubr.msk.bf16.mxu0 %vm2588_vm0, %v2587_v0  ;;  %2250 = vmatprep.mubr.msk.bf16.mxu1 %vm2588_vm0, %v2587_v0  ;;  %v3157_v0 = vld [vmem:[%s3260_s6] ss:$0 sm:$0xff] }
 0x42a   : > { %v2144_v37 = vpop.f32.mrb[77].mxu0  ;;  %v2180_v38 = vpop.f32.mrb[77].mxu1  ;;  %v1185_v41 = vadd.f32 %v3116_v47, %v1184_v35  ;;  %v1263_v42 = vadd.f32 %v3116_v47, %v1262_v36 }
 0x42b   : > { %v1187_v39 = vpop.f32.mrb[78].mxu0  ;;  %v1265_v40 = vpop.f32.mrb[78].mxu1 }
 0x42c   : > { %v1188_v43 = vadd.f32 %v3116_v47, %v1187_v39  ;;  %v1266_v44 = vadd.f32 %v3116_v47, %v1265_v40  ;;  %v2145_v45 = vpop.f32.mrb[79].mxu0  ;;  %v2181_v46 = vpop.f32.mrb[79].mxu1 }
 0x42e   : > { %v1273_v48 = vpack.c.bf16 %v1188_v43, %v1185_v41  ;;  %v1431_v49 = vpack.c.bf16 %v1266_v44, %v1263_v42 }
 0x430   : > { %2215 = vmatmul.mubr.bf16.gmra.mrb[96].mxu0 %v1273_v48  ;;  %2251 = vmatmul.mubr.bf16.gmra.mrb[96].mxu1 %v1431_v49 }
 0x4e3   : > { %v1378_v50 = vpop.f32.mrb[80].mxu0  ;;  %v1530_v51 = vpop.f32.mrb[80].mxu1 }
 0x4e4   : > { %v1379_v52 = vadd.f32 %v3157_v0, %v1378_v50  ;;  %v1531_v53 = vadd.f32 %v3157_v0, %v1530_v51  ;;  %v2200_v54 = vpop.f32.mrb[81].mxu0  ;;  %v2236_v47 = vpop.f32.mrb[81].mxu1 }
 0x4e5   : > { %v1381_v55 = vpop.f32.mrb[82].mxu0  ;;  %v1533_v56 = vpop.f32.mrb[82].mxu1 }
 0x4e6   : > { %1417 = vst [vmem:[%s3163_s17] sm:$0xff] %v1379_v52  ;;  %1569 = vst [vmem:[%s3163_s17 + $0x50] sm:$0xff] %v1531_v53  ;;  %v1382_v57 = vadd.f32 %v3157_v0, %v1381_v55  ;;  %v1534_v58 = vadd.f32 %v3157_v0, %v1533_v56  ;;  %v2201_v59 = vpop.f32.mrb[83].mxu0  ;;  %v2237_v60 = vpop.f32.mrb[83].mxu1 }
 0x4e8   : > { %1418 = vst [vmem:[%s3163_s17 + $0x8] sm:$0xff] %v1382_v57  ;;  %1570 = vst [vmem:[%s3163_s17 + $0x58] sm:$0xff] %v1534_v58 }
 0x4eb   : > { %v1386_v61 = vpop.f32.mrb[84].mxu0  ;;  %v1538_v62 = vpop.f32.mrb[84].mxu1 }
 0x4ec   : > { %v1387_v63 = vadd.f32 %v3157_v0, %v1386_v61  ;;  %v1539_v1 = vadd.f32 %v3157_v0, %v1538_v62  ;;  %v2204_v2 = vpop.f32.mrb[85].mxu0  ;;  %v2240_v3 = vpop.f32.mrb[85].mxu1 }
 0x4ed   : > { %v1389_v4 = vpop.f32.mrb[86].mxu0  ;;  %v1541_v5 = vpop.f32.mrb[86].mxu1 }
 0x4ee   : > { %1419 = vst [vmem:[%s3163_s17 + $0x10] sm:$0xff] %v1387_v63  ;;  %1571 = vst [vmem:[%s3163_s17 + $0x60] sm:$0xff] %v1539_v1  ;;  %v1390_v6 = vadd.f32 %v3157_v0, %v1389_v4  ;;  %v1542_v7 = vadd.f32 %v3157_v0, %v1541_v5  ;;  %v2205_v8 = vpop.f32.mrb[87].mxu0  ;;  %v2241_v9 = vpop.f32.mrb[87].mxu1 }
 0x4f0   : > { %1420 = vst [vmem:[%s3163_s17 + $0x18] sm:$0xff] %v1390_v6  ;;  %1572 = vst [vmem:[%s3163_s17 + $0x68] sm:$0xff] %v1542_v7 }
 0x4f3   : > { %v1394_v10 = vpop.f32.mrb[88].mxu0  ;;  %v1546_v11 = vpop.f32.mrb[88].mxu1 }
 0x4f4   : > { %v1395_v12 = vadd.f32 %v3157_v0, %v1394_v10  ;;  %v1547_v13 = vadd.f32 %v3157_v0, %v1546_v11  ;;  %v2208_v14 = vpop.f32.mrb[89].mxu0  ;;  %v2244_v15 = vpop.f32.mrb[89].mxu1 }
 0x4f5   : > { %v1397_v16 = vpop.f32.mrb[90].mxu0  ;;  %v1549_v17 = vpop.f32.mrb[90].mxu1 }
 0x4f6   : > { %1421 = vst [vmem:[%s3163_s17 + $0x20] sm:$0xff] %v1395_v12  ;;  %1573 = vst [vmem:[%s3163_s17 + $0x70] sm:$0xff] %v1547_v13  ;;  %v1398_v18 = vadd.f32 %v3157_v0, %v1397_v16  ;;  %v1550_v19 = vadd.f32 %v3157_v0, %v1549_v17  ;;  %v2209_v20 = vpop.f32.mrb[91].mxu0  ;;  %v2245_v21 = vpop.f32.mrb[91].mxu1 }
 0x4f8   : > { %1422 = vst [vmem:[%s3163_s17 + $0x28] sm:$0xff] %v1398_v18  ;;  %1574 = vst [vmem:[%s3163_s17 + $0x78] sm:$0xff] %v1550_v19 }
 0x4fb   : > { %v1402_v22 = vpop.f32.mrb[92].mxu0  ;;  %v1554_v23 = vpop.f32.mrb[92].mxu1 }
 0x4fc   : > { %v1403_v24 = vadd.f32 %v3157_v0, %v1402_v22  ;;  %v1555_v25 = vadd.f32 %v3157_v0, %v1554_v23  ;;  %v2212_v26 = vpop.f32.mrb[93].mxu0  ;;  %v2248_v27 = vpop.f32.mrb[93].mxu1 }
 0x4fd   : > { %v1405_v28 = vpop.f32.mrb[94].mxu0  ;;  %v1557_v29 = vpop.f32.mrb[94].mxu1 }
 0x4fe   : > { %1423 = vst [vmem:[%s3163_s17 + $0x30] sm:$0xff] %v1403_v24  ;;  %1575 = vst [vmem:[%s3163_s17 + $0x80] sm:$0xff] %v1555_v25  ;;  %v1406_v30 = vadd.f32 %v3157_v0, %v1405_v28  ;;  %v1558_v31 = vadd.f32 %v3157_v0, %v1557_v29  ;;  %v2213_v32 = vpop.f32.mrb[95].mxu0  ;;  %v2249_v33 = vpop.f32.mrb[95].mxu1 }
 0x500   : > { %1424 = vst [vmem:[%s3163_s17 + $0x38] sm:$0xff] %v1406_v30  ;;  %1576 = vst [vmem:[%s3163_s17 + $0x88] sm:$0xff] %v1558_v31 }
 0x503   : > { %v1410_v34 = vpop.f32.mrb[96].mxu0  ;;  %v1562_v35 = vpop.f32.mrb[96].mxu1 }
 0x504   : > { %v1411_v36 = vadd.f32 %v3157_v0, %v1410_v34  ;;  %v1563_v37 = vadd.f32 %v3157_v0, %v1562_v35  ;;  %v2216_v38 = vpop.f32.mrb[97].mxu0  ;;  %v2252_v39 = vpop.f32.mrb[97].mxu1 }
 0x505   : > { %v1413_v40 = vpop.f32.mrb[98].mxu0  ;;  %v1565_v41 = vpop.f32.mrb[98].mxu1 }
 0x506   : > { %1425 = vst [vmem:[%s3163_s17 + $0x40] sm:$0xff] %v1411_v36  ;;  %1577 = vst [vmem:[%s3163_s17 + $0x90] sm:$0xff] %v1563_v37  ;;  %v1414_v42 = vadd.f32 %v3157_v0, %v1413_v40  ;;  %v1566_v43 = vadd.f32 %v3157_v0, %v1565_v41  ;;  %v2217_v44 = vpop.f32.mrb[99].mxu0  ;;  %v2253_v45 = vpop.f32.mrb[99].mxu1 }
 0x508   : > { %1426 = vst [vmem:[%s3163_s17 + $0x48] sm:$0xff] %v1414_v42  ;;  %1578 = vst [vmem:[%s3163_s17 + $0x98] sm:$0xff] %v1566_v43 }
 0x509   : > { %2516 = shalt.err (!%p2513_p4)
}
 0x50a   : > { %s2517_s16 = scalar_lea.hbm %s3202_s9, 2560  ;;  %s2521_s8 = scalar_lea.hbm %s3261_s7, 5120 }
 0x50b   : > { %p2518_p9 = scmp.ne.s32.totalorder %s3202_s9, %s2517_s16  ;;  %p2522_p8 = scmp.lt.u32.totalorder %s3202_s9, %s3261_s7 }
 0x50c   : > { %p2523_p13 = scmp.lt.u32.totalorder %s2521_s8, %s2517_s16  ;;  %p2525_p10 = scmp.lt.u32.totalorder %s2517_s16, %s3202_s9 }
 0x50d   : > { %p2519_p0 = pnand %p2518_p9, %p2786_p5 }
 0x50e   : > { %p2524_p6 = por %p2523_p13, %p2522_p8 }
 0x50f   : > { %p2520_p11 = pneg %p2519_p0 }
 0x510   : > { %p2526_p3 = por %p2525_p10, %p2524_p6 }
 0x512   : > { %p2527_p7 = pnand %p2526_p3, %p2520_p11 }
 0x514   : > { %2530 = shalt.err (!%p2527_p7)
}
 0x515   : > { %s2590_s20 = smov 128   ;;  %s2591_s30 = smov 8  }
 0x516   : > { %2270 = dma.vmem_to_hbm [thread:$0]  (%p2786_p5), %s3204_s15, 2560, %s3202_s9, %s1580_s28, %s2590_s20, %s2590_s20, %s2591_s30  }
 0x517 PF: > { %s3281_s23 = sld [smem:[#allocation15_spill]]  ;;  %s1608_s29 = sand.u32 1, %s2565_s24  }
 0x518   : > { %p3283_p1 = scmp.ge.s32.totalorder %s2577_s27, 2  ;;  %s1609_s11 = scalar_lea.sflag [#allocation4], %s1608_s29 }
 0x51d   : > { %p3282_p12 = scmp.ne.s32.totalorder %s3281_s23, 0 }
 0x51f   : > { %p2287_p2 = pnand %p3283_p1, %p3282_p12 }
 0x521   : > { %2560 = dma.done.wait (!%p2287_p2), %s1609_s11, 2560  }
 0x522   : > { %2562 = vsyncadd (!%p2287_p2), %s1609_s11, 4294964736  ;;  %p22_p4 = scmp.ge.s32.totalorder %s2772_s22, 4   ;;  %s3284_s24 = smov %s2569_s25 }
 0x523   : > { %s3285_s25 = smov %s2573_s26  ;;  %s3286_s26 = smov %s2782_s18 }
 0x524   : > { %s3287_s27 = smov %s2772_s22  ;;  %24 = sbr.rel (!%p22_p4) target bundleno = 7 (0x7), region = 107 }
 0x52b   :  { %1614 = vsyncpa [#allocation3], 1 }
 0x52c   :  { %1616 = vsyncpa [#allocation3 + $0x1], 1 }
 0x52d   :  { %1617 = vsyncpa [#allocation6], 1 }
 0x52e   :  { %1618 = vsyncpa [#allocation9], 1 }
 0x52f   :  { %1619 = vsyncpa [#allocation4], 1 }
 0x530   :  { %1621 = vsyncpa [#allocation4 + $0x1], 1 }

</bundles_post_ra>
